<compile_context>
chip_gen: v7x
topology: tpu7x:2x2x1
jax: 0.10.0
libtpu: 0.0.40
codegen_flags: <defaults>
</compile_context>

<pallas_src>
import jax
import jax.numpy as jnp
from jax.experimental import pallas as pl
from jax.experimental.pallas import tpu as pltpu


_CONV_VMEM = 32 * 1024 * 1024   # explicit scoped-VMEM budget; safe on v5e/v6e/v7x


# ----------------------------- GroupNorm + SiLU -----------------------------

def _gn_stats_kernel(x_ref, sum_ref, sq_ref):
    # x_ref: (1, ts, C) f32.  sum_ref / sq_ref: (1, 1, C) f32, resident across the
    # last ("arbitrary") S-tile grid axis -> per-channel sum / sum-of-squares in one
    # read of the block.
    @pl.when(pl.program_id(1) == 0)
    def _():
        sum_ref[...] = jnp.zeros_like(sum_ref)
        sq_ref[...] = jnp.zeros_like(sq_ref)

    x = x_ref[0]                                     # (ts, C)
    sum_ref[0] += jnp.sum(x, axis=0, keepdims=True)
    sq_ref[0] += jnp.sum(x * x, axis=0, keepdims=True)


def _gn_apply_silu_kernel(x_ref, sc_ref, sh_ref, o_ref):
    # y = x * scale + shift  (scale/shift fold gamma/beta and group statistics),
    # then SiLU.  Channels stay lane-dense; purely elementwise.
    x = x_ref[0]                                     # (ts, C) f32
    y = x * sc_ref[0] + sh_ref[0]
    o_ref[0] = (y * (1.0 / (1.0 + jnp.exp(-y)))).astype(o_ref.dtype)


def _pick_tile_s(s, max_rows=1024):
    """Largest multiple-of-8 divisor of s (<= max_rows) that gives >= 2 tiles."""
    for t in range(min(s // 2, max_rows), 7, -1):
        if s % t == 0 and t % 8 == 0:
            return t
    return s


def groupnorm_silu(x, gamma, beta, num_groups=32, eps=1e-5):
    """x: (B, S, C) channels-last f32.  Returns silu(GroupNorm(x)) in f32."""
    B, S, C = x.shape
    G = num_groups
    Cg = C // G
    ts = _pick_tile_s(S)
    n_s = S // ts

    sums, sqs = pl.pallas_call(
        _gn_stats_kernel,
        out_shape=(jax.ShapeDtypeStruct((B, 1, C), jnp.float32),
                   jax.ShapeDtypeStruct((B, 1, C), jnp.float32)),
        grid=(B, n_s),
        in_specs=[pl.BlockSpec((1, ts, C), lambda b, s: (b, s, 0))],
        out_specs=(pl.BlockSpec((1, 1, C), lambda b, s: (b, 0, 0)),
                   pl.BlockSpec((1, 1, C), lambda b, s: (b, 0, 0))),
        compiler_params=pltpu.CompilerParams(
            dimension_semantics=("parallel", "arbitrary")),
    )(x)

    # Tiny (B, G)-sized group combine + affine folding in plain JAX.
    n = float(Cg * S)
    gsum = sums.reshape(B, G, Cg).sum(-1)
    gsq = sqs.reshape(B, G, Cg).sum(-1)
    mean = gsum / n
    var = gsq / n - mean * mean                      # biased variance (GroupNorm)
    inv = jax.lax.rsqrt(var + eps)                   # (B, G)
    inv_c = jnp.repeat(inv, Cg, axis=1)              # (B, C)
    mean_c = jnp.repeat(mean, Cg, axis=1)
    scale = (inv_c * gamma[None, :]).reshape(B, 1, C)
    shift = (beta[None, :] - mean_c * inv_c * gamma[None, :]).reshape(B, 1, C)

    return pl.pallas_call(
        _gn_apply_silu_kernel,
        out_shape=jax.ShapeDtypeStruct((B, S, C), jnp.float32),
        grid=(B, n_s),
        in_specs=[pl.BlockSpec((1, ts, C), lambda b, s: (b, s, 0)),
                  pl.BlockSpec((1, 1, C), lambda b, s: (b, 0, 0)),
                  pl.BlockSpec((1, 1, C), lambda b, s: (b, 0, 0))],
        out_specs=pl.BlockSpec((1, ts, C), lambda b, s: (b, s, 0)),
        compiler_params=pltpu.CompilerParams(
            dimension_semantics=("parallel", "parallel")),
    )(x, scale, shift)


# ----------------------------- conv kernels (tap accumulation) -----------------------------

def _conv3d_kernel(x0_ref, x1_ref, x2_ref, w_ref, b_ref, o_ref):
    # x*_ref: (1, 1, Hp, Wp, Cin) f32 -- zero-padded frames t, t+1, t+2 (overlapping
    # windows selected via size-1 T blocks and element-shifted index_maps).
    # w_ref: (27, Cin, Cout) bf16 tap-major.  b_ref: (1, Cout) f32.
    Hp, Wp = x0_ref.shape[2], x0_ref.shape[3]
    H, W = Hp - 2, Wp - 2
    Cout = w_ref.shape[2]
    acc = jnp.zeros((H * W, Cout), jnp.float32)
    frames = (x0_ref, x1_ref, x2_ref)
    for kt in range(3):
        slab = frames[kt][0, 0]                      # (Hp, Wp, Cin) f32
        for kh in range(3):
            for kw in range(3):
                win = slab[kh:kh + H, kw:kw + W, :].reshape(H * W, -1)
                acc = acc + jnp.dot(win.astype(jnp.bfloat16),
                                    w_ref[(kt * 3 + kh) * 3 + kw],
                                    preferred_element_type=jnp.float32)
    o_ref[...] = (acc + b_ref[...]).reshape(1, 1, H, W, Cout)


def _accum_2d_taps(h_ref, w_ref, acc, H, W):
    slab = h_ref[0, 0]                               # (Hp, Wp, C) f32
    for kh in range(3):
        for kw in range(3):
            win = slab[kh:kh + H, kw:kw + W, :].reshape(H * W, -1)
            acc = acc + jnp.dot(win.astype(jnp.bfloat16), w_ref[3 * kh + kw],
                                preferred_element_type=jnp.float32)
    return acc


def _conv2d_nin_res_kernel(h_ref, x_ref, w_ref, b_ref, nw_ref, nb_ref, o_ref):
    # Fused: per-frame 3x3 conv2 (9 taps) + bias + 1x1x1 nin_shortcut(x) residual.
    Hp, Wp = h_ref.shape[2], h_ref.shape[3]
    H, W = Hp - 2, Wp - 2
    Cout = w_ref.shape[2]
    x = x_ref[0, 0].reshape(H * W, -1).astype(jnp.bfloat16)
    acc = jnp.dot(x, nw_ref[...], preferred_element_type=jnp.float32) + nb_ref[...]
    acc = _accum_2d_taps(h_ref, w_ref, acc, H, W)
    o_ref[...] = (acc + b_ref[...]).reshape(1, 1, H, W, Cout)


def _conv2d_id_res_kernel(h_ref, x_ref, w_ref, b_ref, o_ref):
    # Fused: per-frame 3x3 conv2 (9 taps) + bias + identity residual (Cin == Cout).
    Hp, Wp = h_ref.shape[2], h_ref.shape[3]
    H, W = Hp - 2, Wp - 2
    Cout = w_ref.shape[2]
    acc = x_ref[0, 0].reshape(H * W, Cout).astype(jnp.float32)
    acc = _accum_2d_taps(h_ref, w_ref, acc, H, W)
    o_ref[...] = (acc + b_ref[...]).reshape(1, 1, H, W, Cout)


# ----------------------------- conv wrappers -----------------------------

def conv3d_3x3x3(hp, wm, b):
    """hp: (B, T+2, H+2, W+2, Cin) f32 zero-padded.  wm: (27, Cin, Cout) bf16.
    Returns (B, T, H, W, Cout) f32."""
    B, Tp, Hp, Wp, Cin = hp.shape
    T, H, W = Tp - 2, Hp - 2, Wp - 2
    Cout = wm.shape[2]
    in_specs = [pl.BlockSpec((1, 1, Hp, Wp, Cin),
                             (lambda b_, t_, kt=kt: (b_, t_ + kt, 0, 0, 0)))
                for kt in range(3)]
    in_specs += [pl.BlockSpec((27, Cin, Cout), lambda b_, t_: (0, 0, 0)),
                 pl.BlockSpec((1, Cout), lambda b_, t_: (0, 0))]
    return pl.pallas_call(
        _conv3d_kernel,
        out_shape=jax.ShapeDtypeStruct((B, T, H, W, Cout), jnp.float32),
        grid=(B, T),
        in_specs=in_specs,
        out_specs=pl.BlockSpec((1, 1, H, W, Cout),
                               lambda b_, t_: (b_, t_, 0, 0, 0)),
        compiler_params=pltpu.CompilerParams(
            dimension_semantics=("parallel", "parallel"),
            vmem_limit_bytes=_CONV_VMEM),
    )(hp, hp, hp, wm, b)


def conv2d_3x3_res(hp, x, params, Cin, Cout):
    """Fused conv2 + bias + shortcut residual.
    hp: (B, T, H+2, W+2, Cout) f32 zero-padded.  x: (B, T, H, W, Cin) f32."""
    B, T, Hp, Wp, _ = hp.shape
    H, W = Hp - 2, Wp - 2
    frame = lambda b_, t_: (b_, t_, 0, 0, 0)
    in_specs = [pl.BlockSpec((1, 1, Hp, Wp, Cout), frame),
                pl.BlockSpec((1, 1, H, W, Cin), frame),
                pl.BlockSpec((9, Cout, Cout), lambda b_, t_: (0, 0, 0)),
                pl.BlockSpec((1, Cout), lambda b_, t_: (0, 0))]
    args = [hp, x, params["wm2"], params["b2"]]
    if Cin != Cout:
        kernel = _conv2d_nin_res_kernel
        in_specs += [pl.BlockSpec((Cin, Cout), lambda b_, t_: (0, 0)),
                     pl.BlockSpec((1, Cout), lambda b_, t_: (0, 0))]
        args += [params["nin_wm"], params["nin_b"]]
    else:
        kernel = _conv2d_id_res_kernel
    return pl.pallas_call(
        kernel,
        out_shape=jax.ShapeDtypeStruct((B, T, H, W, Cout), jnp.float32),
        grid=(B, T),
        in_specs=in_specs,
        out_specs=pl.BlockSpec((1, 1, H, W, Cout), frame),
        compiler_params=pltpu.CompilerParams(
            dimension_semantics=("parallel", "parallel"),
            vmem_limit_bytes=_CONV_VMEM),
    )(*args)


# ----------------------------- module forward -----------------------------

def resnet_block_3d_forward(x, params, num_groups=32):
    """ResnetBlock3D.forward (see header).  x: (B, C_in, T, H, W) f32 NCDHW."""
    B, Cin, T, H, W = x.shape
    Cout = params["wm1"].shape[2]
    S = T * H * W

    xl = jnp.transpose(x, (0, 2, 3, 4, 1))          # single relayout in

    # norm1 + SiLU (channels-last, no transpose around the kernel)
    h = groupnorm_silu(xl.reshape(B, S, Cin), params["norm1_gamma"],
                       params["norm1_beta"], num_groups)
    # conv1 (3x3x3): zero-pad once, then in-kernel tap accumulation (no im2col).
    h = jnp.pad(h.reshape(B, T, H, W, Cin),
                ((0, 0), (1, 1), (1, 1), (1, 1), (0, 0)))
    h = conv3d_3x3x3(h, params["wm1"], params["b1"])
    # TODO(synk): temb path not implemented (temb is None in this forward).

    # norm2 + SiLU
    h = groupnorm_silu(h.reshape(B, S, Cout), params["norm2_gamma"],
                       params["norm2_beta"], num_groups)
    # dropout: identity in eval mode.
    # conv2 (per-frame 3x3) + bias + (nin_shortcut(x) | x) residual, one fused kernel.
    h = jnp.pad(h.reshape(B, T, H, W, Cout),
                ((0, 0), (0, 0), (1, 1), (1, 1), (0, 0)))
    out = conv2d_3x3_res(h, xl, params, Cin, Cout)

    return jnp.transpose(out, (0, 4, 1, 2, 3))      # single relayout out


# ----------------------------- params & reference -----------------------------

def init_params(key, cin, cout):
    ks = jax.random.split(key, 10)

    def nrm(k, shape, scale):
        return scale * jax.random.normal(k, shape, jnp.float32)

    return {
        "norm1_gamma": 1.0 + nrm(ks[0], (cin,), 0.05),
        "norm1_beta": nrm(ks[1], (cin,), 0.05),
        "conv1_w": nrm(ks[2], (cout, cin, 3, 3, 3), 0.05),
        "conv1_b": nrm(ks[3], (cout,), 0.02),
        "norm2_gamma": 1.0 + nrm(ks[4], (cout,), 0.05),
        "norm2_beta": nrm(ks[5], (cout,), 0.05),
        "conv2_w": nrm(ks[6], (cout, cout, 3, 3), 0.05),
        "conv2_b": nrm(ks[7], (cout,), 0.02),
        "nin_w": nrm(ks[8], (cout, cin, 1, 1, 1), 0.1),
        "nin_b": nrm(ks[9], (cout,), 0.02),
    }


def prepare_params(raw):
    """One-time weight relayout: tap-major (K, Cin, Cout) bf16 matrices and (1, Cout)
    f32 biases (no per-call reshape/transpose of weights inside the forward)."""
    Cout, Cin = raw["conv1_w"].shape[:2]
    p = {
        "norm1_gamma": raw["norm1_gamma"],
        "norm1_beta": raw["norm1_beta"],
        "norm2_gamma": raw["norm2_gamma"],
        "norm2_beta": raw["norm2_beta"],
        "wm1": jnp.transpose(raw["conv1_w"], (2, 3, 4, 1, 0))
                  .reshape(27, Cin, Cout).astype(jnp.bfloat16),
        "b1": raw["conv1_b"].reshape(1, Cout).astype(jnp.float32),
        "wm2": jnp.transpose(raw["conv2_w"], (2, 3, 1, 0))
                  .reshape(9, Cout, Cout).astype(jnp.bfloat16),
        "b2": raw["conv2_b"].reshape(1, Cout).astype(jnp.float32),
    }
    if Cin != Cout:
        p["nin_wm"] = raw["nin_w"].reshape(Cout, Cin).T.astype(jnp.bfloat16)
        p["nin_b"] = raw["nin_b"].reshape(1, Cout).astype(jnp.float32)
    return p


def reference_forward(x, params, num_groups=32):
    """Pure-JAX (XLA) reference mirroring the PyTorch module, NCDHW layout."""
    hi = jax.lax.Precision.HIGHEST

    def gn(v, gamma, beta):
        B, C, T, H, W = v.shape
        vr = v.reshape(B, num_groups, -1)
        m = vr.mean(-1, keepdims=True)
        var = ((vr - m) ** 2).mean(-1, keepdims=True)
        vn = ((vr - m) / jnp.sqrt(var + 1e-5)).reshape(B, C, T, H, W)
        return vn * gamma[None, :, None, None, None] + beta[None, :, None, None, None]

    def silu(v):
        return v * jax.nn.sigmoid(v)

    def conv3d(v, w, b, pad):
        out = jax.lax.conv_general_dilated(
            v, w, window_strides=(1, 1, 1), padding=[(pad, pad)] * 3,
            dimension_numbers=("NCDHW", "OIDHW", "NCDHW"), precision=hi)
        return out + b[None, :, None, None, None]

    def conv2d_frames(v, w, b):
        B, C, T, H, W = v.shape
        vr = jnp.transpose(v, (0, 2, 1, 3, 4)).reshape(B * T, C, H, W)
        out = jax.lax.conv_general_dilated(
            vr, w, window_strides=(1, 1), padding=[(1, 1), (1, 1)],
            dimension_numbers=("NCHW", "OIHW", "NCHW"), precision=hi)
        out = out + b[None, :, None, None]
        Cout = w.shape[0]
        return jnp.transpose(out.reshape(B, T, Cout, H, W), (0, 2, 1, 3, 4))

    h = silu(gn(x, params["norm1_gamma"], params["norm1_beta"]))
    h = conv3d(h, params["conv1_w"], params["conv1_b"], pad=1)
    h = silu(gn(h, params["norm2_gamma"], params["norm2_beta"]))
    h = conv2d_frames(h, params["conv2_w"], params["conv2_b"])
    xs = conv3d(x, params["nin_w"], params["nin_b"], pad=0)
    return xs + h


# ----------------------------- main -----------------------------

if __name__ == "__main__":
    B, Cin, Cout, T, H, W = 2, 32, 64, 4, 8, 8   # GroupNorm(32) needs C % 32 == 0
    key = jax.random.PRNGKey(0)
    kx, kp = jax.random.split(key)
    x = jax.random.normal(kx, (B, Cin, T, H, W), jnp.float32)
    raw = init_params(kp, Cin, Cout)
    params = prepare_params(raw)

    out = jax.jit(resnet_block_3d_forward)(x, params)
    out = jax.block_until_ready(out)
    assert out.shape == (B, Cout, T, H, W)

    ref = reference_forward(x, raw)
    err = float(jnp.max(jnp.abs(out - ref)))
    # bf16 MXU inputs (f32 accumulate): tolerance loosened vs the pure-f32 path.
    assert err < 5e-2, f"mismatch vs reference: max abs err = {err}"
    print("KERNEL_OK")
</pallas_src>

<mosaic_0001>
module attributes {stable_mosaic.version = 11 : i64} {
  func.func @_gn_apply_silu_kernel(%arg0: i32, %arg1: i32, %arg2: memref<1x128x32xf32, #tpu.memory_space<vmem>>, %arg3: memref<1x1x32xf32, #tpu.memory_space<vmem>>, %arg4: memref<1x1x32xf32, #tpu.memory_space<vmem>>, %arg5: memref<1x128x32xf32, #tpu.memory_space<vmem>>) attributes {dimension_semantics = [#tpu.dimension_semantics<parallel>, #tpu.dimension_semantics<parallel>], iteration_bounds = array<i64: 2, 2>, scalar_prefetch = 0 : i64, scratch_operands = 0 : i64, tpu.core_type = #tpu.core_type<tc>, window_params = [{transform_indices = @transform_0, window_bounds = array<i64: 1, 128, 32>}, {transform_indices = @transform_1, window_bounds = array<i64: 1, 1, 32>}, {transform_indices = @transform_2, window_bounds = array<i64: 1, 1, 32>}, {transform_indices = @transform_3, window_bounds = array<i64: 1, 128, 32>}]} {
    %c0 = arith.constant 0 : index
    %c0_0 = arith.constant 0 : index
    %c0_1 = arith.constant 0 : index
    %0 = vector.load %arg2[%c0, %c0_0, %c0_1] : memref<1x128x32xf32, #tpu.memory_space<vmem>>, vector<1x128x32xf32>
    %1 = vector.shape_cast %0 : vector<1x128x32xf32> to vector<128x32xf32>
    %c0_2 = arith.constant 0 : index
    %c0_3 = arith.constant 0 : index
    %c0_4 = arith.constant 0 : index
    %2 = vector.load %arg3[%c0_2, %c0_3, %c0_4] : memref<1x1x32xf32, #tpu.memory_space<vmem>>, vector<1x1x32xf32>
    %3 = vector.shape_cast %2 : vector<1x1x32xf32> to vector<1x32xf32>
    %4 = vector.broadcast %3 : vector<1x32xf32> to vector<128x32xf32>
    %5 = arith.mulf %1, %4 : vector<128x32xf32>
    %c0_5 = arith.constant 0 : index
    %c0_6 = arith.constant 0 : index
    %c0_7 = arith.constant 0 : index
    %6 = vector.load %arg4[%c0_5, %c0_6, %c0_7] : memref<1x1x32xf32, #tpu.memory_space<vmem>>, vector<1x1x32xf32>
    %7 = vector.shape_cast %6 : vector<1x1x32xf32> to vector<1x32xf32>
    %8 = vector.broadcast %7 : vector<1x32xf32> to vector<128x32xf32>
    %9 = arith.addf %5, %8 : vector<128x32xf32>
    %cst = arith.constant 0.000000e+00 : f32
    %10 = vector.broadcast %cst : f32 to vector<128x32xf32>
    %11 = arith.subf %10, %9 : vector<128x32xf32>
    %12 = math.exp %11 : vector<128x32xf32>
    %cst_8 = arith.constant 1.000000e+00 : f32
    %13 = vector.broadcast %cst_8 : f32 to vector<128x32xf32>
    %14 = arith.addf %13, %12 : vector<128x32xf32>
    %cst_9 = arith.constant 1.000000e+00 : f32
    %15 = vector.broadcast %cst_9 : f32 to vector<128x32xf32>
    %16 = arith.divf %15, %14 : vector<128x32xf32>
    %17 = arith.mulf %9, %16 : vector<128x32xf32>
    %c0_10 = arith.constant 0 : index
    %c0_11 = arith.constant 0 : index
    %c0_12 = arith.constant 0 : index
    %18 = vector.load %arg5[%c0_10, %c0_11, %c0_12] : memref<1x128x32xf32, #tpu.memory_space<vmem>>, vector<1x128x32xf32>
    %19 = vector.shape_cast %18 : vector<1x128x32xf32> to vector<128x32xf32>
    %20 = vector.shape_cast %17 : vector<128x32xf32> to vector<1x128x32xf32>
    tpu.vector_store %arg5[%c0_10, %c0_11, %c0_12], %20 {strides = array<i32>} : memref<1x128x32xf32, #tpu.memory_space<vmem>>, vector<1x128x32xf32>,
    return
  }
  func.func @transform_0(%arg0: i32, %arg1: i32) -> (i32, i32, i32) {
    %c0_i32 = arith.constant 0 : i32
    %c0_i32_0 = arith.constant 0 : i32
    return %arg0, %arg1, %c0_i32 : i32, i32, i32
  }
  func.func @transform_1(%arg0: i32, %arg1: i32) -> (i32, i32, i32) {
    %c0_i32 = arith.constant 0 : i32
    %c0_i32_0 = arith.constant 0 : i32
    %c0_i32_1 = arith.constant 0 : i32
    return %arg0, %c0_i32, %c0_i32_0 : i32, i32, i32
  }
  func.func @transform_2(%arg0: i32, %arg1: i32) -> (i32, i32, i32) {
    %c0_i32 = arith.constant 0 : i32
    %c0_i32_0 = arith.constant 0 : i32
    %c0_i32_1 = arith.constant 0 : i32
    return %arg0, %c0_i32, %c0_i32_0 : i32, i32, i32
  }
  func.func @transform_3(%arg0: i32, %arg1: i32) -> (i32, i32, i32) {
    %c0_i32 = arith.constant 0 : i32
    %c0_i32_0 = arith.constant 0 : i32
    return %arg0, %arg1, %c0_i32 : i32, i32, i32
  }
}

module attributes {stable_mosaic.version = 11 : i64} {
  func.func @_gn_stats_kernel(%arg0: i32, %arg1: i32, %arg2: memref<1x128x32xf32, #tpu.memory_space<vmem>>, %arg3: memref<1x1x32xf32, #tpu.memory_space<vmem>>, %arg4: memref<1x1x32xf32, #tpu.memory_space<vmem>>) attributes {dimension_semantics = [#tpu.dimension_semantics<parallel>, #tpu.dimension_semantics<arbitrary>], iteration_bounds = array<i64: 2, 2>, scalar_prefetch = 0 : i64, scratch_operands = 0 : i64, tpu.core_type = #tpu.core_type<tc>, window_params = [{transform_indices = @transform_0, window_bounds = array<i64: 1, 128, 32>}, {transform_indices = @transform_1, window_bounds = array<i64: 1, 1, 32>}, {transform_indices = @transform_2, window_bounds = array<i64: 1, 1, 32>}]} {
    %c0_i32 = arith.constant 0 : i32
    %0 = arith.cmpi eq, %arg1, %c0_i32 : i32
    %1 = arith.extui %0 : i1 to i32
    %c0_i32_0 = arith.constant 0 : i32
    %2 = arith.cmpi ne, %1, %c0_i32_0 : i32
    scf.if %2 {
      %cst_16 = arith.constant 0.000000e+00 : f32
      %22 = vector.broadcast %cst_16 : f32 to vector<1x1x32xf32>
      %c0_17 = arith.constant 0 : index
      %c0_18 = arith.constant 0 : index
      %c0_19 = arith.constant 0 : index
      %23 = vector.load %arg3[%c0_17, %c0_18, %c0_19] : memref<1x1x32xf32, #tpu.memory_space<vmem>>, vector<1x1x32xf32>
      tpu.vector_store %arg3[%c0_17, %c0_18, %c0_19], %22 {strides = array<i32>} : memref<1x1x32xf32, #tpu.memory_space<vmem>>, vector<1x1x32xf32>,
      %cst_20 = arith.constant 0.000000e+00 : f32
      %24 = vector.broadcast %cst_20 : f32 to vector<1x1x32xf32>
      %c0_21 = arith.constant 0 : index
      %c0_22 = arith.constant 0 : index
      %c0_23 = arith.constant 0 : index
      %25 = vector.load %arg4[%c0_21, %c0_22, %c0_23] : memref<1x1x32xf32, #tpu.memory_space<vmem>>, vector<1x1x32xf32>
      tpu.vector_store %arg4[%c0_21, %c0_22, %c0_23], %24 {strides = array<i32>} : memref<1x1x32xf32, #tpu.memory_space<vmem>>, vector<1x1x32xf32>,
    } else {
    }
    %c0 = arith.constant 0 : index
    %c0_1 = arith.constant 0 : index
    %c0_2 = arith.constant 0 : index
    %3 = vector.load %arg2[%c0, %c0_1, %c0_2] : memref<1x128x32xf32, #tpu.memory_space<vmem>>, vector<1x128x32xf32>
    %4 = vector.shape_cast %3 : vector<1x128x32xf32> to vector<128x32xf32>
    %c0_3 = arith.constant 0 : index
    %c0_4 = arith.constant 0 : index
    %c0_5 = arith.constant 0 : index
    %5 = vector.load %arg3[%c0_3, %c0_4, %c0_5] : memref<1x1x32xf32, #tpu.memory_space<vmem>>, vector<1x1x32xf32>
    %6 = vector.shape_cast %5 : vector<1x1x32xf32> to vector<1x32xf32>
    %cst = arith.constant dense<0.000000e+00> : vector<32xf32>
    %7 = vector.multi_reduction <add>, %4, %cst [0] : vector<128x32xf32> to vector<32xf32>
    %8 = vector.shape_cast %7 : vector<32xf32> to vector<1x32xf32>
    %9 = arith.addf %6, %8 : vector<1x32xf32>
    %c0_6 = arith.constant 0 : index
    %c0_7 = arith.constant 0 : index
    %c0_8 = arith.constant 0 : index
    %10 = vector.load %arg3[%c0_6, %c0_7, %c0_8] : memref<1x1x32xf32, #tpu.memory_space<vmem>>, vector<1x1x32xf32>
    %11 = vector.shape_cast %10 : vector<1x1x32xf32> to vector<1x32xf32>
    %12 = vector.shape_cast %9 : vector<1x32xf32> to vector<1x1x32xf32>
    tpu.vector_store %arg3[%c0_6, %c0_7, %c0_8], %12 {strides = array<i32>} : memref<1x1x32xf32, #tpu.memory_space<vmem>>, vector<1x1x32xf32>,
    %c0_9 = arith.constant 0 : index
    %c0_10 = arith.constant 0 : index
    %c0_11 = arith.constant 0 : index
    %13 = vector.load %arg4[%c0_9, %c0_10, %c0_11] : memref<1x1x32xf32, #tpu.memory_space<vmem>>, vector<1x1x32xf32>
    %14 = vector.shape_cast %13 : vector<1x1x32xf32> to vector<1x32xf32>
    %15 = arith.mulf %4, %4 : vector<128x32xf32>
    %cst_12 = arith.constant dense<0.000000e+00> : vector<32xf32>
    %16 = vector.multi_reduction <add>, %15, %cst_12 [0] : vector<128x32xf32> to vector<32xf32>
    %17 = vector.shape_cast %16 : vector<32xf32> to vector<1x32xf32>
    %18 = arith.addf %14, %17 : vector<1x32xf32>
    %c0_13 = arith.constant 0 : index
    %c0_14 = arith.constant 0 : index
    %c0_15 = arith.constant 0 : index
    %19 = vector.load %arg4[%c0_13, %c0_14, %c0_15] : memref<1x1x32xf32, #tpu.memory_space<vmem>>, vector<1x1x32xf32>
    %20 = vector.shape_cast %19 : vector<1x1x32xf32> to vector<1x32xf32>
    %21 = vector.shape_cast %18 : vector<1x32xf32> to vector<1x1x32xf32>
    tpu.vector_store %arg4[%c0_13, %c0_14, %c0_15], %21 {strides = array<i32>} : memref<1x1x32xf32, #tpu.memory_space<vmem>>, vector<1x1x32xf32>,
    return
  }
  func.func @transform_0(%arg0: i32, %arg1: i32) -> (i32, i32, i32) {
    %c0_i32 = arith.constant 0 : i32
    %c0_i32_0 = arith.constant 0 : i32
    return %arg0, %arg1, %c0_i32 : i32, i32, i32
  }
  func.func @transform_1(%arg0: i32, %arg1: i32) -> (i32, i32, i32) {
    %c0_i32 = arith.constant 0 : i32
    %c0_i32_0 = arith.constant 0 : i32
    %c0_i32_1 = arith.constant 0 : i32
    return %arg0, %c0_i32, %c0_i32_0 : i32, i32, i32
  }
  func.func @transform_2(%arg0: i32, %arg1: i32) -> (i32, i32, i32) {
    %c0_i32 = arith.constant 0 : i32
    %c0_i32_0 = arith.constant 0 : i32
    %c0_i32_1 = arith.constant 0 : i32
    return %arg0, %c0_i32, %c0_i32_0 : i32, i32, i32
  }
}

module attributes {stable_mosaic.version = 11 : i64} {
  func.func @_conv3d_kernel(%arg0: i32, %arg1: i32, %arg2: memref<1x1x10x10x32xf32, #tpu.memory_space<vmem>>, %arg3: memref<1x1x10x10x32xf32, #tpu.memory_space<vmem>>, %arg4: memref<1x1x10x10x32xf32, #tpu.memory_space<vmem>>, %arg5: memref<27x32x64xbf16, #tpu.memory_space<vmem>>, %arg6: memref<1x64xf32, #tpu.memory_space<vmem>>, %arg7: memref<1x1x8x8x64xf32, #tpu.memory_space<vmem>>) attributes {dimension_semantics = [#tpu.dimension_semantics<parallel>, #tpu.dimension_semantics<parallel>], iteration_bounds = array<i64: 2, 4>, scalar_prefetch = 0 : i64, scratch_operands = 0 : i64, tpu.core_type = #tpu.core_type<tc>, window_params = [{transform_indices = @transform_0, window_bounds = array<i64: 1, 1, 10, 10, 32>}, {transform_indices = @transform_1, window_bounds = array<i64: 1, 1, 10, 10, 32>}, {transform_indices = @transform_2, window_bounds = array<i64: 1, 1, 10, 10, 32>}, {pipeline_mode = #tpu.pipeline_mode<synchronous>, transform_indices = @transform_3, window_bounds = array<i64: 27, 32, 64>}, {pipeline_mode = #tpu.pipeline_mode<synchronous>, transform_indices = @transform_4, window_bounds = array<i64: 1, 64>}, {transform_indices = @transform_5, window_bounds = array<i64: 1, 1, 8, 8, 64>}]} {
    %cst = arith.constant 0.000000e+00 : f32
    %0 = vector.broadcast %cst : f32 to vector<64x64xf32>
    %c0 = arith.constant 0 : index
    %c0_0 = arith.constant 0 : index
    %c0_1 = arith.constant 0 : index
    %c0_2 = arith.constant 0 : index
    %c0_3 = arith.constant 0 : index
    %1 = vector.load %arg2[%c0, %c0_0, %c0_1, %c0_2, %c0_3] : memref<1x1x10x10x32xf32, #tpu.memory_space<vmem>>, vector<1x1x10x10x32xf32>
    %2 = vector.shape_cast %1 : vector<1x1x10x10x32xf32> to vector<10x10x32xf32>
    %3 = vector.extract_strided_slice %2 {offsets = [0, 0, 0], sizes = [8, 8, 32], strides = [1, 1, 1]} : vector<10x10x32xf32> to vector<8x8x32xf32>
    %4 = vector.shape_cast %3 : vector<8x8x32xf32> to vector<64x32xf32>
    %5 = arith.truncf %4 : vector<64x32xf32> to vector<64x32xbf16>
    %c0_4 = arith.constant 0 : index
    %c0_5 = arith.constant 0 : index
    %c0_6 = arith.constant 0 : index
    %6 = vector.load %arg5[%c0_4, %c0_5, %c0_6] : memref<27x32x64xbf16, #tpu.memory_space<vmem>>, vector<1x32x64xbf16>
    %7 = vector.shape_cast %6 : vector<1x32x64xbf16> to vector<32x64xbf16>
    %cst_7 = arith.constant dense<0.000000e+00> : vector<64x64xf32>
    %8 = tpu.matmul %5, %7, %cst_7 {dimension_numbers = #tpu.dot_dimension_numbers<[1], [0], [0], [1], [0, 0, 1, 1], [], []>} : vector<64x32xbf16>, vector<32x64xbf16>, vector<64x64xf32> -> vector<64x64xf32>
    %9 = arith.addf %0, %8 : vector<64x64xf32>
    %10 = vector.extract_strided_slice %2 {offsets = [0, 1, 0], sizes = [8, 8, 32], strides = [1, 1, 1]} : vector<10x10x32xf32> to vector<8x8x32xf32>
    %11 = vector.shape_cast %10 : vector<8x8x32xf32> to vector<64x32xf32>
    %12 = arith.truncf %11 : vector<64x32xf32> to vector<64x32xbf16>
    %c1 = arith.constant 1 : index
    %c0_8 = arith.constant 0 : index
    %c0_9 = arith.constant 0 : index
    %13 = vector.load %arg5[%c1, %c0_8, %c0_9] : memref<27x32x64xbf16, #tpu.memory_space<vmem>>, vector<1x32x64xbf16>
    %14 = vector.shape_cast %13 : vector<1x32x64xbf16> to vector<32x64xbf16>
    %cst_10 = arith.constant dense<0.000000e+00> : vector<64x64xf32>
    %15 = tpu.matmul %12, %14, %cst_10 {dimension_numbers = #tpu.dot_dimension_numbers<[1], [0], [0], [1], [0, 0, 1, 1], [], []>} : vector<64x32xbf16>, vector<32x64xbf16>, vector<64x64xf32> -> vector<64x64xf32>
    %16 = arith.addf %9, %15 : vector<64x64xf32>
    %17 = vector.extract_strided_slice %2 {offsets = [0, 2, 0], sizes = [8, 8, 32], strides = [1, 1, 1]} : vector<10x10x32xf32> to vector<8x8x32xf32>
    %18 = vector.shape_cast %17 : vector<8x8x32xf32> to vector<64x32xf32>
    %19 = arith.truncf %18 : vector<64x32xf32> to vector<64x32xbf16>
    %c2 = arith.constant 2 : index
    %c0_11 = arith.constant 0 : index
    %c0_12 = arith.constant 0 : index
    %20 = vector.load %arg5[%c2, %c0_11, %c0_12] : memref<27x32x64xbf16, #tpu.memory_space<vmem>>, vector<1x32x64xbf16>
    %21 = vector.shape_cast %20 : vector<1x32x64xbf16> to vector<32x64xbf16>
    %cst_13 = arith.constant dense<0.000000e+00> : vector<64x64xf32>
    %22 = tpu.matmul %19, %21, %cst_13 {dimension_numbers = #tpu.dot_dimension_numbers<[1], [0], [0], [1], [0, 0, 1, 1], [], []>} : vector<64x32xbf16>, vector<32x64xbf16>, vector<64x64xf32> -> vector<64x64xf32>
    %23 = arith.addf %16, %22 : vector<64x64xf32>
    %24 = vector.extract_strided_slice %2 {offsets = [1, 0, 0], sizes = [8, 8, 32], strides = [1, 1, 1]} : vector<10x10x32xf32> to vector<8x8x32xf32>
    %25 = vector.shape_cast %24 : vector<8x8x32xf32> to vector<64x32xf32>
    %26 = arith.truncf %25 : vector<64x32xf32> to vector<64x32xbf16>
    %c3 = arith.constant 3 : index
    %c0_14 = arith.constant 0 : index
    %c0_15 = arith.constant 0 : index
    %27 = vector.load %arg5[%c3, %c0_14, %c0_15] : memref<27x32x64xbf16, #tpu.memory_space<vmem>>, vector<1x32x64xbf16>
    %28 = vector.shape_cast %27 : vector<1x32x64xbf16> to vector<32x64xbf16>
    %cst_16 = arith.constant dense<0.000000e+00> : vector<64x64xf32>
    %29 = tpu.matmul %26, %28, %cst_16 {dimension_numbers = #tpu.dot_dimension_numbers<[1], [0], [0], [1], [0, 0, 1, 1], [], []>} : vector<64x32xbf16>, vector<32x64xbf16>, vector<64x64xf32> -> vector<64x64xf32>
    %30 = arith.addf %23, %29 : vector<64x64xf32>
    %31 = vector.extract_strided_slice %2 {offsets = [1, 1, 0], sizes = [8, 8, 32], strides = [1, 1, 1]} : vector<10x10x32xf32> to vector<8x8x32xf32>
    %32 = vector.shape_cast %31 : vector<8x8x32xf32> to vector<64x32xf32>
    %33 = arith.truncf %32 : vector<64x32xf32> to vector<64x32xbf16>
    %c4 = arith.constant 4 : index
    %c0_17 = arith.constant 0 : index
    %c0_18 = arith.constant 0 : index
    %34 = vector.load %arg5[%c4, %c0_17, %c0_18] : memref<27x32x64xbf16, #tpu.memory_space<vmem>>, vector<1x32x64xbf16>
    %35 = vector.shape_cast %34 : vector<1x32x64xbf16> to vector<32x64xbf16>
    %cst_19 = arith.constant dense<0.000000e+00> : vector<64x64xf32>
    %36 = tpu.matmul %33, %35, %cst_19 {dimension_numbers = #tpu.dot_dimension_numbers<[1], [0], [0], [1], [0, 0, 1, 1], [], []>} : vector<64x32xbf16>, vector<32x64xbf16>, vector<64x64xf32> -> vector<64x64xf32>
    %37 = arith.addf %30, %36 : vector<64x64xf32>
    %38 = vector.extract_strided_slice %2 {offsets = [1, 2, 0], sizes = [8, 8, 32], strides = [1, 1, 1]} : vector<10x10x32xf32> to vector<8x8x32xf32>
    %39 = vector.shape_cast %38 : vector<8x8x32xf32> to vector<64x32xf32>
    %40 = arith.truncf %39 : vector<64x32xf32> to vector<64x32xbf16>
    %c5 = arith.constant 5 : index
    %c0_20 = arith.constant 0 : index
    %c0_21 = arith.constant 0 : index
    %41 = vector.load %arg5[%c5, %c0_20, %c0_21] : memref<27x32x64xbf16, #tpu.memory_space<vmem>>, vector<1x32x64xbf16>
    %42 = vector.shape_cast %41 : vector<1x32x64xbf16> to vector<32x64xbf16>
    %cst_22 = arith.constant dense<0.000000e+00> : vector<64x64xf32>
    %43 = tpu.matmul %40, %42, %cst_22 {dimension_numbers = #tpu.dot_dimension_numbers<[1], [0], [0], [1], [0, 0, 1, 1], [], []>} : vector<64x32xbf16>, vector<32x64xbf16>, vector<64x64xf32> -> vector<64x64xf32>
    %44 = arith.addf %37, %43 : vector<64x64xf32>
    %45 = vector.extract_strided_slice %2 {offsets = [2, 0, 0], sizes = [8, 8, 32], strides = [1, 1, 1]} : vector<10x10x32xf32> to vector<8x8x32xf32>
    %46 = vector.shape_cast %45 : vector<8x8x32xf32> to vector<64x32xf32>
    %47 = arith.truncf %46 : vector<64x32xf32> to vector<64x32xbf16>
    %c6 = arith.constant 6 : index
    %c0_23 = arith.constant 0 : index
    %c0_24 = arith.constant 0 : index
    %48 = vector.load %arg5[%c6, %c0_23, %c0_24] : memref<27x32x64xbf16, #tpu.memory_space<vmem>>, vector<1x32x64xbf16>
    %49 = vector.shape_cast %48 : vector<1x32x64xbf16> to vector<32x64xbf16>
    %cst_25 = arith.constant dense<0.000000e+00> : vector<64x64xf32>
    %50 = tpu.matmul %47, %49, %cst_25 {dimension_numbers = #tpu.dot_dimension_numbers<[1], [0], [0], [1], [0, 0, 1, 1], [], []>} : vector<64x32xbf16>, vector<32x64xbf16>, vector<64x64xf32> -> vector<64x64xf32>
    %51 = arith.addf %44, %50 : vector<64x64xf32>
    %52 = vector.extract_strided_slice %2 {offsets = [2, 1, 0], sizes = [8, 8, 32], strides = [1, 1, 1]} : vector<10x10x32xf32> to vector<8x8x32xf32>
    %53 = vector.shape_cast %52 : vector<8x8x32xf32> to vector<64x32xf32>
    %54 = arith.truncf %53 : vector<64x32xf32> to vector<64x32xbf16>
    %c7 = arith.constant 7 : index
    %c0_26 = arith.constant 0 : index
    %c0_27 = arith.constant 0 : index
    %55 = vector.load %arg5[%c7, %c0_26, %c0_27] : memref<27x32x64xbf16, #tpu.memory_space<vmem>>, vector<1x32x64xbf16>
    %56 = vector.shape_cast %55 : vector<1x32x64xbf16> to vector<32x64xbf16>
    %cst_28 = arith.constant dense<0.000000e+00> : vector<64x64xf32>
    %57 = tpu.matmul %54, %56, %cst_28 {dimension_numbers = #tpu.dot_dimension_numbers<[1], [0], [0], [1], [0, 0, 1, 1], [], []>} : vector<64x32xbf16>, vector<32x64xbf16>, vector<64x64xf32> -> vector<64x64xf32>
    %58 = arith.addf %51, %57 : vector<64x64xf32>
    %59 = vector.extract_strided_slice %2 {offsets = [2, 2, 0], sizes = [8, 8, 32], strides = [1, 1, 1]} : vector<10x10x32xf32> to vector<8x8x32xf32>
    %60 = vector.shape_cast %59 : vector<8x8x32xf32> to vector<64x32xf32>
    %61 = arith.truncf %60 : vector<64x32xf32> to vector<64x32xbf16>
    %c8 = arith.constant 8 : index
    %c0_29 = arith.constant 0 : index
    %c0_30 = arith.constant 0 : index
    %62 = vector.load %arg5[%c8, %c0_29, %c0_30] : memref<27x32x64xbf16, #tpu.memory_space<vmem>>, vector<1x32x64xbf16>
    %63 = vector.shape_cast %62 : vector<1x32x64xbf16> to vector<32x64xbf16>
    %cst_31 = arith.constant dense<0.000000e+00> : vector<64x64xf32>
    %64 = tpu.matmul %61, %63, %cst_31 {dimension_numbers = #tpu.dot_dimension_numbers<[1], [0], [0], [1], [0, 0, 1, 1], [], []>} : vector<64x32xbf16>, vector<32x64xbf16>, vector<64x64xf32> -> vector<64x64xf32>
    %65 = arith.addf %58, %64 : vector<64x64xf32>
    %c0_32 = arith.constant 0 : index
    %c0_33 = arith.constant 0 : index
    %c0_34 = arith.constant 0 : index
    %c0_35 = arith.constant 0 : index
    %c0_36 = arith.constant 0 : index
    %66 = vector.load %arg3[%c0_32, %c0_33, %c0_34, %c0_35, %c0_36] : memref<1x1x10x10x32xf32, #tpu.memory_space<vmem>>, vector<1x1x10x10x32xf32>
    %67 = vector.shape_cast %66 : vector<1x1x10x10x32xf32> to vector<10x10x32xf32>
    %68 = vector.extract_strided_slice %67 {offsets = [0, 0, 0], sizes = [8, 8, 32], strides = [1, 1, 1]} : vector<10x10x32xf32> to vector<8x8x32xf32>
    %69 = vector.shape_cast %68 : vector<8x8x32xf32> to vector<64x32xf32>
    %70 = arith.truncf %69 : vector<64x32xf32> to vector<64x32xbf16>
    %c9 = arith.constant 9 : index
    %c0_37 = arith.constant 0 : index
    %c0_38 = arith.constant 0 : index
    %71 = vector.load %arg5[%c9, %c0_37, %c0_38] : memref<27x32x64xbf16, #tpu.memory_space<vmem>>, vector<1x32x64xbf16>
    %72 = vector.shape_cast %71 : vector<1x32x64xbf16> to vector<32x64xbf16>
    %cst_39 = arith.constant dense<0.000000e+00> : vector<64x64xf32>
    %73 = tpu.matmul %70, %72, %cst_39 {dimension_numbers = #tpu.dot_dimension_numbers<[1], [0], [0], [1], [0, 0, 1, 1], [], []>} : vector<64x32xbf16>, vector<32x64xbf16>, vector<64x64xf32> -> vector<64x64xf32>
    %74 = arith.addf %65, %73 : vector<64x64xf32>
    %75 = vector.extract_strided_slice %67 {offsets = [0, 1, 0], sizes = [8, 8, 32], strides = [1, 1, 1]} : vector<10x10x32xf32> to vector<8x8x32xf32>
    %76 = vector.shape_cast %75 : vector<8x8x32xf32> to vector<64x32xf32>
    %77 = arith.truncf %76 : vector<64x32xf32> to vector<64x32xbf16>
    %c10 = arith.constant 10 : index
    %c0_40 = arith.constant 0 : index
    %c0_41 = arith.constant 0 : index
    %78 = vector.load %arg5[%c10, %c0_40, %c0_41] : memref<27x32x64xbf16, #tpu.memory_space<vmem>>, vector<1x32x64xbf16>
    %79 = vector.shape_cast %78 : vector<1x32x64xbf16> to vector<32x64xbf16>
    %cst_42 = arith.constant dense<0.000000e+00> : vector<64x64xf32>
    %80 = tpu.matmul %77, %79, %cst_42 {dimension_numbers = #tpu.dot_dimension_numbers<[1], [0], [0], [1], [0, 0, 1, 1], [], []>} : vector<64x32xbf16>, vector<32x64xbf16>, vector<64x64xf32> -> vector<64x64xf32>
    %81 = arith.addf %74, %80 : vector<64x64xf32>
    %82 = vector.extract_strided_slice %67 {offsets = [0, 2, 0], sizes = [8, 8, 32], strides = [1, 1, 1]} : vector<10x10x32xf32> to vector<8x8x32xf32>
    %83 = vector.shape_cast %82 : vector<8x8x32xf32> to vector<64x32xf32>
    %84 = arith.truncf %83 : vector<64x32xf32> to vector<64x32xbf16>
    %c11 = arith.constant 11 : index
    %c0_43 = arith.constant 0 : index
    %c0_44 = arith.constant 0 : index
    %85 = vector.load %arg5[%c11, %c0_43, %c0_44] : memref<27x32x64xbf16, #tpu.memory_space<vmem>>, vector<1x32x64xbf16>
    %86 = vector.shape_cast %85 : vector<1x32x64xbf16> to vector<32x64xbf16>
    %cst_45 = arith.constant dense<0.000000e+00> : vector<64x64xf32>
    %87 = tpu.matmul %84, %86, %cst_45 {dimension_numbers = #tpu.dot_dimension_numbers<[1], [0], [0], [1], [0, 0, 1, 1], [], []>} : vector<64x32xbf16>, vector<32x64xbf16>, vector<64x64xf32> -> vector<64x64xf32>
    %88 = arith.addf %81, %87 : vector<64x64xf32>
    %89 = vector.extract_strided_slice %67 {offsets = [1, 0, 0], sizes = [8, 8, 32], strides = [1, 1, 1]} : vector<10x10x32xf32> to vector<8x8x32xf32>
    %90 = vector.shape_cast %89 : vector<8x8x32xf32> to vector<64x32xf32>
    %91 = arith.truncf %90 : vector<64x32xf32> to vector<64x32xbf16>
    %c12 = arith.constant 12 : index
    %c0_46 = arith.constant 0 : index
    %c0_47 = arith.constant 0 : index
    %92 = vector.load %arg5[%c12, %c0_46, %c0_47] : memref<27x32x64xbf16, #tpu.memory_space<vmem>>, vector<1x32x64xbf16>
    %93 = vector.shape_cast %92 : vector<1x32x64xbf16> to vector<32x64xbf16>
    %cst_48 = arith.constant dense<0.000000e+00> : vector<64x64xf32>
    %94 = tpu.matmul %91, %93, %cst_48 {dimension_numbers = #tpu.dot_dimension_numbers<[1], [0], [0], [1], [0, 0, 1, 1], [], []>} : vector<64x32xbf16>, vector<32x64xbf16>, vector<64x64xf32> -> vector<64x64xf32>
    %95 = arith.addf %88, %94 : vector<64x64xf32>
    %96 = vector.extract_strided_slice %67 {offsets = [1, 1, 0], sizes = [8, 8, 32], strides = [1, 1, 1]} : vector<10x10x32xf32> to vector<8x8x32xf32>
    %97 = vector.shape_cast %96 : vector<8x8x32xf32> to vector<64x32xf32>
    %98 = arith.truncf %97 : vector<64x32xf32> to vector<64x32xbf16>
    %c13 = arith.constant 13 : index
    %c0_49 = arith.constant 0 : index
    %c0_50 = arith.constant 0 : index
    %99 = vector.load %arg5[%c13, %c0_49, %c0_50] : memref<27x32x64xbf16, #tpu.memory_space<vmem>>, vector<1x32x64xbf16>
    %100 = vector.shape_cast %99 : vector<1x32x64xbf16> to vector<32x64xbf16>
    %cst_51 = arith.constant dense<0.000000e+00> : vector<64x64xf32>
    %101 = tpu.matmul %98, %100, %cst_51 {dimension_numbers = #tpu.dot_dimension_numbers<[1], [0], [0], [1], [0, 0, 1, 1], [], []>} : vector<64x32xbf16>, vector<32x64xbf16>, vector<64x64xf32> -> vector<64x64xf32>
    %102 = arith.addf %95, %101 : vector<64x64xf32>
    %103 = vector.extract_strided_slice %67 {offsets = [1, 2, 0], sizes = [8, 8, 32], strides = [1, 1, 1]} : vector<10x10x32xf32> to vector<8x8x32xf32>
    %104 = vector.shape_cast %103 : vector<8x8x32xf32> to vector<64x32xf32>
    %105 = arith.truncf %104 : vector<64x32xf32> to vector<64x32xbf16>
    %c14 = arith.constant 14 : index
    %c0_52 = arith.constant 0 : index
    %c0_53 = arith.constant 0 : index
    %106 = vector.load %arg5[%c14, %c0_52, %c0_53] : memref<27x32x64xbf16, #tpu.memory_space<vmem>>, vector<1x32x64xbf16>
    %107 = vector.shape_cast %106 : vector<1x32x64xbf16> to vector<32x64xbf16>
    %cst_54 = arith.constant dense<0.000000e+00> : vector<64x64xf32>
    %108 = tpu.matmul %105, %107, %cst_54 {dimension_numbers = #tpu.dot_dimension_numbers<[1], [0], [0], [1], [0, 0, 1, 1], [], []>} : vector<64x32xbf16>, vector<32x64xbf16>, vector<64x64xf32> -> vector<64x64xf32>
    %109 = arith.addf %102, %108 : vector<64x64xf32>
    %110 = vector.extract_strided_slice %67 {offsets = [2, 0, 0], sizes = [8, 8, 32], strides = [1, 1, 1]} : vector<10x10x32xf32> to vector<8x8x32xf32>
    %111 = vector.shape_cast %110 : vector<8x8x32xf32> to vector<64x32xf32>
    %112 = arith.truncf %111 : vector<64x32xf32> to vector<64x32xbf16>
    %c15 = arith.constant 15 : index
    %c0_55 = arith.constant 0 : index
    %c0_56 = arith.constant 0 : index
    %113 = vector.load %arg5[%c15, %c0_55, %c0_56] : memref<27x32x64xbf16, #tpu.memory_space<vmem>>, vector<1x32x64xbf16>
    %114 = vector.shape_cast %113 : vector<1x32x64xbf16> to vector<32x64xbf16>
    %cst_57 = arith.constant dense<0.000000e+00> : vector<64x64xf32>
    %115 = tpu.matmul %112, %114, %cst_57 {dimension_numbers = #tpu.dot_dimension_numbers<[1], [0], [0], [1], [0, 0, 1, 1], [], []>} : vector<64x32xbf16>, vector<32x64xbf16>, vector<64x64xf32> -> vector<64x64xf32>
    %116 = arith.addf %109, %115 : vector<64x64xf32>
    %117 = vector.extract_strided_slice %67 {offsets = [2, 1, 0], sizes = [8, 8, 32], strides = [1, 1, 1]} : vector<10x10x32xf32> to vector<8x8x32xf32>
    %118 = vector.shape_cast %117 : vector<8x8x32xf32> to vector<64x32xf32>
    %119 = arith.truncf %118 : vector<64x32xf32> to vector<64x32xbf16>
    %c16 = arith.constant 16 : index
    %c0_58 = arith.constant 0 : index
    %c0_59 = arith.constant 0 : index
    %120 = vector.load %arg5[%c16, %c0_58, %c0_59] : memref<27x32x64xbf16, #tpu.memory_space<vmem>>, vector<1x32x64xbf16>
    %121 = vector.shape_cast %120 : vector<1x32x64xbf16> to vector<32x64xbf16>
    %cst_60 = arith.constant dense<0.000000e+00> : vector<64x64xf32>
    %122 = tpu.matmul %119, %121, %cst_60 {dimension_numbers = #tpu.dot_dimension_numbers<[1], [0], [0], [1], [0, 0, 1, 1], [], []>} : vector<64x32xbf16>, vector<32x64xbf16>, vector<64x64xf32> -> vector<64x64xf32>
    %123 = arith.addf %116, %122 : vector<64x64xf32>
    %124 = vector.extract_strided_slice %67 {offsets = [2, 2, 0], sizes = [8, 8, 32], strides = [1, 1, 1]} : vector<10x10x32xf32> to vector<8x8x32xf32>
    %125 = vector.shape_cast %124 : vector<8x8x32xf32> to vector<64x32xf32>
    %126 = arith.truncf %125 : vector<64x32xf32> to vector<64x32xbf16>
    %c17 = arith.constant 17 : index
    %c0_61 = arith.constant 0 : index
    %c0_62 = arith.constant 0 : index
    %127 = vector.load %arg5[%c17, %c0_61, %c0_62] : memref<27x32x64xbf16, #tpu.memory_space<vmem>>, vector<1x32x64xbf16>
    %128 = vector.shape_cast %127 : vector<1x32x64xbf16> to vector<32x64xbf16>
    %cst_63 = arith.constant dense<0.000000e+00> : vector<64x64xf32>
    %129 = tpu.matmul %126, %128, %cst_63 {dimension_numbers = #tpu.dot_dimension_numbers<[1], [0], [0], [1], [0, 0, 1, 1], [], []>} : vector<64x32xbf16>, vector<32x64xbf16>, vector<64x64xf32> -> vector<64x64xf32>
    %130 = arith.addf %123, %129 : vector<64x64xf32>
    %c0_64 = arith.constant 0 : index
    %c0_65 = arith.constant 0 : index
    %c0_66 = arith.constant 0 : index
    %c0_67 = arith.constant 0 : index
    %c0_68 = arith.constant 0 : index
    %131 = vector.load %arg4[%c0_64, %c0_65, %c0_66, %c0_67, %c0_68] : memref<1x1x10x10x32xf32, #tpu.memory_space<vmem>>, vector<1x1x10x10x32xf32>
    %132 = vector.shape_cast %131 : vector<1x1x10x10x32xf32> to vector<10x10x32xf32>
    %133 = vector.extract_strided_slice %132 {offsets = [0, 0, 0], sizes = [8, 8, 32], strides = [1, 1, 1]} : vector<10x10x32xf32> to vector<8x8x32xf32>
    %134 = vector.shape_cast %133 : vector<8x8x32xf32> to vector<64x32xf32>
    %135 = arith.truncf %134 : vector<64x32xf32> to vector<64x32xbf16>
    %c18 = arith.constant 18 : index
    %c0_69 = arith.constant 0 : index
    %c0_70 = arith.constant 0 : index
    %136 = vector.load %arg5[%c18, %c0_69, %c0_70] : memref<27x32x64xbf16, #tpu.memory_space<vmem>>, vector<1x32x64xbf16>
    %137 = vector.shape_cast %136 : vector<1x32x64xbf16> to vector<32x64xbf16>
    %cst_71 = arith.constant dense<0.000000e+00> : vector<64x64xf32>
    %138 = tpu.matmul %135, %137, %cst_71 {dimension_numbers = #tpu.dot_dimension_numbers<[1], [0], [0], [1], [0, 0, 1, 1], [], []>} : vector<64x32xbf16>, vector<32x64xbf16>, vector<64x64xf32> -> vector<64x64xf32>
    %139 = arith.addf %130, %138 : vector<64x64xf32>
    %140 = vector.extract_strided_slice %132 {offsets = [0, 1, 0], sizes = [8, 8, 32], strides = [1, 1, 1]} : vector<10x10x32xf32> to vector<8x8x32xf32>
    %141 = vector.shape_cast %140 : vector<8x8x32xf32> to vector<64x32xf32>
    %142 = arith.truncf %141 : vector<64x32xf32> to vector<64x32xbf16>
    %c19 = arith.constant 19 : index
    %c0_72 = arith.constant 0 : index
    %c0_73 = arith.constant 0 : index
    %143 = vector.load %arg5[%c19, %c0_72, %c0_73] : memref<27x32x64xbf16, #tpu.memory_space<vmem>>, vector<1x32x64xbf16>
    %144 = vector.shape_cast %143 : vector<1x32x64xbf16> to vector<32x64xbf16>
    %cst_74 = arith.constant dense<0.000000e+00> : vector<64x64xf32>
    %145 = tpu.matmul %142, %144, %cst_74 {dimension_numbers = #tpu.dot_dimension_numbers<[1], [0], [0], [1], [0, 0, 1, 1], [], []>} : vector<64x32xbf16>, vector<32x64xbf16>, vector<64x64xf32> -> vector<64x64xf32>
    %146 = arith.addf %139, %145 : vector<64x64xf32>
    %147 = vector.extract_strided_slice %132 {offsets = [0, 2, 0], sizes = [8, 8, 32], strides = [1, 1, 1]} : vector<10x10x32xf32> to vector<8x8x32xf32>
    %148 = vector.shape_cast %147 : vector<8x8x32xf32> to vector<64x32xf32>
    %149 = arith.truncf %148 : vector<64x32xf32> to vector<64x32xbf16>
    %c20 = arith.constant 20 : index
    %c0_75 = arith.constant 0 : index
    %c0_76 = arith.constant 0 : index
    %150 = vector.load %arg5[%c20, %c0_75, %c0_76] : memref<27x32x64xbf16, #tpu.memory_space<vmem>>, vector<1x32x64xbf16>
    %151 = vector.shape_cast %150 : vector<1x32x64xbf16> to vector<32x64xbf16>
    %cst_77 = arith.constant dense<0.000000e+00> : vector<64x64xf32>
    %152 = tpu.matmul %149, %151, %cst_77 {dimension_numbers = #tpu.dot_dimension_numbers<[1], [0], [0], [1], [0, 0, 1, 1], [], []>} : vector<64x32xbf16>, vector<32x64xbf16>, vector<64x64xf32> -> vector<64x64xf32>
    %153 = arith.addf %146, %152 : vector<64x64xf32>
    %154 = vector.extract_strided_slice %132 {offsets = [1, 0, 0], sizes = [8, 8, 32], strides = [1, 1, 1]} : vector<10x10x32xf32> to vector<8x8x32xf32>
    %155 = vector.shape_cast %154 : vector<8x8x32xf32> to vector<64x32xf32>
    %156 = arith.truncf %155 : vector<64x32xf32> to vector<64x32xbf16>
    %c21 = arith.constant 21 : index
    %c0_78 = arith.constant 0 : index
    %c0_79 = arith.constant 0 : index
    %157 = vector.load %arg5[%c21, %c0_78, %c0_79] : memref<27x32x64xbf16, #tpu.memory_space<vmem>>, vector<1x32x64xbf16>
    %158 = vector.shape_cast %157 : vector<1x32x64xbf16> to vector<32x64xbf16>
    %cst_80 = arith.constant dense<0.000000e+00> : vector<64x64xf32>
    %159 = tpu.matmul %156, %158, %cst_80 {dimension_numbers = #tpu.dot_dimension_numbers<[1], [0], [0], [1], [0, 0, 1, 1], [], []>} : vector<64x32xbf16>, vector<32x64xbf16>, vector<64x64xf32> -> vector<64x64xf32>
    %160 = arith.addf %153, %159 : vector<64x64xf32>
    %161 = vector.extract_strided_slice %132 {offsets = [1, 1, 0], sizes = [8, 8, 32], strides = [1, 1, 1]} : vector<10x10x32xf32> to vector<8x8x32xf32>
    %162 = vector.shape_cast %161 : vector<8x8x32xf32> to vector<64x32xf32>
    %163 = arith.truncf %162 : vector<64x32xf32> to vector<64x32xbf16>
    %c22 = arith.constant 22 : index
    %c0_81 = arith.constant 0 : index
    %c0_82 = arith.constant 0 : index
    %164 = vector.load %arg5[%c22, %c0_81, %c0_82] : memref<27x32x64xbf16, #tpu.memory_space<vmem>>, vector<1x32x64xbf16>
    %165 = vector.shape_cast %164 : vector<1x32x64xbf16> to vector<32x64xbf16>
    %cst_83 = arith.constant dense<0.000000e+00> : vector<64x64xf32>
    %166 = tpu.matmul %163, %165, %cst_83 {dimension_numbers = #tpu.dot_dimension_numbers<[1], [0], [0], [1], [0, 0, 1, 1], [], []>} : vector<64x32xbf16>, vector<32x64xbf16>, vector<64x64xf32> -> vector<64x64xf32>
    %167 = arith.addf %160, %166 : vector<64x64xf32>
    %168 = vector.extract_strided_slice %132 {offsets = [1, 2, 0], sizes = [8, 8, 32], strides = [1, 1, 1]} : vector<10x10x32xf32> to vector<8x8x32xf32>
    %169 = vector.shape_cast %168 : vector<8x8x32xf32> to vector<64x32xf32>
    %170 = arith.truncf %169 : vector<64x32xf32> to vector<64x32xbf16>
    %c23 = arith.constant 23 : index
    %c0_84 = arith.constant 0 : index
    %c0_85 = arith.constant 0 : index
    %171 = vector.load %arg5[%c23, %c0_84, %c0_85] : memref<27x32x64xbf16, #tpu.memory_space<vmem>>, vector<1x32x64xbf16>
    %172 = vector.shape_cast %171 : vector<1x32x64xbf16> to vector<32x64xbf16>
    %cst_86 = arith.constant dense<0.000000e+00> : vector<64x64xf32>
    %173 = tpu.matmul %170, %172, %cst_86 {dimension_numbers = #tpu.dot_dimension_numbers<[1], [0], [0], [1], [0, 0, 1, 1], [], []>} : vector<64x32xbf16>, vector<32x64xbf16>, vector<64x64xf32> -> vector<64x64xf32>
    %174 = arith.addf %167, %173 : vector<64x64xf32>
    %175 = vector.extract_strided_slice %132 {offsets = [2, 0, 0], sizes = [8, 8, 32], strides = [1, 1, 1]} : vector<10x10x32xf32> to vector<8x8x32xf32>
    %176 = vector.shape_cast %175 : vector<8x8x32xf32> to vector<64x32xf32>
    %177 = arith.truncf %176 : vector<64x32xf32> to vector<64x32xbf16>
    %c24 = arith.constant 24 : index
    %c0_87 = arith.constant 0 : index
    %c0_88 = arith.constant 0 : index
    %178 = vector.load %arg5[%c24, %c0_87, %c0_88] : memref<27x32x64xbf16, #tpu.memory_space<vmem>>, vector<1x32x64xbf16>
    %179 = vector.shape_cast %178 : vector<1x32x64xbf16> to vector<32x64xbf16>
    %cst_89 = arith.constant dense<0.000000e+00> : vector<64x64xf32>
    %180 = tpu.matmul %177, %179, %cst_89 {dimension_numbers = #tpu.dot_dimension_numbers<[1], [0], [0], [1], [0, 0, 1, 1], [], []>} : vector<64x32xbf16>, vector<32x64xbf16>, vector<64x64xf32> -> vector<64x64xf32>
    %181 = arith.addf %174, %180 : vector<64x64xf32>
    %182 = vector.extract_strided_slice %132 {offsets = [2, 1, 0], sizes = [8, 8, 32], strides = [1, 1, 1]} : vector<10x10x32xf32> to vector<8x8x32xf32>
    %183 = vector.shape_cast %182 : vector<8x8x32xf32> to vector<64x32xf32>
    %184 = arith.truncf %183 : vector<64x32xf32> to vector<64x32xbf16>
    %c25 = arith.constant 25 : index
    %c0_90 = arith.constant 0 : index
    %c0_91 = arith.constant 0 : index
    %185 = vector.load %arg5[%c25, %c0_90, %c0_91] : memref<27x32x64xbf16, #tpu.memory_space<vmem>>, vector<1x32x64xbf16>
    %186 = vector.shape_cast %185 : vector<1x32x64xbf16> to vector<32x64xbf16>
    %cst_92 = arith.constant dense<0.000000e+00> : vector<64x64xf32>
    %187 = tpu.matmul %184, %186, %cst_92 {dimension_numbers = #tpu.dot_dimension_numbers<[1], [0], [0], [1], [0, 0, 1, 1], [], []>} : vector<64x32xbf16>, vector<32x64xbf16>, vector<64x64xf32> -> vector<64x64xf32>
    %188 = arith.addf %181, %187 : vector<64x64xf32>
    %189 = vector.extract_strided_slice %132 {offsets = [2, 2, 0], sizes = [8, 8, 32], strides = [1, 1, 1]} : vector<10x10x32xf32> to vector<8x8x32xf32>
    %190 = vector.shape_cast %189 : vector<8x8x32xf32> to vector<64x32xf32>
    %191 = arith.truncf %190 : vector<64x32xf32> to vector<64x32xbf16>
    %c26 = arith.constant 26 : index
    %c0_93 = arith.constant 0 : index
    %c0_94 = arith.constant 0 : index
    %192 = vector.load %arg5[%c26, %c0_93, %c0_94] : memref<27x32x64xbf16, #tpu.memory_space<vmem>>, vector<1x32x64xbf16>
    %193 = vector.shape_cast %192 : vector<1x32x64xbf16> to vector<32x64xbf16>
    %cst_95 = arith.constant dense<0.000000e+00> : vector<64x64xf32>
    %194 = tpu.matmul %191, %193, %cst_95 {dimension_numbers = #tpu.dot_dimension_numbers<[1], [0], [0], [1], [0, 0, 1, 1], [], []>} : vector<64x32xbf16>, vector<32x64xbf16>, vector<64x64xf32> -> vector<64x64xf32>
    %195 = arith.addf %188, %194 : vector<64x64xf32>
    %c0_96 = arith.constant 0 : index
    %c0_97 = arith.constant 0 : index
    %196 = vector.load %arg6[%c0_96, %c0_97] : memref<1x64xf32, #tpu.memory_space<vmem>>, vector<1x64xf32>
    %197 = vector.broadcast %196 : vector<1x64xf32> to vector<64x64xf32>
    %198 = arith.addf %195, %197 : vector<64x64xf32>
    %199 = vector.shape_cast %198 : vector<64x64xf32> to vector<1x1x8x8x64xf32>
    %c0_98 = arith.constant 0 : index
    %c0_99 = arith.constant 0 : index
    %c0_100 = arith.constant 0 : index
    %c0_101 = arith.constant 0 : index
    %c0_102 = arith.constant 0 : index
    %200 = vector.load %arg7[%c0_98, %c0_99, %c0_100, %c0_101, %c0_102] : memref<1x1x8x8x64xf32, #tpu.memory_space<vmem>>, vector<1x1x8x8x64xf32>
    tpu.vector_store %arg7[%c0_98, %c0_99, %c0_100, %c0_101, %c0_102], %199 {strides = array<i32>} : memref<1x1x8x8x64xf32, #tpu.memory_space<vmem>>, vector<1x1x8x8x64xf32>,
    return
  }
  func.func @transform_0(%arg0: i32, %arg1: i32) -> (i32, i32, i32, i32, i32) {
    %c0_i32 = arith.constant 0 : i32
    %0 = arith.addi %arg1, %c0_i32 : i32
    %c0_i32_0 = arith.constant 0 : i32
    %c0_i32_1 = arith.constant 0 : i32
    %c0_i32_2 = arith.constant 0 : i32
    %c0_i32_3 = arith.constant 0 : i32
    return %arg0, %0, %c0_i32_0, %c0_i32_1, %c0_i32_2 : i32, i32, i32, i32, i32
  }
  func.func @transform_1(%arg0: i32, %arg1: i32) -> (i32, i32, i32, i32, i32) {
    %c1_i32 = arith.constant 1 : i32
    %0 = arith.addi %arg1, %c1_i32 : i32
    %c0_i32 = arith.constant 0 : i32
    %c0_i32_0 = arith.constant 0 : i32
    %c0_i32_1 = arith.constant 0 : i32
    %c0_i32_2 = arith.constant 0 : i32
    return %arg0, %0, %c0_i32, %c0_i32_0, %c0_i32_1 : i32, i32, i32, i32, i32
  }
  func.func @transform_2(%arg0: i32, %arg1: i32) -> (i32, i32, i32, i32, i32) {
    %c2_i32 = arith.constant 2 : i32
    %0 = arith.addi %arg1, %c2_i32 : i32
    %c0_i32 = arith.constant 0 : i32
    %c0_i32_0 = arith.constant 0 : i32
    %c0_i32_1 = arith.constant 0 : i32
    %c0_i32_2 = arith.constant 0 : i32
    return %arg0, %0, %c0_i32, %c0_i32_0, %c0_i32_1 : i32, i32, i32, i32, i32
  }
  func.func @transform_3(%arg0: i32, %arg1: i32) -> (i32, i32, i32) {
    %c0_i32 = arith.constant 0 : i32
    %c0_i32_0 = arith.constant 0 : i32
    %c0_i32_1 = arith.constant 0 : i32
    %c0_i32_2 = arith.constant 0 : i32
    return %c0_i32, %c0_i32_0, %c0_i32_1 : i32, i32, i32
  }
  func.func @transform_4(%arg0: i32, %arg1: i32) -> (i32, i32) {
    %c0_i32 = arith.constant 0 : i32
    %c0_i32_0 = arith.constant 0 : i32
    %c0_i32_1 = arith.constant 0 : i32
    return %c0_i32, %c0_i32_0 : i32, i32
  }
  func.func @transform_5(%arg0: i32, %arg1: i32) -> (i32, i32, i32, i32, i32) {
    %c0_i32 = arith.constant 0 : i32
    %c0_i32_0 = arith.constant 0 : i32
    %c0_i32_1 = arith.constant 0 : i32
    %c0_i32_2 = arith.constant 0 : i32
    return %arg0, %arg1, %c0_i32, %c0_i32_0, %c0_i32_1 : i32, i32, i32, i32, i32
  }
}

module attributes {stable_mosaic.version = 11 : i64} {
  func.func @_gn_stats_kernel(%arg0: i32, %arg1: i32, %arg2: memref<1x128x64xf32, #tpu.memory_space<vmem>>, %arg3: memref<1x1x64xf32, #tpu.memory_space<vmem>>, %arg4: memref<1x1x64xf32, #tpu.memory_space<vmem>>) attributes {dimension_semantics = [#tpu.dimension_semantics<parallel>, #tpu.dimension_semantics<arbitrary>], iteration_bounds = array<i64: 2, 2>, scalar_prefetch = 0 : i64, scratch_operands = 0 : i64, tpu.core_type = #tpu.core_type<tc>, window_params = [{transform_indices = @transform_0, window_bounds = array<i64: 1, 128, 64>}, {transform_indices = @transform_1, window_bounds = array<i64: 1, 1, 64>}, {transform_indices = @transform_2, window_bounds = array<i64: 1, 1, 64>}]} {
    %c0_i32 = arith.constant 0 : i32
    %0 = arith.cmpi eq, %arg1, %c0_i32 : i32
    %1 = arith.extui %0 : i1 to i32
    %c0_i32_0 = arith.constant 0 : i32
    %2 = arith.cmpi ne, %1, %c0_i32_0 : i32
    scf.if %2 {
      %cst_16 = arith.constant 0.000000e+00 : f32
      %22 = vector.broadcast %cst_16 : f32 to vector<1x1x64xf32>
      %c0_17 = arith.constant 0 : index
      %c0_18 = arith.constant 0 : index
      %c0_19 = arith.constant 0 : index
      %23 = vector.load %arg3[%c0_17, %c0_18, %c0_19] : memref<1x1x64xf32, #tpu.memory_space<vmem>>, vector<1x1x64xf32>
      tpu.vector_store %arg3[%c0_17, %c0_18, %c0_19], %22 {strides = array<i32>} : memref<1x1x64xf32, #tpu.memory_space<vmem>>, vector<1x1x64xf32>,
      %cst_20 = arith.constant 0.000000e+00 : f32
      %24 = vector.broadcast %cst_20 : f32 to vector<1x1x64xf32>
      %c0_21 = arith.constant 0 : index
      %c0_22 = arith.constant 0 : index
      %c0_23 = arith.constant 0 : index
      %25 = vector.load %arg4[%c0_21, %c0_22, %c0_23] : memref<1x1x64xf32, #tpu.memory_space<vmem>>, vector<1x1x64xf32>
      tpu.vector_store %arg4[%c0_21, %c0_22, %c0_23], %24 {strides = array<i32>} : memref<1x1x64xf32, #tpu.memory_space<vmem>>, vector<1x1x64xf32>,
    } else {
    }
    %c0 = arith.constant 0 : index
    %c0_1 = arith.constant 0 : index
    %c0_2 = arith.constant 0 : index
    %3 = vector.load %arg2[%c0, %c0_1, %c0_2] : memref<1x128x64xf32, #tpu.memory_space<vmem>>, vector<1x128x64xf32>
    %4 = vector.shape_cast %3 : vector<1x128x64xf32> to vector<128x64xf32>
    %c0_3 = arith.constant 0 : index
    %c0_4 = arith.constant 0 : index
    %c0_5 = arith.constant 0 : index
    %5 = vector.load %arg3[%c0_3, %c0_4, %c0_5] : memref<1x1x64xf32, #tpu.memory_space<vmem>>, vector<1x1x64xf32>
    %6 = vector.shape_cast %5 : vector<1x1x64xf32> to vector<1x64xf32>
    %cst = arith.constant dense<0.000000e+00> : vector<64xf32>
    %7 = vector.multi_reduction <add>, %4, %cst [0] : vector<128x64xf32> to vector<64xf32>
    %8 = vector.shape_cast %7 : vector<64xf32> to vector<1x64xf32>
    %9 = arith.addf %6, %8 : vector<1x64xf32>
    %c0_6 = arith.constant 0 : index
    %c0_7 = arith.constant 0 : index
    %c0_8 = arith.constant 0 : index
    %10 = vector.load %arg3[%c0_6, %c0_7, %c0_8] : memref<1x1x64xf32, #tpu.memory_space<vmem>>, vector<1x1x64xf32>
    %11 = vector.shape_cast %10 : vector<1x1x64xf32> to vector<1x64xf32>
    %12 = vector.shape_cast %9 : vector<1x64xf32> to vector<1x1x64xf32>
    tpu.vector_store %arg3[%c0_6, %c0_7, %c0_8], %12 {strides = array<i32>} : memref<1x1x64xf32, #tpu.memory_space<vmem>>, vector<1x1x64xf32>,
    %c0_9 = arith.constant 0 : index
    %c0_10 = arith.constant 0 : index
    %c0_11 = arith.constant 0 : index
    %13 = vector.load %arg4[%c0_9, %c0_10, %c0_11] : memref<1x1x64xf32, #tpu.memory_space<vmem>>, vector<1x1x64xf32>
    %14 = vector.shape_cast %13 : vector<1x1x64xf32> to vector<1x64xf32>
    %15 = arith.mulf %4, %4 : vector<128x64xf32>
    %cst_12 = arith.constant dense<0.000000e+00> : vector<64xf32>
    %16 = vector.multi_reduction <add>, %15, %cst_12 [0] : vector<128x64xf32> to vector<64xf32>
    %17 = vector.shape_cast %16 : vector<64xf32> to vector<1x64xf32>
    %18 = arith.addf %14, %17 : vector<1x64xf32>
    %c0_13 = arith.constant 0 : index
    %c0_14 = arith.constant 0 : index
    %c0_15 = arith.constant 0 : index
    %19 = vector.load %arg4[%c0_13, %c0_14, %c0_15] : memref<1x1x64xf32, #tpu.memory_space<vmem>>, vector<1x1x64xf32>
    %20 = vector.shape_cast %19 : vector<1x1x64xf32> to vector<1x64xf32>
    %21 = vector.shape_cast %18 : vector<1x64xf32> to vector<1x1x64xf32>
    tpu.vector_store %arg4[%c0_13, %c0_14, %c0_15], %21 {strides = array<i32>} : memref<1x1x64xf32, #tpu.memory_space<vmem>>, vector<1x1x64xf32>,
    return
  }
  func.func @transform_0(%arg0: i32, %arg1: i32) -> (i32, i32, i32) {
    %c0_i32 = arith.constant 0 : i32
    %c0_i32_0 = arith.constant 0 : i32
    return %arg0, %arg1, %c0_i32 : i32, i32, i32
  }
  func.func @transform_1(%arg0: i32, %arg1: i32) -> (i32, i32, i32) {
    %c0_i32 = arith.constant 0 : i32
    %c0_i32_0 = arith.constant 0 : i32
    %c0_i32_1 = arith.constant 0 : i32
    return %arg0, %c0_i32, %c0_i32_0 : i32, i32, i32
  }
  func.func @transform_2(%arg0: i32, %arg1: i32) -> (i32, i32, i32) {
    %c0_i32 = arith.constant 0 : i32
    %c0_i32_0 = arith.constant 0 : i32
    %c0_i32_1 = arith.constant 0 : i32
    return %arg0, %c0_i32, %c0_i32_0 : i32, i32, i32
  }
}

module attributes {stable_mosaic.version = 11 : i64} {
  func.func @_gn_apply_silu_kernel(%arg0: i32, %arg1: i32, %arg2: memref<1x128x64xf32, #tpu.memory_space<vmem>>, %arg3: memref<1x1x64xf32, #tpu.memory_space<vmem>>, %arg4: memref<1x1x64xf32, #tpu.memory_space<vmem>>, %arg5: memref<1x128x64xf32, #tpu.memory_space<vmem>>) attributes {dimension_semantics = [#tpu.dimension_semantics<parallel>, #tpu.dimension_semantics<parallel>], iteration_bounds = array<i64: 2, 2>, scalar_prefetch = 0 : i64, scratch_operands = 0 : i64, tpu.core_type = #tpu.core_type<tc>, window_params = [{transform_indices = @transform_0, window_bounds = array<i64: 1, 128, 64>}, {transform_indices = @transform_1, window_bounds = array<i64: 1, 1, 64>}, {transform_indices = @transform_2, window_bounds = array<i64: 1, 1, 64>}, {transform_indices = @transform_3, window_bounds = array<i64: 1, 128, 64>}]} {
    %c0 = arith.constant 0 : index
    %c0_0 = arith.constant 0 : index
    %c0_1 = arith.constant 0 : index
    %0 = vector.load %arg2[%c0, %c0_0, %c0_1] : memref<1x128x64xf32, #tpu.memory_space<vmem>>, vector<1x128x64xf32>
    %1 = vector.shape_cast %0 : vector<1x128x64xf32> to vector<128x64xf32>
    %c0_2 = arith.constant 0 : index
    %c0_3 = arith.constant 0 : index
    %c0_4 = arith.constant 0 : index
    %2 = vector.load %arg3[%c0_2, %c0_3, %c0_4] : memref<1x1x64xf32, #tpu.memory_space<vmem>>, vector<1x1x64xf32>
    %3 = vector.shape_cast %2 : vector<1x1x64xf32> to vector<1x64xf32>
    %4 = vector.broadcast %3 : vector<1x64xf32> to vector<128x64xf32>
    %5 = arith.mulf %1, %4 : vector<128x64xf32>
    %c0_5 = arith.constant 0 : index
    %c0_6 = arith.constant 0 : index
    %c0_7 = arith.constant 0 : index
    %6 = vector.load %arg4[%c0_5, %c0_6, %c0_7] : memref<1x1x64xf32, #tpu.memory_space<vmem>>, vector<1x1x64xf32>
    %7 = vector.shape_cast %6 : vector<1x1x64xf32> to vector<1x64xf32>
    %8 = vector.broadcast %7 : vector<1x64xf32> to vector<128x64xf32>
    %9 = arith.addf %5, %8 : vector<128x64xf32>
    %cst = arith.constant 0.000000e+00 : f32
    %10 = vector.broadcast %cst : f32 to vector<128x64xf32>
    %11 = arith.subf %10, %9 : vector<128x64xf32>
    %12 = math.exp %11 : vector<128x64xf32>
    %cst_8 = arith.constant 1.000000e+00 : f32
    %13 = vector.broadcast %cst_8 : f32 to vector<128x64xf32>
    %14 = arith.addf %13, %12 : vector<128x64xf32>
    %cst_9 = arith.constant 1.000000e+00 : f32
    %15 = vector.broadcast %cst_9 : f32 to vector<128x64xf32>
    %16 = arith.divf %15, %14 : vector<128x64xf32>
    %17 = arith.mulf %9, %16 : vector<128x64xf32>
    %c0_10 = arith.constant 0 : index
    %c0_11 = arith.constant 0 : index
    %c0_12 = arith.constant 0 : index
    %18 = vector.load %arg5[%c0_10, %c0_11, %c0_12] : memref<1x128x64xf32, #tpu.memory_space<vmem>>, vector<1x128x64xf32>
    %19 = vector.shape_cast %18 : vector<1x128x64xf32> to vector<128x64xf32>
    %20 = vector.shape_cast %17 : vector<128x64xf32> to vector<1x128x64xf32>
    tpu.vector_store %arg5[%c0_10, %c0_11, %c0_12], %20 {strides = array<i32>} : memref<1x128x64xf32, #tpu.memory_space<vmem>>, vector<1x128x64xf32>,
    return
  }
  func.func @transform_0(%arg0: i32, %arg1: i32) -> (i32, i32, i32) {
    %c0_i32 = arith.constant 0 : i32
    %c0_i32_0 = arith.constant 0 : i32
    return %arg0, %arg1, %c0_i32 : i32, i32, i32
  }
  func.func @transform_1(%arg0: i32, %arg1: i32) -> (i32, i32, i32) {
    %c0_i32 = arith.constant 0 : i32
    %c0_i32_0 = arith.constant 0 : i32
    %c0_i32_1 = arith.constant 0 : i32
    return %arg0, %c0_i32, %c0_i32_0 : i32, i32, i32
  }
  func.func @transform_2(%arg0: i32, %arg1: i32) -> (i32, i32, i32) {
    %c0_i32 = arith.constant 0 : i32
    %c0_i32_0 = arith.constant 0 : i32
    %c0_i32_1 = arith.constant 0 : i32
    return %arg0, %c0_i32, %c0_i32_0 : i32, i32, i32
  }
  func.func @transform_3(%arg0: i32, %arg1: i32) -> (i32, i32, i32) {
    %c0_i32 = arith.constant 0 : i32
    %c0_i32_0 = arith.constant 0 : i32
    return %arg0, %arg1, %c0_i32 : i32, i32, i32
  }
}

module attributes {stable_mosaic.version = 11 : i64} {
  func.func @_conv2d_nin_res_kernel(%arg0: i32, %arg1: i32, %arg2: memref<1x1x10x10x64xf32, #tpu.memory_space<vmem>>, %arg3: memref<1x1x8x8x32xf32, #tpu.memory_space<vmem>>, %arg4: memref<9x64x64xbf16, #tpu.memory_space<vmem>>, %arg5: memref<1x64xf32, #tpu.memory_space<vmem>>, %arg6: memref<32x64xbf16, #tpu.memory_space<vmem>>, %arg7: memref<1x64xf32, #tpu.memory_space<vmem>>, %arg8: memref<1x1x8x8x64xf32, #tpu.memory_space<vmem>>) attributes {dimension_semantics = [#tpu.dimension_semantics<parallel>, #tpu.dimension_semantics<parallel>], iteration_bounds = array<i64: 2, 4>, scalar_prefetch = 0 : i64, scratch_operands = 0 : i64, tpu.core_type = #tpu.core_type<tc>, window_params = [{transform_indices = @transform_0, window_bounds = array<i64: 1, 1, 10, 10, 64>}, {transform_indices = @transform_1, window_bounds = array<i64: 1, 1, 8, 8, 32>}, {pipeline_mode = #tpu.pipeline_mode<synchronous>, transform_indices = @transform_2, window_bounds = array<i64: 9, 64, 64>}, {pipeline_mode = #tpu.pipeline_mode<synchronous>, transform_indices = @transform_3, window_bounds = array<i64: 1, 64>}, {pipeline_mode = #tpu.pipeline_mode<synchronous>, transform_indices = @transform_4, window_bounds = array<i64: 32, 64>}, {pipeline_mode = #tpu.pipeline_mode<synchronous>, transform_indices = @transform_5, window_bounds = array<i64: 1, 64>}, {transform_indices = @transform_6, window_bounds = array<i64: 1, 1, 8, 8, 64>}]} {
    %c0 = arith.constant 0 : index
    %c0_0 = arith.constant 0 : index
    %c0_1 = arith.constant 0 : index
    %c0_2 = arith.constant 0 : index
    %c0_3 = arith.constant 0 : index
    %0 = vector.load %arg3[%c0, %c0_0, %c0_1, %c0_2, %c0_3] : memref<1x1x8x8x32xf32, #tpu.memory_space<vmem>>, vector<1x1x8x8x32xf32>
    %1 = vector.shape_cast %0 : vector<1x1x8x8x32xf32> to vector<8x8x32xf32>
    %2 = vector.shape_cast %1 : vector<8x8x32xf32> to vector<64x32xf32>
    %3 = arith.truncf %2 : vector<64x32xf32> to vector<64x32xbf16>
    %c0_4 = arith.constant 0 : index
    %c0_5 = arith.constant 0 : index
    %4 = vector.load %arg6[%c0_4, %c0_5] : memref<32x64xbf16, #tpu.memory_space<vmem>>, vector<32x64xbf16>
    %cst = arith.constant dense<0.000000e+00> : vector<64x64xf32>
    %5 = tpu.matmul %3, %4, %cst {dimension_numbers = #tpu.dot_dimension_numbers<[1], [0], [0], [1], [0, 0, 1, 1], [], []>} : vector<64x32xbf16>, vector<32x64xbf16>, vector<64x64xf32> -> vector<64x64xf32>
    %c0_6 = arith.constant 0 : index
    %c0_7 = arith.constant 0 : index
    %6 = vector.load %arg7[%c0_6, %c0_7] : memref<1x64xf32, #tpu.memory_space<vmem>>, vector<1x64xf32>
    %7 = vector.broadcast %6 : vector<1x64xf32> to vector<64x64xf32>
    %8 = arith.addf %5, %7 : vector<64x64xf32>
    %c0_8 = arith.constant 0 : index
    %c0_9 = arith.constant 0 : index
    %c0_10 = arith.constant 0 : index
    %c0_11 = arith.constant 0 : index
    %c0_12 = arith.constant 0 : index
    %9 = vector.load %arg2[%c0_8, %c0_9, %c0_10, %c0_11, %c0_12] : memref<1x1x10x10x64xf32, #tpu.memory_space<vmem>>, vector<1x1x10x10x64xf32>
    %10 = vector.shape_cast %9 : vector<1x1x10x10x64xf32> to vector<10x10x64xf32>
    %11 = vector.extract_strided_slice %10 {offsets = [0, 0, 0], sizes = [8, 8, 64], strides = [1, 1, 1]} : vector<10x10x64xf32> to vector<8x8x64xf32>
    %12 = vector.shape_cast %11 : vector<8x8x64xf32> to vector<64x64xf32>
    %13 = arith.truncf %12 : vector<64x64xf32> to vector<64x64xbf16>
    %c0_13 = arith.constant 0 : index
    %c0_14 = arith.constant 0 : index
    %c0_15 = arith.constant 0 : index
    %14 = vector.load %arg4[%c0_13, %c0_14, %c0_15] : memref<9x64x64xbf16, #tpu.memory_space<vmem>>, vector<1x64x64xbf16>
    %15 = vector.shape_cast %14 : vector<1x64x64xbf16> to vector<64x64xbf16>
    %cst_16 = arith.constant dense<0.000000e+00> : vector<64x64xf32>
    %16 = tpu.matmul %13, %15, %cst_16 {dimension_numbers = #tpu.dot_dimension_numbers<[1], [0], [0], [1], [0, 0, 1, 1], [], []>} : vector<64x64xbf16>, vector<64x64xbf16>, vector<64x64xf32> -> vector<64x64xf32>
    %17 = arith.addf %8, %16 : vector<64x64xf32>
    %18 = vector.extract_strided_slice %10 {offsets = [0, 1, 0], sizes = [8, 8, 64], strides = [1, 1, 1]} : vector<10x10x64xf32> to vector<8x8x64xf32>
    %19 = vector.shape_cast %18 : vector<8x8x64xf32> to vector<64x64xf32>
    %20 = arith.truncf %19 : vector<64x64xf32> to vector<64x64xbf16>
    %c1 = arith.constant 1 : index
    %c0_17 = arith.constant 0 : index
    %c0_18 = arith.constant 0 : index
    %21 = vector.load %arg4[%c1, %c0_17, %c0_18] : memref<9x64x64xbf16, #tpu.memory_space<vmem>>, vector<1x64x64xbf16>
    %22 = vector.shape_cast %21 : vector<1x64x64xbf16> to vector<64x64xbf16>
    %cst_19 = arith.constant dense<0.000000e+00> : vector<64x64xf32>
    %23 = tpu.matmul %20, %22, %cst_19 {dimension_numbers = #tpu.dot_dimension_numbers<[1], [0], [0], [1], [0, 0, 1, 1], [], []>} : vector<64x64xbf16>, vector<64x64xbf16>, vector<64x64xf32> -> vector<64x64xf32>
    %24 = arith.addf %17, %23 : vector<64x64xf32>
    %25 = vector.extract_strided_slice %10 {offsets = [0, 2, 0], sizes = [8, 8, 64], strides = [1, 1, 1]} : vector<10x10x64xf32> to vector<8x8x64xf32>
    %26 = vector.shape_cast %25 : vector<8x8x64xf32> to vector<64x64xf32>
    %27 = arith.truncf %26 : vector<64x64xf32> to vector<64x64xbf16>
    %c2 = arith.constant 2 : index
    %c0_20 = arith.constant 0 : index
    %c0_21 = arith.constant 0 : index
    %28 = vector.load %arg4[%c2, %c0_20, %c0_21] : memref<9x64x64xbf16, #tpu.memory_space<vmem>>, vector<1x64x64xbf16>
    %29 = vector.shape_cast %28 : vector<1x64x64xbf16> to vector<64x64xbf16>
    %cst_22 = arith.constant dense<0.000000e+00> : vector<64x64xf32>
    %30 = tpu.matmul %27, %29, %cst_22 {dimension_numbers = #tpu.dot_dimension_numbers<[1], [0], [0], [1], [0, 0, 1, 1], [], []>} : vector<64x64xbf16>, vector<64x64xbf16>, vector<64x64xf32> -> vector<64x64xf32>
    %31 = arith.addf %24, %30 : vector<64x64xf32>
    %32 = vector.extract_strided_slice %10 {offsets = [1, 0, 0], sizes = [8, 8, 64], strides = [1, 1, 1]} : vector<10x10x64xf32> to vector<8x8x64xf32>
    %33 = vector.shape_cast %32 : vector<8x8x64xf32> to vector<64x64xf32>
    %34 = arith.truncf %33 : vector<64x64xf32> to vector<64x64xbf16>
    %c3 = arith.constant 3 : index
    %c0_23 = arith.constant 0 : index
    %c0_24 = arith.constant 0 : index
    %35 = vector.load %arg4[%c3, %c0_23, %c0_24] : memref<9x64x64xbf16, #tpu.memory_space<vmem>>, vector<1x64x64xbf16>
    %36 = vector.shape_cast %35 : vector<1x64x64xbf16> to vector<64x64xbf16>
    %cst_25 = arith.constant dense<0.000000e+00> : vector<64x64xf32>
    %37 = tpu.matmul %34, %36, %cst_25 {dimension_numbers = #tpu.dot_dimension_numbers<[1], [0], [0], [1], [0, 0, 1, 1], [], []>} : vector<64x64xbf16>, vector<64x64xbf16>, vector<64x64xf32> -> vector<64x64xf32>
    %38 = arith.addf %31, %37 : vector<64x64xf32>
    %39 = vector.extract_strided_slice %10 {offsets = [1, 1, 0], sizes = [8, 8, 64], strides = [1, 1, 1]} : vector<10x10x64xf32> to vector<8x8x64xf32>
    %40 = vector.shape_cast %39 : vector<8x8x64xf32> to vector<64x64xf32>
    %41 = arith.truncf %40 : vector<64x64xf32> to vector<64x64xbf16>
    %c4 = arith.constant 4 : index
    %c0_26 = arith.constant 0 : index
    %c0_27 = arith.constant 0 : index
    %42 = vector.load %arg4[%c4, %c0_26, %c0_27] : memref<9x64x64xbf16, #tpu.memory_space<vmem>>, vector<1x64x64xbf16>
    %43 = vector.shape_cast %42 : vector<1x64x64xbf16> to vector<64x64xbf16>
    %cst_28 = arith.constant dense<0.000000e+00> : vector<64x64xf32>
    %44 = tpu.matmul %41, %43, %cst_28 {dimension_numbers = #tpu.dot_dimension_numbers<[1], [0], [0], [1], [0, 0, 1, 1], [], []>} : vector<64x64xbf16>, vector<64x64xbf16>, vector<64x64xf32> -> vector<64x64xf32>
    %45 = arith.addf %38, %44 : vector<64x64xf32>
    %46 = vector.extract_strided_slice %10 {offsets = [1, 2, 0], sizes = [8, 8, 64], strides = [1, 1, 1]} : vector<10x10x64xf32> to vector<8x8x64xf32>
    %47 = vector.shape_cast %46 : vector<8x8x64xf32> to vector<64x64xf32>
    %48 = arith.truncf %47 : vector<64x64xf32> to vector<64x64xbf16>
    %c5 = arith.constant 5 : index
    %c0_29 = arith.constant 0 : index
    %c0_30 = arith.constant 0 : index
    %49 = vector.load %arg4[%c5, %c0_29, %c0_30] : memref<9x64x64xbf16, #tpu.memory_space<vmem>>, vector<1x64x64xbf16>
    %50 = vector.shape_cast %49 : vector<1x64x64xbf16> to vector<64x64xbf16>
    %cst_31 = arith.constant dense<0.000000e+00> : vector<64x64xf32>
    %51 = tpu.matmul %48, %50, %cst_31 {dimension_numbers = #tpu.dot_dimension_numbers<[1], [0], [0], [1], [0, 0, 1, 1], [], []>} : vector<64x64xbf16>, vector<64x64xbf16>, vector<64x64xf32> -> vector<64x64xf32>
    %52 = arith.addf %45, %51 : vector<64x64xf32>
    %53 = vector.extract_strided_slice %10 {offsets = [2, 0, 0], sizes = [8, 8, 64], strides = [1, 1, 1]} : vector<10x10x64xf32> to vector<8x8x64xf32>
    %54 = vector.shape_cast %53 : vector<8x8x64xf32> to vector<64x64xf32>
    %55 = arith.truncf %54 : vector<64x64xf32> to vector<64x64xbf16>
    %c6 = arith.constant 6 : index
    %c0_32 = arith.constant 0 : index
    %c0_33 = arith.constant 0 : index
    %56 = vector.load %arg4[%c6, %c0_32, %c0_33] : memref<9x64x64xbf16, #tpu.memory_space<vmem>>, vector<1x64x64xbf16>
    %57 = vector.shape_cast %56 : vector<1x64x64xbf16> to vector<64x64xbf16>
    %cst_34 = arith.constant dense<0.000000e+00> : vector<64x64xf32>
    %58 = tpu.matmul %55, %57, %cst_34 {dimension_numbers = #tpu.dot_dimension_numbers<[1], [0], [0], [1], [0, 0, 1, 1], [], []>} : vector<64x64xbf16>, vector<64x64xbf16>, vector<64x64xf32> -> vector<64x64xf32>
    %59 = arith.addf %52, %58 : vector<64x64xf32>
    %60 = vector.extract_strided_slice %10 {offsets = [2, 1, 0], sizes = [8, 8, 64], strides = [1, 1, 1]} : vector<10x10x64xf32> to vector<8x8x64xf32>
    %61 = vector.shape_cast %60 : vector<8x8x64xf32> to vector<64x64xf32>
    %62 = arith.truncf %61 : vector<64x64xf32> to vector<64x64xbf16>
    %c7 = arith.constant 7 : index
    %c0_35 = arith.constant 0 : index
    %c0_36 = arith.constant 0 : index
    %63 = vector.load %arg4[%c7, %c0_35, %c0_36] : memref<9x64x64xbf16, #tpu.memory_space<vmem>>, vector<1x64x64xbf16>
    %64 = vector.shape_cast %63 : vector<1x64x64xbf16> to vector<64x64xbf16>
    %cst_37 = arith.constant dense<0.000000e+00> : vector<64x64xf32>
    %65 = tpu.matmul %62, %64, %cst_37 {dimension_numbers = #tpu.dot_dimension_numbers<[1], [0], [0], [1], [0, 0, 1, 1], [], []>} : vector<64x64xbf16>, vector<64x64xbf16>, vector<64x64xf32> -> vector<64x64xf32>
    %66 = arith.addf %59, %65 : vector<64x64xf32>
    %67 = vector.extract_strided_slice %10 {offsets = [2, 2, 0], sizes = [8, 8, 64], strides = [1, 1, 1]} : vector<10x10x64xf32> to vector<8x8x64xf32>
    %68 = vector.shape_cast %67 : vector<8x8x64xf32> to vector<64x64xf32>
    %69 = arith.truncf %68 : vector<64x64xf32> to vector<64x64xbf16>
    %c8 = arith.constant 8 : index
    %c0_38 = arith.constant 0 : index
    %c0_39 = arith.constant 0 : index
    %70 = vector.load %arg4[%c8, %c0_38, %c0_39] : memref<9x64x64xbf16, #tpu.memory_space<vmem>>, vector<1x64x64xbf16>
    %71 = vector.shape_cast %70 : vector<1x64x64xbf16> to vector<64x64xbf16>
    %cst_40 = arith.constant dense<0.000000e+00> : vector<64x64xf32>
    %72 = tpu.matmul %69, %71, %cst_40 {dimension_numbers = #tpu.dot_dimension_numbers<[1], [0], [0], [1], [0, 0, 1, 1], [], []>} : vector<64x64xbf16>, vector<64x64xbf16>, vector<64x64xf32> -> vector<64x64xf32>
    %73 = arith.addf %66, %72 : vector<64x64xf32>
    %c0_41 = arith.constant 0 : index
    %c0_42 = arith.constant 0 : index
    %74 = vector.load %arg5[%c0_41, %c0_42] : memref<1x64xf32, #tpu.memory_space<vmem>>, vector<1x64xf32>
    %75 = vector.broadcast %74 : vector<1x64xf32> to vector<64x64xf32>
    %76 = arith.addf %73, %75 : vector<64x64xf32>
    %77 = vector.shape_cast %76 : vector<64x64xf32> to vector<1x1x8x8x64xf32>
    %c0_43 = arith.constant 0 : index
    %c0_44 = arith.constant 0 : index
    %c0_45 = arith.constant 0 : index
    %c0_46 = arith.constant 0 : index
    %c0_47 = arith.constant 0 : index
    %78 = vector.load %arg8[%c0_43, %c0_44, %c0_45, %c0_46, %c0_47] : memref<1x1x8x8x64xf32, #tpu.memory_space<vmem>>, vector<1x1x8x8x64xf32>
    tpu.vector_store %arg8[%c0_43, %c0_44, %c0_45, %c0_46, %c0_47], %77 {strides = array<i32>} : memref<1x1x8x8x64xf32, #tpu.memory_space<vmem>>, vector<1x1x8x8x64xf32>,
    return
  }
  func.func @transform_0(%arg0: i32, %arg1: i32) -> (i32, i32, i32, i32, i32) {
    %c0_i32 = arith.constant 0 : i32
    %c0_i32_0 = arith.constant 0 : i32
    %c0_i32_1 = arith.constant 0 : i32
    %c0_i32_2 = arith.constant 0 : i32
    return %arg0, %arg1, %c0_i32, %c0_i32_0, %c0_i32_1 : i32, i32, i32, i32, i32
  }
  func.func @transform_1(%arg0: i32, %arg1: i32) -> (i32, i32, i32, i32, i32) {
    %c0_i32 = arith.constant 0 : i32
    %c0_i32_0 = arith.constant 0 : i32
    %c0_i32_1 = arith.constant 0 : i32
    %c0_i32_2 = arith.constant 0 : i32
    return %arg0, %arg1, %c0_i32, %c0_i32_0, %c0_i32_1 : i32, i32, i32, i32, i32
  }
  func.func @transform_2(%arg0: i32, %arg1: i32) -> (i32, i32, i32) {
    %c0_i32 = arith.constant 0 : i32
    %c0_i32_0 = arith.constant 0 : i32
    %c0_i32_1 = arith.constant 0 : i32
    %c0_i32_2 = arith.constant 0 : i32
    return %c0_i32, %c0_i32_0, %c0_i32_1 : i32, i32, i32
  }
  func.func @transform_3(%arg0: i32, %arg1: i32) -> (i32, i32) {
    %c0_i32 = arith.constant 0 : i32
    %c0_i32_0 = arith.constant 0 : i32
    %c0_i32_1 = arith.constant 0 : i32
    return %c0_i32, %c0_i32_0 : i32, i32
  }
  func.func @transform_4(%arg0: i32, %arg1: i32) -> (i32, i32) {
    %c0_i32 = arith.constant 0 : i32
    %c0_i32_0 = arith.constant 0 : i32
    %c0_i32_1 = arith.constant 0 : i32
    return %c0_i32, %c0_i32_0 : i32, i32
  }
  func.func @transform_5(%arg0: i32, %arg1: i32) -> (i32, i32) {
    %c0_i32 = arith.constant 0 : i32
    %c0_i32_0 = arith.constant 0 : i32
    %c0_i32_1 = arith.constant 0 : i32
    return %c0_i32, %c0_i32_0 : i32, i32
  }
  func.func @transform_6(%arg0: i32, %arg1: i32) -> (i32, i32, i32, i32, i32) {
    %c0_i32 = arith.constant 0 : i32
    %c0_i32_0 = arith.constant 0 : i32
    %c0_i32_1 = arith.constant 0 : i32
    %c0_i32_2 = arith.constant 0 : i32
    return %arg0, %arg1, %c0_i32, %c0_i32_0, %c0_i32_1 : i32, i32, i32, i32, i32
  }
}

</mosaic_0001>

<bundles_post_ra>
// kernel: resnet_block_3d_forward.6
= control target key start
LH: loop header
LB: loop body
LE: loop exit
PB: predicated region body
PF: predicated region fallthrough
CT: control target
= control target key end

     0   :  { %8 = vsyncpa [#allocation3], 0  ;;  %s824_s0 = inlined_call_operand.hbm [shape: f32[2,256,32], index: 0, kind: input, shape index: {}]   ;;  %s825_s1 = inlined_call_operand.vmem [shape: f32[2,1,32], index: 1, kind: output, shape index: {0}]   ;;  %s826_s2 = inlined_call_operand.vmem [shape: f32[2,1,32], index: 2, kind: output, shape index: {1}]  }
   0x1   :  { %10 = vsyncpa [#allocation3 + $0x1], 0  ;;  %s609_s9 = smov 0   ;;  %s611_s10 = smov 0  }
   0x2   :  { %s613_s11 = smov 0   ;;  %s615_s12 = smov 0  }
   0x3   :  { %s617_s13 = smov 0   ;;  %s619_s14 = smov 0  }
   0x4   :  { %s621_s15 = smov 0   ;;  %s623_s16 = smov 0  }
   0x5 LB: > { %s405_s17 = sadd.s32 4294967295, %s588_s16   ;;  %s25_s18 = sadd.s32 1, %s580_s14  ;;  %s588_s16 = sphi %s623_s16, %s16_s16   ;;  %s584_s15 = sphi %s621_s15, %s837_s15   ;;  %s580_s14 = sphi %s619_s14, %s836_s14   ;;  %s576_s13 = sphi %s617_s13, %s835_s13   ;;  %s572_s12 = sphi %s615_s12, %s834_s12   ;;  %s568_s11 = sphi %s613_s11, %s833_s11   ;;  %s564_s10 = sphi %s611_s10, %s832_s10   ;;  %s560_s9 = sphi %s609_s9, %s831_s9  }
   0x6   : > { %p26_p0 = scmp.ge.s32.totalorder %s25_s18, 2  ;;  %s28_s19 = sadd.s32 1, %s584_s15 }
   0x7   : > { %s37_s20 = sadd.s32 1, %s568_s11  ;;  %p44_p1 = scmp.ne.s32.totalorder %s568_s11, %s564_s10 }
   0x8   : > { %s839_s18 = smov (%p26_p0, %s25_s18), 0  ;;  %s841_s19 = smov (!%p26_p0, %s28_s19), %s584_s15 }
   0x9   : > { %s33_s21 = ssub.s32 %s580_s14, %s839_s18  ;;  %p45_p2 = scmp.eq.s32.totalorder %s588_s16, 0 }
   0xa   : > { %p30_p3 = scmp.ge.s32.totalorder %s841_s19, 2  ;;  %p50_p4 = scmp.ne.s32.totalorder %s564_s10, %s560_s9 }
   0xb   : > { %p660_p5 = por %p45_p2, %p44_p1  ;;  %p51_p6 = scmp.eq.s32.totalorder %s405_s17, 0 }
   0xc   : > { %s843_s19 = smov (%p30_p3, %s841_s19), 0  ;;  %p424_p8 = scmp.lt.s32.totalorder %s588_s16, 4 }
   0xd   : > { %p666_p7 = por %p51_p6, %p50_p4  ;;  %s32_s24 = ssub.s32 %s584_s15, %s843_s19 }
   0xe   : > { %s34_s25 = sor.u32 %s33_s21, %s32_s24  ;;  %s126_s26 = sand.u32 1, %s568_s11  }
   0xf   : > { %p35_p9 = scmp.eq.s32.totalorder %s34_s25, 0  ;;  %s409_s27 = sshll.u32 %s126_s26, 7 }
  0x10   : > { %s410_s28 = sshll.u32 %s580_s14, 4  ;;  %s411_s30 = sshll.u32 %s584_s15, 5 }
  0x11   : > { %s676_s29 = scalar_select %p35_p9, %s568_s11, %s37_s20  }
  0x12   : > { %s136_s3 = sadd.s32 %s411_s30, %s410_s28  ;;  %s130_s4 = scalar_lea.vmem [#allocation2], %s409_s27 }
  0x13   : > { %s139_s5 = sshll.u32 %s130_s4, 4  ;;  %s412_s6 = sshll.u32 %s136_s3, 7  ;;  %s679_s5 = int_to_ptr.vmem [resolvable:$true] %s139_s5 }
  0x14   : > { %s684_s9 = scalar_lea.hbm %s824_s0, %s412_s6  ;;  %p690_p10 = pnand %p424_p8, %p660_p5 }
  0x15   : > { %s695_s20 = scalar_lea.sflag [#allocation3], %s126_s26  ;;  %s492_s21 = scalar_lea.hbm %s684_s9, 2048 }
  0x16   : > { %p493_p12 = scmp.ne.s32.totalorder %s684_s9, %s492_s21  ;;  %p494_p13 = pneg %p690_p10 }
  0x17   : > { %s497_s25 = scalar_lea.hbm %s824_s0, 8192  ;;  %p498_p2 = scmp.lt.u32.totalorder %s684_s9, %s824_s0 }
  0x18   : > { %p495_p0 = pnand %p494_p13, %p493_p12  ;;  %p499_p3 = scmp.lt.u32.totalorder %s497_s25, %s492_s21 }
  0x19   : > { %p501_p5 = scmp.lt.u32.totalorder %s492_s21, %s684_s9 }
  0x1a   : > { %p496_p1 = pneg %p495_p0  ;;  %p500_p4 = por %p499_p3, %p498_p2 }
  0x1c   : > { %p502_p6 = por %p501_p5, %p500_p4 }
  0x1e   : > { %p503_p8 = pnand %p502_p6, %p496_p1 }
  0x20   : > { %506 = shalt.err (!%p503_p8)
}
  0x21   : > { %s507_s26 = scalar_lea.vmem %s679_s5, 2048  ;;  %s590_s30 = smov [#allocation2]  }
  0x22   : > { %p508_p9 = scmp.ne.s32.totalorder %s679_s5, %s507_s26  ;;  %s512_s3 = sshll.u32 %s590_s30, 4  ;;  %s513_s3 = int_to_ptr.vmem [resolvable:$false] %s512_s3 }
  0x23   : > { %s514_s4 = scalar_lea.vmem %s513_s3, 4096  ;;  %p515_p11 = scmp.lt.s32.totalorder %s679_s5, %s513_s3 }
  0x24   : > { %p510_p12 = pnand %p508_p9, %p494_p13  ;;  %p516_p2 = scmp.lt.s32.totalorder %s514_s4, %s507_s26 }
  0x26   : > { %p511_p0 = pneg %p510_p12  ;;  %p517_p3 = por %p516_p2, %p515_p11 }
  0x28   : > { %p518_p4 = pnand %p517_p3, %p511_p0 }
  0x2a   : > { %521 = shalt.err (!%p518_p4)
}
  0x2b   : > { %s591_s6 = smov 128   ;;  %s592_s7 = smov 8  }
  0x2c   : > { %423 = dma.hbm_to_vmem [thread:$0]  (!%p690_p10), %s684_s9, 2048, %s679_s5, %s695_s20, %s591_s6, %s591_s6, %s592_s7  }
  0x2d   : > { %p147_p13 = scmp.lt.s32.totalorder %s588_s16, 5  ;;  %p830_p1 = scmp.ge.s32.totalorder %s588_s16, 1 }
  0x2f   : > { %p148_p5 = pnand %p830_p1, %p147_p13 }
  0x30   : > { %s153_s8 = sand.u32 (!%p148_p5), 1, %s564_s10  }
  0x31   : > { %151 = sbr.rel (%p148_p5) target bundleno = 116 (0x74), region = 24  ;;  %s414_s21 = sshll.u32 (!%p148_p5), %s153_s8, 7 }
  0x32   : > { %s154_s22 = scalar_lea.sflag (!%p148_p5), [#allocation3], %s153_s8  ;;  %s727_s24 = scalar_lea.vmem (!%p148_p5), [#allocation2], %s414_s21 }
  0x38   : > { %555 = dma.done.wait (%p666_p7), %s154_s22, 2048  }
  0x39   : > { %557 = vsyncadd (%p666_p7), %s154_s22, 4294965248  ;;  %p180_p11 = scmp.lt.s32.totalorder %s576_s13, 1  ;;  %p415_p10 = scmp.ne.s32.totalorder %s572_s12, 0 }
  0x3a   : > { %vm190_vm0 = vcmask (!%p415_p10), 253952   ;;  %v593_v0 = vmov (!%p415_p10), 0.0  }
  0x3b   : > { %s845_s13 = smov (!%p180_p11, %s576_s13), 1  ;;  %189 = sbr.rel (%p415_p10) target bundleno = 66 (0x42), region = 32 }
  0x3c   : > { %s738_s17 = scalar_lea.vmem %s825_s1, %s845_s13  ;;  %s743_s27 = scalar_lea.vmem %s826_s2, %s845_s13 }
  0x3d   : > { %191 = vst.msk [vmem:[%s738_s17] sm:$0x1] (!%p415_p10), %vm190_vm0, %v593_v0  ;;  %192 = vst.msk [vmem:[%s743_s27] sm:$0x1] (!%p415_p10), %vm190_vm0, %v593_v0 }
  0x42 PF: > { %v193_v1 = vld [vmem:[%s727_s24] sm:$0xff]  ;;  %v194_v2 = vld [vmem:[%s727_s24 + $0x8] sm:$0xff]  ;;  %v195_v3 = vld [vmem:[%s727_s24 + $0x10] sm:$0xff]  ;;  %vm210_vm1 = vcmask 261120   ;;  %vm249_vm2 = vcmask 253952  }
  0x43   : > { %v211_v4 = vsel %vm210_vm1, %v193_v1, 0.0  ;;  %v212_v5 = vsel %vm210_vm1, %v194_v2, 0.0  ;;  %v214_v6 = vsel %vm210_vm1, %v195_v3, 0.0  ;;  %v196_v7 = vld [vmem:[%s727_s24 + $0x18] sm:$0xff]  ;;  %v197_v10 = vld [vmem:[%s727_s24 + $0x20] sm:$0xff]  ;;  %v198_v13 = vld [vmem:[%s727_s24 + $0x28] sm:$0xff]  ;;  %v252_v15 = vmul.f32 %v193_v1, %v193_v1 }
  0x44   : > { %v213_v8 = vadd.f32 %v212_v5, %v211_v4  ;;  %v216_v9 = vsel %vm210_vm1, %v196_v7, 0.0  ;;  %v218_v12 = vsel %vm210_vm1, %v197_v10, 0.0  ;;  %v253_v16 = vmul.f32 %v194_v2, %v194_v2  ;;  %v199_v19 = vld [vmem:[%s727_s24 + $0x30] sm:$0xff]  ;;  %v200_v24 = vld [vmem:[%s727_s24 + $0x38] sm:$0xff]  ;;  %v201_v31 = vld [vmem:[%s727_s24 + $0x40] sm:$0xff] }
  0x45   : > { %v254_v17 = vmul.f32 %v195_v3, %v195_v3  ;;  %v220_v18 = vsel %vm210_vm1, %v198_v13, 0.0  ;;  %v255_v21 = vmul.f32 %v196_v7, %v196_v7  ;;  %v222_v22 = vsel %vm210_vm1, %v199_v19, 0.0  ;;  %v202_v37 = vld [vmem:[%s727_s24 + $0x48] sm:$0xff]  ;;  %v203_v43 = vld [vmem:[%s727_s24 + $0x50] sm:$0xff]  ;;  %v204_v49 = vld [vmem:[%s727_s24 + $0x58] sm:$0xff] }
  0x46   : > { %v215_v11 = vadd.f32 %v214_v6, %v213_v8  ;;  %v256_v23 = vmul.f32 %v197_v10, %v197_v10  ;;  %v268_v26 = vsel %vm210_vm1, %v252_v15, 0.0  ;;  %v269_v27 = vsel %vm210_vm1, %v253_v16, 0.0  ;;  %v205_v55 = vld [vmem:[%s727_s24 + $0x60] sm:$0xff]  ;;  %v206_v61 = vld [vmem:[%s727_s24 + $0x68] sm:$0xff]  ;;  %v207_v3 = vld [vmem:[%s727_s24 + $0x70] sm:$0xff] }
  0x47   : > { %v271_v28 = vsel %vm210_vm1, %v254_v17, 0.0  ;;  %v224_v29 = vsel %vm210_vm1, %v200_v24, 0.0  ;;  %v270_v30 = vadd.f32 %v269_v27, %v268_v26  ;;  %v257_v33 = vmul.f32 %v198_v13, %v198_v13 }
  0x48   : > { %v217_v14 = vadd.f32 %v216_v9, %v215_v11  ;;  %v273_v34 = vsel %vm210_vm1, %v255_v21, 0.0  ;;  %v226_v35 = vsel %vm210_vm1, %v201_v31, 0.0  ;;  %v258_v39 = vmul.f32 %v199_v19, %v199_v19  ;;  %v208_v9 = vld [vmem:[%s727_s24 + $0x78] sm:$0xff] }
  0x49   : > { %v272_v36 = vadd.f32 %v271_v28, %v270_v30  ;;  %v275_v40 = vsel %vm210_vm1, %v256_v23, 0.0  ;;  %v228_v41 = vsel %vm210_vm1, %v202_v37, 0.0  ;;  %v259_v45 = vmul.f32 %v200_v24, %v200_v24 }
  0x4a   : > { %v219_v20 = vadd.f32 %v218_v12, %v217_v14  ;;  %v277_v46 = vsel %vm210_vm1, %v257_v33, 0.0  ;;  %v230_v47 = vsel %vm210_vm1, %v203_v43, 0.0  ;;  %v260_v51 = vmul.f32 %v201_v31, %v201_v31 }
  0x4b   : > { %v274_v42 = vadd.f32 %v273_v34, %v272_v36  ;;  %v279_v52 = vsel %vm210_vm1, %v258_v39, 0.0  ;;  %v232_v53 = vsel %vm210_vm1, %v204_v49, 0.0  ;;  %v261_v57 = vmul.f32 %v202_v37, %v202_v37  ;;  %v209_v36 = vld [vmem:[%s738_s17] sm:$0x1] }
  0x4c   : > { %v221_v25 = vadd.f32 %v220_v18, %v219_v20  ;;  %v281_v58 = vsel %vm210_vm1, %v259_v45, 0.0  ;;  %v234_v59 = vsel %vm210_vm1, %v205_v55, 0.0  ;;  %v262_v63 = vmul.f32 %v203_v43, %v203_v43 }
  0x4d   : > { %v276_v48 = vadd.f32 %v275_v40, %v274_v42  ;;  %v283_v0 = vsel %vm210_vm1, %v260_v51, 0.0  ;;  %v236_v1 = vsel %vm210_vm1, %v206_v61, 0.0  ;;  %v263_v5 = vmul.f32 %v204_v49, %v204_v49 }
  0x4e   : > { %v223_v32 = vadd.f32 %v222_v22, %v221_v25  ;;  %v285_v6 = vsel %vm210_vm1, %v261_v57, 0.0  ;;  %v238_v7 = vsel %vm210_vm1, %v207_v3, 0.0  ;;  %v264_v11 = vmul.f32 %v205_v55, %v205_v55 }
  0x4f   : > { %v278_v54 = vadd.f32 %v277_v46, %v276_v48  ;;  %v287_v12 = vsel %vm210_vm1, %v262_v63, 0.0  ;;  %v240_v13 = vsel %vm210_vm1, %v208_v9, 0.0  ;;  %v265_v16 = vmul.f32 %v206_v61, %v206_v61 }
  0x50   : > { %v225_v38 = vadd.f32 %v224_v29, %v223_v32  ;;  %v289_v17 = vsel %vm210_vm1, %v263_v5, 0.0  ;;  %v266_v20 = vmul.f32 %v207_v3, %v207_v3  ;;  %v291_v21 = vsel %vm210_vm1, %v264_v11, 0.0 }
  0x51   : > { %v280_v60 = vadd.f32 %v279_v52, %v278_v54  ;;  %v267_v24 = vmul.f32 %v208_v9, %v208_v9  ;;  %v293_v25 = vsel %vm210_vm1, %v265_v16, 0.0 }
  0x52   : > { %v227_v44 = vadd.f32 %v226_v35, %v225_v38  ;;  %v295_v28 = vsel %vm210_vm1, %v266_v20, 0.0 }
  0x53   : > { %v282_v2 = vadd.f32 %v281_v58, %v280_v60  ;;  %v297_v31 = vsel %vm210_vm1, %v267_v24, 0.0 }
  0x54   : > { %v229_v50 = vadd.f32 %v228_v41, %v227_v44  ;;  %v251_v44 = vld [vmem:[%s743_s27] sm:$0x1] }
  0x55   : > { %v284_v8 = vadd.f32 %v283_v0, %v282_v2 }
  0x56   : > { %v231_v56 = vadd.f32 %v230_v47, %v229_v50 }
  0x57   : > { %v286_v14 = vadd.f32 %v285_v6, %v284_v8 }
  0x58   : > { %v233_v62 = vadd.f32 %v232_v53, %v231_v56 }
  0x59   : > { %v288_v18 = vadd.f32 %v287_v12, %v286_v14 }
  0x5a   : > { %v235_v4 = vadd.f32 %v234_v59, %v233_v62 }
  0x5b   : > { %v290_v22 = vadd.f32 %v289_v17, %v288_v18 }
  0x5c   : > { %v237_v10 = vadd.f32 %v236_v1, %v235_v4 }
  0x5d   : > { %v292_v26 = vadd.f32 %v291_v21, %v290_v22 }
  0x5e   : > { %v239_v15 = vadd.f32 %v238_v7, %v237_v10 }
  0x5f   : > { %v294_v29 = vadd.f32 %v293_v25, %v292_v26 }
  0x60   : > { %v241_v19 = vadd.f32 %v240_v13, %v239_v15 }
  0x61   : > { %v296_v32 = vadd.f32 %v295_v28, %v294_v29 }
  0x62   : > { %v242_v23 = vrot.slane %v241_v19, 4 }
  0x63   : > { %v298_v34 = vadd.f32 %v297_v31, %v296_v32 }
  0x64   : > { %v243_v27 = vadd.f32 %v242_v23, %v241_v19 }
  0x65   : > { %v299_v37 = vrot.slane %v298_v34, 4 }
  0x66   : > { %v244_v30 = vrot.slane %v243_v27, 2 }
  0x67   : > { %v300_v39 = vadd.f32 %v299_v37, %v298_v34 }
  0x68   : > { %v245_v33 = vadd.f32 %v244_v30, %v243_v27 }
  0x69   : > { %v301_v41 = vrot.slane %v300_v39, 2 }
  0x6a   : > { %v246_v35 = vrot.slane %v245_v33, 1 }
  0x6b   : > { %v302_v42 = vadd.f32 %v301_v41, %v300_v39 }
  0x6c   : > { %v247_v38 = vadd.f32 %v246_v35, %v245_v33 }
  0x6d   : > { %v303_v43 = vrot.slane %v302_v42, 1 }
  0x6e   : > { %v248_v40 = vadd.f32 %v247_v38, %v209_v36 }
  0x6f   : > { %v304_v45 = vadd.f32 %v303_v43, %v302_v42 }
  0x70   : > { %250 = vst.msk [vmem:[%s738_s17] sm:$0x1] %vm249_vm2, %v248_v40 }
  0x71   : > { %v305_v46 = vadd.f32 %v304_v45, %v251_v44 }
  0x73   : > { %306 = vst.msk [vmem:[%s743_s27] sm:$0x1] %vm249_vm2, %v305_v46 }
  0x74 PF: > { %s16_s16 = sadd.s32 1, %s588_s16   ;;  %s831_s9 = smov %s564_s10 }
  0x75   : > { %p13_p7 = scmp.ge.s32.totalorder %s16_s16, 6   ;;  %s832_s10 = smov %s568_s11 }
  0x76   : > { %s833_s11 = smov %s676_s29  ;;  %s834_s12 = smov %s580_s14 }
  0x77   : > { %s835_s13 = smov %s584_s15  ;;  %s836_s14 = smov %s839_s18 }
  0x78   : > { %s837_s15 = smov %s843_s19  ;;  %15 = sbr.rel (!%p13_p7) target bundleno = 5 (0x5), region = 80 }
  0x7f   :  { %336 = vsyncpa [#allocation3], 1 }
  0x80   :  { %338 = vsyncpa [#allocation3 + $0x1], 1 }

// kernel: resnet_block_3d_forward.7
= control target key start
LH: loop header
LB: loop body
LE: loop exit
PB: predicated region body
PF: predicated region fallthrough
CT: control target
= control target key end

     0   :  { %s716_s12 = smov 0   ;;  %s718_s13 = smov 0   ;;  %s932_s0 = inlined_call_operand.vmem [shape: f32[2,256,32], index: 0, kind: input, shape index: {}]   ;;  %s933_s1 = inlined_call_operand.vmem [shape: f32[2,1,32], index: 1, kind: input, shape index: {}]   ;;  %s934_s2 = inlined_call_operand.vmem [shape: f32[2,1,32], index: 2, kind: input, shape index: {}]   ;;  %s935_s3 = inlined_call_operand.vmem [shape: f32[2,256,32], index: 3, kind: output, shape index: {}]  }
   0x1   :  { %s720_s14 = smov 0   ;;  %s722_s15 = smov 0  }
   0x2   :  { %s724_s16 = smov 0  }
   0x3 LB: > { %s22_s17 = sadd.s32 1, %s686_s14  ;;  %s25_s18 = sadd.s32 1, %s690_s15  ;;  %s694_s16 = sphi %s724_s16, %s13_s16   ;;  %s690_s15 = sphi %s722_s15, %s939_s15   ;;  %s686_s14 = sphi %s720_s14, %s938_s14   ;;  %s682_s13 = sphi %s718_s13, %s937_s13   ;;  %s678_s12 = sphi %s716_s12, %s936_s12  }
   0x4   : > { %p23_p0 = scmp.ge.s32.totalorder %s22_s17, 2  ;;  %p541_p1 = scmp.ge.s32.totalorder %s694_s16, 1 }
   0x5   : > { %p174_p2 = scmp.lt.s32.totalorder %s694_s16, 5 }
   0x6   : > { %s941_s17 = smov (%p23_p0, %s22_s17), 0  ;;  %s943_s18 = smov (!%p23_p0, %s25_s18), %s690_s15 }
   0x7   : > { %p175_p3 = pnand %p541_p1, %p174_p2  ;;  %p27_p4 = scmp.ge.s32.totalorder %s943_s18, 2 }
   0x8   : > { %s542_s19 = sshll.u32 (!%p175_p3), %s678_s12, 4  ;;  %p213_p5 = scmp.lt.s32.totalorder (!%p175_p3), %s682_s13, 1  ;;  %vm412_vm0 = vcmask (!%p175_p3), 261120  }
   0x9   : > { %s945_s18 = smov (%p27_p4, %s943_s18), 0  ;;  %178 = sbr.rel (%p175_p3) target bundleno = 85 (0x55), region = 32 }
   0xa   : > { %p215_p6 = scmp.lt.s32.totalorder (!%p175_p3), %s542_s19, 31 }
  0x10   : > { %s947_s13 = smov (!%p213_p5, %s682_s13), 1  ;;  %s949_s19 = smov (!%p215_p6, %s542_s19), 31 }
  0x11   : > { %s543_s20 = sshll.u32 %s947_s13, 5  ;;  %s224_s23 = scalar_lea.vmem %s933_s1, %s947_s13 }
  0x12   : > { %s749_s24 = sadd.s32 %s543_s20, %s949_s19  ;;  %s227_s27 = scalar_lea.vmem %s934_s2, %s947_s13  ;;  %v755_v0 = vld [vmem:[%s224_s23] ss:$0 sm:$0xff] }
  0x13   : > { %s544_s28 = sshll.u32 %s749_s24, 3  ;;  %v764_v1 = vld [vmem:[%s227_s27] ss:$0 sm:$0xff] }
  0x14   : > { %s762_s4 = scalar_lea.vmem %s932_s0, %s544_s28  ;;  %s867_s7 = scalar_lea.vmem %s935_s3, %s544_s28 }
  0x15   : > { %v238_v2 = vld [vmem:[%s762_s4] sm:$0xff]  ;;  %v239_v3 = vld [vmem:[%s762_s4 + $0x8] sm:$0xff]  ;;  %v240_v4 = vld [vmem:[%s762_s4 + $0x10] sm:$0xff] }
  0x16   : > { %v261_v5 = vmul.f32 %v755_v0, %v238_v2  ;;  %v262_v6 = vmul.f32 %v755_v0, %v239_v3  ;;  %v263_v7 = vmul.f32 %v755_v0, %v240_v4  ;;  %v241_v8 = vld [vmem:[%s762_s4 + $0x18] sm:$0xff]  ;;  %v242_v9 = vld [vmem:[%s762_s4 + $0x20] sm:$0xff]  ;;  %v243_v10 = vld [vmem:[%s762_s4 + $0x28] sm:$0xff] }
  0x17   : > { %v264_v11 = vmul.f32 %v755_v0, %v241_v8  ;;  %v265_v12 = vmul.f32 %v755_v0, %v242_v9  ;;  %v266_v13 = vmul.f32 %v755_v0, %v243_v10  ;;  %v244_v14 = vld [vmem:[%s762_s4 + $0x30] sm:$0xff]  ;;  %v245_v15 = vld [vmem:[%s762_s4 + $0x38] sm:$0xff]  ;;  %v246_v24 = vld [vmem:[%s762_s4 + $0x40] sm:$0xff] }
  0x18   : > { %v781_v16 = vadd.f32 %v764_v1, %v261_v5  ;;  %v784_v17 = vadd.f32 %v764_v1, %v262_v6  ;;  %v787_v18 = vadd.f32 %v764_v1, %v263_v7  ;;  %v267_v19 = vmul.f32 %v755_v0, %v244_v14  ;;  %v247_v29 = vld [vmem:[%s762_s4 + $0x48] sm:$0xff]  ;;  %v248_v34 = vld [vmem:[%s762_s4 + $0x50] sm:$0xff]  ;;  %v249_v35 = vld [vmem:[%s762_s4 + $0x58] sm:$0xff] }
  0x19   : > { %v791_v20 = vadd.f32 %v764_v1, %v264_v11  ;;  %v794_v21 = vadd.f32 %v764_v1, %v265_v12  ;;  %v797_v22 = vadd.f32 %v764_v1, %v266_v13  ;;  %v268_v23 = vmul.f32 %v755_v0, %v245_v15  ;;  %v250_v50 = vld [vmem:[%s762_s4 + $0x60] sm:$0xff]  ;;  %v251_v3 = vld [vmem:[%s762_s4 + $0x68] sm:$0xff]  ;;  %v252_v5 = vld [vmem:[%s762_s4 + $0x70] sm:$0xff] }
  0x1a   : > { %v300_v25 = vsub.f32 0.0, %v781_v16  ;;  %v301_v26 = vsub.f32 0.0, %v784_v17  ;;  %v302_v27 = vsub.f32 0.0, %v787_v18  ;;  %v805_v28 = vadd.f32 %v764_v1, %v267_v19  ;;  %v253_v6 = vld [vmem:[%s762_s4 + $0x78] sm:$0xff] }
  0x1b   : > { %v303_v30 = vsub.f32 0.0, %v791_v20  ;;  %v304_v31 = vsub.f32 0.0, %v794_v21  ;;  %v305_v32 = vsub.f32 0.0, %v797_v22  ;;  %v812_v33 = vadd.f32 %v764_v1, %v268_v23 }
  0x1c   : > { %v316_v36 = vmul.f32 1.442695, %v300_v25  ;;  %v318_v37 = vmul.f32 1.442695, %v301_v26  ;;  %v320_v38 = vmul.f32 1.442695, %v302_v27  ;;  %v269_v39 = vmul.f32 %v755_v0, %v246_v24 }
  0x1d   : > { %v322_v40 = vmul.f32 1.442695, %v303_v30  ;;  %v324_v41 = vmul.f32 1.442695, %v304_v31  ;;  %v326_v42 = vmul.f32 1.442695, %v305_v32  ;;  %v270_v43 = vmul.f32 %v755_v0, %v247_v29 }
  0x1e   : > { %592 = vpow2.f32 %v316_v36  ;;  %v306_v44 = vsub.f32 0.0, %v805_v28  ;;  %v307_v45 = vsub.f32 0.0, %v812_v33  ;;  %v821_v46 = vadd.f32 %v764_v1, %v269_v39 }
  0x1f   : > { %594 = vpow2.f32 %v318_v37  ;;  %v824_v47 = vadd.f32 %v764_v1, %v270_v43  ;;  %v271_v48 = vmul.f32 %v755_v0, %v248_v34  ;;  %v272_v49 = vmul.f32 %v755_v0, %v249_v35 }
  0x20   : > { %596 = vpow2.f32 %v320_v38  ;;  %v328_v51 = vmul.f32 1.442695, %v306_v44  ;;  %v330_v52 = vmul.f32 1.442695, %v307_v45  ;;  %v308_v53 = vsub.f32 0.0, %v821_v46 }
  0x21   : > { %598 = vpow2.f32 %v322_v40  ;;  %v309_v54 = vsub.f32 0.0, %v824_v47  ;;  %v832_v55 = vadd.f32 %v764_v1, %v271_v48  ;;  %v835_v56 = vadd.f32 %v764_v1, %v272_v49 }
  0x22   : > { %600 = vpow2.f32 %v324_v41  ;;  %v332_v57 = vmul.f32 1.442695, %v308_v53  ;;  %v273_v58 = vmul.f32 %v755_v0, %v250_v50  ;;  %v274_v9 = vmul.f32 %v755_v0, %v251_v3 }
  0x23   : > { %602 = vpow2.f32 %v326_v42  ;;  %v334_v59 = vmul.f32 1.442695, %v309_v54  ;;  %v310_v60 = vsub.f32 0.0, %v832_v55  ;;  %v311_v61 = vsub.f32 0.0, %v835_v56 }
  0x24   : > { %604 = vpow2.f32 %v328_v51  ;;  %v841_v62 = vadd.f32 %v764_v1, %v273_v58  ;;  %v275_v12 = vmul.f32 %v755_v0, %v252_v5  ;;  %v276_v15 = vmul.f32 %v755_v0, %v253_v6 }
  0x25   : > { %606 = vpow2.f32 %v330_v52  ;;  %v336_v63 = vmul.f32 1.442695, %v310_v60  ;;  %v338_v2 = vmul.f32 1.442695, %v311_v61  ;;  %v851_v26 = vadd.f32 %v764_v1, %v274_v9 }
  0x26   : > { %608 = vpow2.f32 %v332_v57  ;;  %v312_v4 = vsub.f32 0.0, %v841_v62  ;;  %v854_v30 = vadd.f32 %v764_v1, %v275_v12  ;;  %v857_v0 = vadd.f32 %v764_v1, %v276_v15 }
  0x27   : > { %610 = vpow2.f32 %v334_v59  ;;  %v313_v38 = vsub.f32 0.0, %v851_v26 }
  0x28   : > { %v593_v7 = vpop.eup %592  ;;  %612 = vpow2.f32 %v336_v63  ;;  %v340_v8 = vmul.f32 1.442695, %v312_v4  ;;  %v314_v41 = vsub.f32 0.0, %v854_v30  ;;  %v315_v1 = vsub.f32 0.0, %v857_v0 }
  0x29   : > { %v595_v10 = vpop.eup %594  ;;  %v348_v11 = vadd.f32 1.0, %v593_v7  ;;  %614 = vpow2.f32 %v338_v2  ;;  %v342_v50 = vmul.f32 1.442695, %v313_v38 }
  0x2a   : > { %v597_v13 = vpop.eup %596  ;;  %v349_v14 = vadd.f32 1.0, %v595_v10  ;;  %616 = vpow2.f32 %v340_v8  ;;  %v344_v53 = vmul.f32 1.442695, %v314_v41  ;;  %v346_v58 = vmul.f32 1.442695, %v315_v1 }
  0x2b   : > { %v599_v19 = vpop.eup %598  ;;  %618 = vrcp.f32 %v348_v11  ;;  %v350_v23 = vadd.f32 1.0, %v597_v13 }
  0x2c   : > { %v601_v24 = vpop.eup %600  ;;  %620 = vrcp.f32 %v349_v14  ;;  %v351_v25 = vadd.f32 1.0, %v599_v19 }
  0x2d   : > { %v603_v27 = vpop.eup %602  ;;  %622 = vrcp.f32 %v350_v23  ;;  %v352_v29 = vadd.f32 1.0, %v601_v24 }
  0x2e   : > { %v605_v31 = vpop.eup %604  ;;  %624 = vrcp.f32 %v351_v25  ;;  %v353_v32 = vadd.f32 1.0, %v603_v27 }
  0x2f   : > { %v607_v34 = vpop.eup %606  ;;  %626 = vrcp.f32 %v352_v29  ;;  %v354_v35 = vadd.f32 1.0, %v605_v31 }
  0x30   : > { %v609_v36 = vpop.eup %608  ;;  %628 = vrcp.f32 %v353_v32  ;;  %v355_v37 = vadd.f32 1.0, %v607_v34 }
  0x31   : > { %v611_v39 = vpop.eup %610  ;;  %630 = vrcp.f32 %v354_v35  ;;  %v356_v40 = vadd.f32 1.0, %v609_v36 }
  0x32   : > { %v613_v42 = vpop.eup %612  ;;  %632 = vrcp.f32 %v355_v37  ;;  %v357_v43 = vadd.f32 1.0, %v611_v39 }
  0x33   : > { %v615_v44 = vpop.eup %614  ;;  %634 = vrcp.f32 %v356_v40  ;;  %v358_v45 = vadd.f32 1.0, %v613_v42 }
  0x34   : > { %v617_v48 = vpop.eup %616  ;;  %636 = vrcp.f32 %v357_v43  ;;  %v359_v49 = vadd.f32 1.0, %v615_v44 }
  0x35   : > { %v619_v51 = vpop.eup %618  ;;  %638 = vrcp.f32 %v358_v45  ;;  %v360_v52 = vadd.f32 1.0, %v617_v48 }
  0x36   : > { %v621_v54 = vpop.eup %620  ;;  %v396_v57 = vmul.f32 %v619_v51, %v781_v16  ;;  %640 = vrcp.f32 %v359_v49 }
  0x37   : > { %v623_v59 = vpop.eup %622  ;;  %v397_v60 = vmul.f32 %v621_v54, %v784_v17  ;;  %642 = vrcp.f32 %v360_v52 }
  0x38   : > { %v625_v61 = vpop.eup %624  ;;  %413 = vst.msk [vmem:[%s867_s7] sm:$0xff] %vm412_vm0, %v396_v57  ;;  %v398_v63 = vmul.f32 %v623_v59, %v787_v18  ;;  %644 = vpow2.f32 %v342_v50 }
  0x39   : > { %v627_v2 = vpop.eup %626  ;;  %414 = vst.msk [vmem:[%s867_s7 + $0x8] sm:$0xff] %vm412_vm0, %v397_v60  ;;  %v399_v16 = vmul.f32 %v625_v61, %v791_v20  ;;  %646 = vpow2.f32 %v344_v53 }
  0x3a   : > { %v629_v3 = vpop.eup %628  ;;  %415 = vst.msk [vmem:[%s867_s7 + $0x10] sm:$0xff] %vm412_vm0, %v398_v63  ;;  %v400_v17 = vmul.f32 %v627_v2, %v794_v21  ;;  %648 = vpow2.f32 %v346_v58 }
  0x3b   : > { %v631_v4 = vpop.eup %630  ;;  %416 = vst.msk [vmem:[%s867_s7 + $0x18] sm:$0xff] %vm412_vm0, %v399_v16  ;;  %v401_v18 = vmul.f32 %v629_v3, %v797_v22 }
  0x3c   : > { %v633_v5 = vpop.eup %632  ;;  %417 = vst.msk [vmem:[%s867_s7 + $0x20] sm:$0xff] %vm412_vm0, %v400_v17  ;;  %v402_v20 = vmul.f32 %v631_v4, %v805_v28 }
  0x3d   : > { %v635_v6 = vpop.eup %634  ;;  %418 = vst.msk [vmem:[%s867_s7 + $0x28] sm:$0xff] %vm412_vm0, %v401_v18  ;;  %v403_v7 = vmul.f32 %v633_v5, %v812_v33 }
  0x3e   : > { %v637_v21 = vpop.eup %636  ;;  %419 = vst.msk [vmem:[%s867_s7 + $0x30] sm:$0xff] %vm412_vm0, %v402_v20  ;;  %v404_v8 = vmul.f32 %v635_v6, %v821_v46 }
  0x3f   : > { %v639_v9 = vpop.eup %638  ;;  %420 = vst.msk [vmem:[%s867_s7 + $0x38] sm:$0xff] %vm412_vm0, %v403_v7  ;;  %v405_v22 = vmul.f32 %v637_v21, %v824_v47 }
  0x40   : > { %v641_v10 = vpop.eup %640  ;;  %421 = vst.msk [vmem:[%s867_s7 + $0x40] sm:$0xff] %vm412_vm0, %v404_v8  ;;  %v406_v28 = vmul.f32 %v639_v9, %v832_v55 }
  0x41   : > { %v643_v11 = vpop.eup %642  ;;  %422 = vst.msk [vmem:[%s867_s7 + $0x48] sm:$0xff] %vm412_vm0, %v405_v22  ;;  %v407_v33 = vmul.f32 %v641_v10, %v835_v56 }
  0x42   : > { %v645_v12 = vpop.eup %644  ;;  %423 = vst.msk [vmem:[%s867_s7 + $0x50] sm:$0xff] %vm412_vm0, %v406_v28  ;;  %v408_v46 = vmul.f32 %v643_v11, %v841_v62 }
  0x43   : > { %v647_v13 = vpop.eup %646  ;;  %424 = vst.msk [vmem:[%s867_s7 + $0x58] sm:$0xff] %vm412_vm0, %v407_v33  ;;  %v361_v47 = vadd.f32 1.0, %v645_v12 }
  0x44   : > { %v649_v14 = vpop.eup %648  ;;  %425 = vst.msk [vmem:[%s867_s7 + $0x60] sm:$0xff] %vm412_vm0, %v408_v46  ;;  %v362_v55 = vadd.f32 1.0, %v647_v13 }
  0x45   : > { %650 = vrcp.f32 %v361_v47  ;;  %v363_v15 = vadd.f32 1.0, %v649_v14 }
  0x46   : > { %652 = vrcp.f32 %v362_v55 }
  0x47   : > { %654 = vrcp.f32 %v363_v15 }
  0x4f   : > { %v651_v56 = vpop.eup %650 }
  0x50   : > { %v653_v19 = vpop.eup %652  ;;  %v409_v23 = vmul.f32 %v651_v56, %v851_v26 }
  0x51   : > { %v655_v62 = vpop.eup %654  ;;  %v410_v24 = vmul.f32 %v653_v19, %v854_v30 }
  0x52   : > { %426 = vst.msk [vmem:[%s867_s7 + $0x68] sm:$0xff] %vm412_vm0, %v409_v23  ;;  %v411_v25 = vmul.f32 %v655_v62, %v857_v0 }
  0x53   : > { %427 = vst.msk [vmem:[%s867_s7 + $0x70] sm:$0xff] %vm412_vm0, %v410_v24 }
  0x54   : > { %428 = vst.msk [vmem:[%s867_s7 + $0x78] sm:$0xff] %vm412_vm0, %v411_v25 }
  0x55 PF: > { %s13_s16 = sadd.s32 1, %s694_s16   ;;  %s936_s12 = smov %s686_s14 }
  0x56   : > { %p10_p7 = scmp.ge.s32.totalorder %s13_s16, 6   ;;  %s937_s13 = smov %s690_s15 }
  0x57   : > { %s938_s14 = smov %s941_s17  ;;  %s939_s15 = smov %s945_s18 }
  0x58   :  { %12 = sbr.rel (!%p10_p7) target bundleno = 3 (0x3), region = 68 }

// kernel: resnet_block_3d_forward.9
= control target key start
LH: loop header
LB: loop body
LE: loop exit
PB: predicated region body
PF: predicated region fallthrough
CT: control target
= control target key end

     0   :  { %s495_s9 = smov 0   ;;  %s497_s10 = smov 0   ;;  %s609_s0 = inlined_call_operand.vmem [shape: f32[2,256,64], index: 0, kind: input, shape index: {}]   ;;  %s610_s1 = inlined_call_operand.vmem [shape: f32[2,1,64], index: 1, kind: output, shape index: {0}]   ;;  %s611_s2 = inlined_call_operand.vmem [shape: f32[2,1,64], index: 2, kind: output, shape index: {1}]  }
   0x1   :  { %s499_s11 = smov 0   ;;  %s501_s12 = smov 0  }
   0x2   :  { %s503_s13 = smov 0  }
   0x3 LB: > { %s22_s14 = sadd.s32 1, %s469_s11  ;;  %s25_s15 = sadd.s32 1, %s473_s12  ;;  %s477_s13 = sphi %s503_s13, %s13_s13   ;;  %s473_s12 = sphi %s501_s12, %s615_s12   ;;  %s469_s11 = sphi %s499_s11, %s614_s11   ;;  %s465_s10 = sphi %s497_s10, %s613_s10   ;;  %s461_s9 = sphi %s495_s9, %s612_s9  }
   0x4   : > { %p23_p0 = scmp.ge.s32.totalorder %s22_s14, 2  ;;  %p391_p1 = scmp.ge.s32.totalorder %s477_s13, 1 }
   0x5   : > { %p134_p2 = scmp.lt.s32.totalorder %s477_s13, 5 }
   0x6   : > { %s617_s14 = smov (%p23_p0, %s22_s14), 0  ;;  %s619_s15 = smov (!%p23_p0, %s25_s15), %s473_s12 }
   0x7   : > { %p135_p3 = pnand %p391_p1, %p134_p2  ;;  %p27_p4 = scmp.ge.s32.totalorder %s619_s15, 2 }
   0x8   : > { %s392_s16 = sshll.u32 (!%p135_p3), %s461_s9, 4  ;;  %p162_p5 = scmp.lt.s32.totalorder (!%p135_p3), %s465_s10, 1 }
   0x9   : > { %s621_s15 = smov (%p27_p4, %s619_s15), 0  ;;  %138 = sbr.rel (%p135_p3) target bundleno = 76 (0x4c), region = 24 }
   0xa   : > { %p164_p6 = scmp.lt.s32.totalorder (!%p135_p3), %s392_s16, 31  ;;  %p395_p7 = scmp.ne.s32.totalorder (!%p135_p3), %s461_s9, 0 }
  0x10   : > { %s623_s10 = smov (!%p162_p5, %s465_s10), 1  ;;  %s625_s16 = smov (!%p164_p6, %s392_s16), 31 }
  0x11   : > { %s393_s17 = sshll.u32 %s623_s10, 5  ;;  %s528_s20 = scalar_lea.vmem %s610_s1, %s623_s10  ;;  %vm181_vm0 = vcmask (!%p395_p7), 516096   ;;  %v479_v0 = vmov (!%p395_p7), 0.0  }
  0x12   : > { %s167_s21 = sadd.s32 %s393_s17, %s625_s16  ;;  %s533_s24 = scalar_lea.vmem %s611_s2, %s623_s10  ;;  %182 = vst.msk [vmem:[%s528_s20] sm:$0x1] (!%p395_p7), %vm181_vm0, %v479_v0 }
  0x13   : > { %s394_s25 = sshll.u32 %s167_s21, 3  ;;  %180 = sbr.rel (%p395_p7) target bundleno = 26 (0x1a), region = 28  ;;  %183 = vst.msk [vmem:[%s533_s24] sm:$0x1] (!%p395_p7), %vm181_vm0, %v479_v0 }
  0x14   : > { %s538_s28 = scalar_lea.vmem %s609_s0, %s394_s25 }
  0x1a PF: > { %v184_v1 = vld [vmem:[%s538_s28] sm:$0xff]  ;;  %v185_v2 = vld [vmem:[%s538_s28 + $0x8] sm:$0xff]  ;;  %v186_v3 = vld [vmem:[%s538_s28 + $0x10] sm:$0xff]  ;;  %vm201_vm1 = vcmask 523264   ;;  %vm240_vm2 = vcmask 516096  }
  0x1b   : > { %v202_v4 = vsel %vm201_vm1, %v184_v1, 0.0  ;;  %v203_v5 = vsel %vm201_vm1, %v185_v2, 0.0  ;;  %v205_v6 = vsel %vm201_vm1, %v186_v3, 0.0  ;;  %v187_v7 = vld [vmem:[%s538_s28 + $0x18] sm:$0xff]  ;;  %v188_v10 = vld [vmem:[%s538_s28 + $0x20] sm:$0xff]  ;;  %v189_v13 = vld [vmem:[%s538_s28 + $0x28] sm:$0xff]  ;;  %v243_v15 = vmul.f32 %v184_v1, %v184_v1 }
  0x1c   : > { %v204_v8 = vadd.f32 %v203_v5, %v202_v4  ;;  %v207_v9 = vsel %vm201_vm1, %v187_v7, 0.0  ;;  %v209_v12 = vsel %vm201_vm1, %v188_v10, 0.0  ;;  %v244_v16 = vmul.f32 %v185_v2, %v185_v2  ;;  %v190_v19 = vld [vmem:[%s538_s28 + $0x30] sm:$0xff]  ;;  %v191_v24 = vld [vmem:[%s538_s28 + $0x38] sm:$0xff]  ;;  %v192_v31 = vld [vmem:[%s538_s28 + $0x40] sm:$0xff] }
  0x1d   : > { %v245_v17 = vmul.f32 %v186_v3, %v186_v3  ;;  %v211_v18 = vsel %vm201_vm1, %v189_v13, 0.0  ;;  %v246_v21 = vmul.f32 %v187_v7, %v187_v7  ;;  %v213_v22 = vsel %vm201_vm1, %v190_v19, 0.0  ;;  %v193_v37 = vld [vmem:[%s538_s28 + $0x48] sm:$0xff]  ;;  %v194_v43 = vld [vmem:[%s538_s28 + $0x50] sm:$0xff]  ;;  %v195_v49 = vld [vmem:[%s538_s28 + $0x58] sm:$0xff] }
  0x1e   : > { %v206_v11 = vadd.f32 %v205_v6, %v204_v8  ;;  %v247_v23 = vmul.f32 %v188_v10, %v188_v10  ;;  %v259_v26 = vsel %vm201_vm1, %v243_v15, 0.0  ;;  %v260_v27 = vsel %vm201_vm1, %v244_v16, 0.0  ;;  %v196_v55 = vld [vmem:[%s538_s28 + $0x60] sm:$0xff]  ;;  %v197_v61 = vld [vmem:[%s538_s28 + $0x68] sm:$0xff]  ;;  %v198_v3 = vld [vmem:[%s538_s28 + $0x70] sm:$0xff] }
  0x1f   : > { %v262_v28 = vsel %vm201_vm1, %v245_v17, 0.0  ;;  %v215_v29 = vsel %vm201_vm1, %v191_v24, 0.0  ;;  %v261_v30 = vadd.f32 %v260_v27, %v259_v26  ;;  %v248_v33 = vmul.f32 %v189_v13, %v189_v13 }
  0x20   : > { %v208_v14 = vadd.f32 %v207_v9, %v206_v11  ;;  %v264_v34 = vsel %vm201_vm1, %v246_v21, 0.0  ;;  %v217_v35 = vsel %vm201_vm1, %v192_v31, 0.0  ;;  %v249_v39 = vmul.f32 %v190_v19, %v190_v19  ;;  %v199_v9 = vld [vmem:[%s538_s28 + $0x78] sm:$0xff] }
  0x21   : > { %v263_v36 = vadd.f32 %v262_v28, %v261_v30  ;;  %v266_v40 = vsel %vm201_vm1, %v247_v23, 0.0  ;;  %v219_v41 = vsel %vm201_vm1, %v193_v37, 0.0  ;;  %v250_v45 = vmul.f32 %v191_v24, %v191_v24 }
  0x22   : > { %v210_v20 = vadd.f32 %v209_v12, %v208_v14  ;;  %v268_v46 = vsel %vm201_vm1, %v248_v33, 0.0  ;;  %v221_v47 = vsel %vm201_vm1, %v194_v43, 0.0  ;;  %v251_v51 = vmul.f32 %v192_v31, %v192_v31 }
  0x23   : > { %v265_v42 = vadd.f32 %v264_v34, %v263_v36  ;;  %v270_v52 = vsel %vm201_vm1, %v249_v39, 0.0  ;;  %v223_v53 = vsel %vm201_vm1, %v195_v49, 0.0  ;;  %v252_v57 = vmul.f32 %v193_v37, %v193_v37  ;;  %v200_v36 = vld [vmem:[%s528_s20] sm:$0x1] }
  0x24   : > { %v212_v25 = vadd.f32 %v211_v18, %v210_v20  ;;  %v272_v58 = vsel %vm201_vm1, %v250_v45, 0.0  ;;  %v225_v59 = vsel %vm201_vm1, %v196_v55, 0.0  ;;  %v253_v63 = vmul.f32 %v194_v43, %v194_v43 }
  0x25   : > { %v267_v48 = vadd.f32 %v266_v40, %v265_v42  ;;  %v274_v0 = vsel %vm201_vm1, %v251_v51, 0.0  ;;  %v227_v1 = vsel %vm201_vm1, %v197_v61, 0.0  ;;  %v254_v5 = vmul.f32 %v195_v49, %v195_v49 }
  0x26   : > { %v214_v32 = vadd.f32 %v213_v22, %v212_v25  ;;  %v276_v6 = vsel %vm201_vm1, %v252_v57, 0.0  ;;  %v229_v7 = vsel %vm201_vm1, %v198_v3, 0.0  ;;  %v255_v11 = vmul.f32 %v196_v55, %v196_v55 }
  0x27   : > { %v269_v54 = vadd.f32 %v268_v46, %v267_v48  ;;  %v278_v12 = vsel %vm201_vm1, %v253_v63, 0.0  ;;  %v231_v13 = vsel %vm201_vm1, %v199_v9, 0.0  ;;  %v256_v16 = vmul.f32 %v197_v61, %v197_v61 }
  0x28   : > { %v216_v38 = vadd.f32 %v215_v29, %v214_v32  ;;  %v280_v17 = vsel %vm201_vm1, %v254_v5, 0.0  ;;  %v257_v20 = vmul.f32 %v198_v3, %v198_v3  ;;  %v282_v21 = vsel %vm201_vm1, %v255_v11, 0.0 }
  0x29   : > { %v271_v60 = vadd.f32 %v270_v52, %v269_v54  ;;  %v258_v24 = vmul.f32 %v199_v9, %v199_v9  ;;  %v284_v25 = vsel %vm201_vm1, %v256_v16, 0.0 }
  0x2a   : > { %v218_v44 = vadd.f32 %v217_v35, %v216_v38  ;;  %v286_v28 = vsel %vm201_vm1, %v257_v20, 0.0 }
  0x2b   : > { %v273_v2 = vadd.f32 %v272_v58, %v271_v60  ;;  %v288_v31 = vsel %vm201_vm1, %v258_v24, 0.0 }
  0x2c   : > { %v220_v50 = vadd.f32 %v219_v41, %v218_v44  ;;  %v242_v44 = vld [vmem:[%s533_s24] sm:$0x1] }
  0x2d   : > { %v275_v8 = vadd.f32 %v274_v0, %v273_v2 }
  0x2e   : > { %v222_v56 = vadd.f32 %v221_v47, %v220_v50 }
  0x2f   : > { %v277_v14 = vadd.f32 %v276_v6, %v275_v8 }
  0x30   : > { %v224_v62 = vadd.f32 %v223_v53, %v222_v56 }
  0x31   : > { %v279_v18 = vadd.f32 %v278_v12, %v277_v14 }
  0x32   : > { %v226_v4 = vadd.f32 %v225_v59, %v224_v62 }
  0x33   : > { %v281_v22 = vadd.f32 %v280_v17, %v279_v18 }
  0x34   : > { %v228_v10 = vadd.f32 %v227_v1, %v226_v4 }
  0x35   : > { %v283_v26 = vadd.f32 %v282_v21, %v281_v22 }
  0x36   : > { %v230_v15 = vadd.f32 %v229_v7, %v228_v10 }
  0x37   : > { %v285_v29 = vadd.f32 %v284_v25, %v283_v26 }
  0x38   : > { %v232_v19 = vadd.f32 %v231_v13, %v230_v15 }
  0x39   : > { %v287_v32 = vadd.f32 %v286_v28, %v285_v29 }
  0x3a   : > { %v233_v23 = vrot.slane %v232_v19, 4 }
  0x3b   : > { %v289_v34 = vadd.f32 %v288_v31, %v287_v32 }
  0x3c   : > { %v234_v27 = vadd.f32 %v233_v23, %v232_v19 }
  0x3d   : > { %v290_v37 = vrot.slane %v289_v34, 4 }
  0x3e   : > { %v235_v30 = vrot.slane %v234_v27, 2 }
  0x3f   : > { %v291_v39 = vadd.f32 %v290_v37, %v289_v34 }
  0x40   : > { %v236_v33 = vadd.f32 %v235_v30, %v234_v27 }
  0x41   : > { %v292_v41 = vrot.slane %v291_v39, 2 }
  0x42   : > { %v237_v35 = vrot.slane %v236_v33, 1 }
  0x43   : > { %v293_v42 = vadd.f32 %v292_v41, %v291_v39 }
  0x44   : > { %v238_v38 = vadd.f32 %v237_v35, %v236_v33 }
  0x45   : > { %v294_v43 = vrot.slane %v293_v42, 1 }
  0x46   : > { %v239_v40 = vadd.f32 %v238_v38, %v200_v36 }
  0x47   : > { %v295_v45 = vadd.f32 %v294_v43, %v293_v42 }
  0x48   : > { %241 = vst.msk [vmem:[%s528_s20] sm:$0x1] %vm240_vm2, %v239_v40 }
  0x49   : > { %v296_v46 = vadd.f32 %v295_v45, %v242_v44 }
  0x4b   : > { %297 = vst.msk [vmem:[%s533_s24] sm:$0x1] %vm240_vm2, %v296_v46 }
  0x4c PF: > { %s13_s13 = sadd.s32 1, %s477_s13   ;;  %s612_s9 = smov %s469_s11 }
  0x4d   : > { %p10_p8 = scmp.ge.s32.totalorder %s13_s13, 6   ;;  %s613_s10 = smov %s473_s12 }
  0x4e   : > { %s614_s11 = smov %s617_s14  ;;  %s615_s12 = smov %s621_s15 }
  0x4f   :  { %12 = sbr.rel (!%p10_p8) target bundleno = 3 (0x3), region = 70 }

// kernel: resnet_block_3d_forward.10
= control target key start
LH: loop header
LB: loop body
LE: loop exit
PB: predicated region body
PF: predicated region fallthrough
CT: control target
= control target key end

     0   :  { %s716_s12 = smov 0   ;;  %s718_s13 = smov 0   ;;  %s932_s0 = inlined_call_operand.vmem [shape: f32[2,256,64], index: 0, kind: input, shape index: {}]   ;;  %s933_s1 = inlined_call_operand.vmem [shape: f32[2,1,64], index: 1, kind: input, shape index: {}]   ;;  %s934_s2 = inlined_call_operand.vmem [shape: f32[2,1,64], index: 2, kind: input, shape index: {}]   ;;  %s935_s3 = inlined_call_operand.vmem [shape: f32[2,256,64], index: 3, kind: output, shape index: {}]  }
   0x1   :  { %s720_s14 = smov 0   ;;  %s722_s15 = smov 0  }
   0x2   :  { %s724_s16 = smov 0  }
   0x3 LB: > { %s22_s17 = sadd.s32 1, %s686_s14  ;;  %s25_s18 = sadd.s32 1, %s690_s15  ;;  %s694_s16 = sphi %s724_s16, %s13_s16   ;;  %s690_s15 = sphi %s722_s15, %s939_s15   ;;  %s686_s14 = sphi %s720_s14, %s938_s14   ;;  %s682_s13 = sphi %s718_s13, %s937_s13   ;;  %s678_s12 = sphi %s716_s12, %s936_s12  }
   0x4   : > { %p23_p0 = scmp.ge.s32.totalorder %s22_s17, 2  ;;  %p541_p1 = scmp.ge.s32.totalorder %s694_s16, 1 }
   0x5   : > { %p174_p2 = scmp.lt.s32.totalorder %s694_s16, 5 }
   0x6   : > { %s941_s17 = smov (%p23_p0, %s22_s17), 0  ;;  %s943_s18 = smov (!%p23_p0, %s25_s18), %s690_s15 }
   0x7   : > { %p175_p3 = pnand %p541_p1, %p174_p2  ;;  %p27_p4 = scmp.ge.s32.totalorder %s943_s18, 2 }
   0x8   : > { %s542_s19 = sshll.u32 (!%p175_p3), %s678_s12, 4  ;;  %p213_p5 = scmp.lt.s32.totalorder (!%p175_p3), %s682_s13, 1  ;;  %vm412_vm0 = vcmask (!%p175_p3), 523264  }
   0x9   : > { %s945_s18 = smov (%p27_p4, %s943_s18), 0  ;;  %178 = sbr.rel (%p175_p3) target bundleno = 85 (0x55), region = 32 }
   0xa   : > { %p215_p6 = scmp.lt.s32.totalorder (!%p175_p3), %s542_s19, 31 }
  0x10   : > { %s947_s13 = smov (!%p213_p5, %s682_s13), 1  ;;  %s949_s19 = smov (!%p215_p6, %s542_s19), 31 }
  0x11   : > { %s543_s20 = sshll.u32 %s947_s13, 5  ;;  %s224_s23 = scalar_lea.vmem %s933_s1, %s947_s13 }
  0x12   : > { %s749_s24 = sadd.s32 %s543_s20, %s949_s19  ;;  %s227_s27 = scalar_lea.vmem %s934_s2, %s947_s13  ;;  %v755_v0 = vld [vmem:[%s224_s23] ss:$0 sm:$0xff] }
  0x13   : > { %s544_s28 = sshll.u32 %s749_s24, 3  ;;  %v764_v1 = vld [vmem:[%s227_s27] ss:$0 sm:$0xff] }
  0x14   : > { %s762_s4 = scalar_lea.vmem %s932_s0, %s544_s28  ;;  %s867_s7 = scalar_lea.vmem %s935_s3, %s544_s28 }
  0x15   : > { %v238_v2 = vld [vmem:[%s762_s4] sm:$0xff]  ;;  %v239_v3 = vld [vmem:[%s762_s4 + $0x8] sm:$0xff]  ;;  %v240_v4 = vld [vmem:[%s762_s4 + $0x10] sm:$0xff] }
  0x16   : > { %v261_v5 = vmul.f32 %v755_v0, %v238_v2  ;;  %v262_v6 = vmul.f32 %v755_v0, %v239_v3  ;;  %v263_v7 = vmul.f32 %v755_v0, %v240_v4  ;;  %v241_v8 = vld [vmem:[%s762_s4 + $0x18] sm:$0xff]  ;;  %v242_v9 = vld [vmem:[%s762_s4 + $0x20] sm:$0xff]  ;;  %v243_v10 = vld [vmem:[%s762_s4 + $0x28] sm:$0xff] }
  0x17   : > { %v264_v11 = vmul.f32 %v755_v0, %v241_v8  ;;  %v265_v12 = vmul.f32 %v755_v0, %v242_v9  ;;  %v266_v13 = vmul.f32 %v755_v0, %v243_v10  ;;  %v244_v14 = vld [vmem:[%s762_s4 + $0x30] sm:$0xff]  ;;  %v245_v15 = vld [vmem:[%s762_s4 + $0x38] sm:$0xff]  ;;  %v246_v24 = vld [vmem:[%s762_s4 + $0x40] sm:$0xff] }
  0x18   : > { %v781_v16 = vadd.f32 %v764_v1, %v261_v5  ;;  %v784_v17 = vadd.f32 %v764_v1, %v262_v6  ;;  %v787_v18 = vadd.f32 %v764_v1, %v263_v7  ;;  %v267_v19 = vmul.f32 %v755_v0, %v244_v14  ;;  %v247_v29 = vld [vmem:[%s762_s4 + $0x48] sm:$0xff]  ;;  %v248_v34 = vld [vmem:[%s762_s4 + $0x50] sm:$0xff]  ;;  %v249_v35 = vld [vmem:[%s762_s4 + $0x58] sm:$0xff] }
  0x19   : > { %v791_v20 = vadd.f32 %v764_v1, %v264_v11  ;;  %v794_v21 = vadd.f32 %v764_v1, %v265_v12  ;;  %v797_v22 = vadd.f32 %v764_v1, %v266_v13  ;;  %v268_v23 = vmul.f32 %v755_v0, %v245_v15  ;;  %v250_v50 = vld [vmem:[%s762_s4 + $0x60] sm:$0xff]  ;;  %v251_v3 = vld [vmem:[%s762_s4 + $0x68] sm:$0xff]  ;;  %v252_v5 = vld [vmem:[%s762_s4 + $0x70] sm:$0xff] }
  0x1a   : > { %v300_v25 = vsub.f32 0.0, %v781_v16  ;;  %v301_v26 = vsub.f32 0.0, %v784_v17  ;;  %v302_v27 = vsub.f32 0.0, %v787_v18  ;;  %v805_v28 = vadd.f32 %v764_v1, %v267_v19  ;;  %v253_v6 = vld [vmem:[%s762_s4 + $0x78] sm:$0xff] }
  0x1b   : > { %v303_v30 = vsub.f32 0.0, %v791_v20  ;;  %v304_v31 = vsub.f32 0.0, %v794_v21  ;;  %v305_v32 = vsub.f32 0.0, %v797_v22  ;;  %v812_v33 = vadd.f32 %v764_v1, %v268_v23 }
  0x1c   : > { %v316_v36 = vmul.f32 1.442695, %v300_v25  ;;  %v318_v37 = vmul.f32 1.442695, %v301_v26  ;;  %v320_v38 = vmul.f32 1.442695, %v302_v27  ;;  %v269_v39 = vmul.f32 %v755_v0, %v246_v24 }
  0x1d   : > { %v322_v40 = vmul.f32 1.442695, %v303_v30  ;;  %v324_v41 = vmul.f32 1.442695, %v304_v31  ;;  %v326_v42 = vmul.f32 1.442695, %v305_v32  ;;  %v270_v43 = vmul.f32 %v755_v0, %v247_v29 }
  0x1e   : > { %592 = vpow2.f32 %v316_v36  ;;  %v306_v44 = vsub.f32 0.0, %v805_v28  ;;  %v307_v45 = vsub.f32 0.0, %v812_v33  ;;  %v821_v46 = vadd.f32 %v764_v1, %v269_v39 }
  0x1f   : > { %594 = vpow2.f32 %v318_v37  ;;  %v824_v47 = vadd.f32 %v764_v1, %v270_v43  ;;  %v271_v48 = vmul.f32 %v755_v0, %v248_v34  ;;  %v272_v49 = vmul.f32 %v755_v0, %v249_v35 }
  0x20   : > { %596 = vpow2.f32 %v320_v38  ;;  %v328_v51 = vmul.f32 1.442695, %v306_v44  ;;  %v330_v52 = vmul.f32 1.442695, %v307_v45  ;;  %v308_v53 = vsub.f32 0.0, %v821_v46 }
  0x21   : > { %598 = vpow2.f32 %v322_v40  ;;  %v309_v54 = vsub.f32 0.0, %v824_v47  ;;  %v832_v55 = vadd.f32 %v764_v1, %v271_v48  ;;  %v835_v56 = vadd.f32 %v764_v1, %v272_v49 }
  0x22   : > { %600 = vpow2.f32 %v324_v41  ;;  %v332_v57 = vmul.f32 1.442695, %v308_v53  ;;  %v273_v58 = vmul.f32 %v755_v0, %v250_v50  ;;  %v274_v9 = vmul.f32 %v755_v0, %v251_v3 }
  0x23   : > { %602 = vpow2.f32 %v326_v42  ;;  %v334_v59 = vmul.f32 1.442695, %v309_v54  ;;  %v310_v60 = vsub.f32 0.0, %v832_v55  ;;  %v311_v61 = vsub.f32 0.0, %v835_v56 }
  0x24   : > { %604 = vpow2.f32 %v328_v51  ;;  %v841_v62 = vadd.f32 %v764_v1, %v273_v58  ;;  %v275_v12 = vmul.f32 %v755_v0, %v252_v5  ;;  %v276_v15 = vmul.f32 %v755_v0, %v253_v6 }
  0x25   : > { %606 = vpow2.f32 %v330_v52  ;;  %v336_v63 = vmul.f32 1.442695, %v310_v60  ;;  %v338_v2 = vmul.f32 1.442695, %v311_v61  ;;  %v851_v26 = vadd.f32 %v764_v1, %v274_v9 }
  0x26   : > { %608 = vpow2.f32 %v332_v57  ;;  %v312_v4 = vsub.f32 0.0, %v841_v62  ;;  %v854_v30 = vadd.f32 %v764_v1, %v275_v12  ;;  %v857_v0 = vadd.f32 %v764_v1, %v276_v15 }
  0x27   : > { %610 = vpow2.f32 %v334_v59  ;;  %v313_v38 = vsub.f32 0.0, %v851_v26 }
  0x28   : > { %v593_v7 = vpop.eup %592  ;;  %612 = vpow2.f32 %v336_v63  ;;  %v340_v8 = vmul.f32 1.442695, %v312_v4  ;;  %v314_v41 = vsub.f32 0.0, %v854_v30  ;;  %v315_v1 = vsub.f32 0.0, %v857_v0 }
  0x29   : > { %v595_v10 = vpop.eup %594  ;;  %v348_v11 = vadd.f32 1.0, %v593_v7  ;;  %614 = vpow2.f32 %v338_v2  ;;  %v342_v50 = vmul.f32 1.442695, %v313_v38 }
  0x2a   : > { %v597_v13 = vpop.eup %596  ;;  %v349_v14 = vadd.f32 1.0, %v595_v10  ;;  %616 = vpow2.f32 %v340_v8  ;;  %v344_v53 = vmul.f32 1.442695, %v314_v41  ;;  %v346_v58 = vmul.f32 1.442695, %v315_v1 }
  0x2b   : > { %v599_v19 = vpop.eup %598  ;;  %618 = vrcp.f32 %v348_v11  ;;  %v350_v23 = vadd.f32 1.0, %v597_v13 }
  0x2c   : > { %v601_v24 = vpop.eup %600  ;;  %620 = vrcp.f32 %v349_v14  ;;  %v351_v25 = vadd.f32 1.0, %v599_v19 }
  0x2d   : > { %v603_v27 = vpop.eup %602  ;;  %622 = vrcp.f32 %v350_v23  ;;  %v352_v29 = vadd.f32 1.0, %v601_v24 }
  0x2e   : > { %v605_v31 = vpop.eup %604  ;;  %624 = vrcp.f32 %v351_v25  ;;  %v353_v32 = vadd.f32 1.0, %v603_v27 }
  0x2f   : > { %v607_v34 = vpop.eup %606  ;;  %626 = vrcp.f32 %v352_v29  ;;  %v354_v35 = vadd.f32 1.0, %v605_v31 }
  0x30   : > { %v609_v36 = vpop.eup %608  ;;  %628 = vrcp.f32 %v353_v32  ;;  %v355_v37 = vadd.f32 1.0, %v607_v34 }
  0x31   : > { %v611_v39 = vpop.eup %610  ;;  %630 = vrcp.f32 %v354_v35  ;;  %v356_v40 = vadd.f32 1.0, %v609_v36 }
  0x32   : > { %v613_v42 = vpop.eup %612  ;;  %632 = vrcp.f32 %v355_v37  ;;  %v357_v43 = vadd.f32 1.0, %v611_v39 }
  0x33   : > { %v615_v44 = vpop.eup %614  ;;  %634 = vrcp.f32 %v356_v40  ;;  %v358_v45 = vadd.f32 1.0, %v613_v42 }
  0x34   : > { %v617_v48 = vpop.eup %616  ;;  %636 = vrcp.f32 %v357_v43  ;;  %v359_v49 = vadd.f32 1.0, %v615_v44 }
  0x35   : > { %v619_v51 = vpop.eup %618  ;;  %638 = vrcp.f32 %v358_v45  ;;  %v360_v52 = vadd.f32 1.0, %v617_v48 }
  0x36   : > { %v621_v54 = vpop.eup %620  ;;  %v396_v57 = vmul.f32 %v619_v51, %v781_v16  ;;  %640 = vrcp.f32 %v359_v49 }
  0x37   : > { %v623_v59 = vpop.eup %622  ;;  %v397_v60 = vmul.f32 %v621_v54, %v784_v17  ;;  %642 = vrcp.f32 %v360_v52 }
  0x38   : > { %v625_v61 = vpop.eup %624  ;;  %413 = vst.msk [vmem:[%s867_s7] sm:$0xff] %vm412_vm0, %v396_v57  ;;  %v398_v63 = vmul.f32 %v623_v59, %v787_v18  ;;  %644 = vpow2.f32 %v342_v50 }
  0x39   : > { %v627_v2 = vpop.eup %626  ;;  %414 = vst.msk [vmem:[%s867_s7 + $0x8] sm:$0xff] %vm412_vm0, %v397_v60  ;;  %v399_v16 = vmul.f32 %v625_v61, %v791_v20  ;;  %646 = vpow2.f32 %v344_v53 }
  0x3a   : > { %v629_v3 = vpop.eup %628  ;;  %415 = vst.msk [vmem:[%s867_s7 + $0x10] sm:$0xff] %vm412_vm0, %v398_v63  ;;  %v400_v17 = vmul.f32 %v627_v2, %v794_v21  ;;  %648 = vpow2.f32 %v346_v58 }
  0x3b   : > { %v631_v4 = vpop.eup %630  ;;  %416 = vst.msk [vmem:[%s867_s7 + $0x18] sm:$0xff] %vm412_vm0, %v399_v16  ;;  %v401_v18 = vmul.f32 %v629_v3, %v797_v22 }
  0x3c   : > { %v633_v5 = vpop.eup %632  ;;  %417 = vst.msk [vmem:[%s867_s7 + $0x20] sm:$0xff] %vm412_vm0, %v400_v17  ;;  %v402_v20 = vmul.f32 %v631_v4, %v805_v28 }
  0x3d   : > { %v635_v6 = vpop.eup %634  ;;  %418 = vst.msk [vmem:[%s867_s7 + $0x28] sm:$0xff] %vm412_vm0, %v401_v18  ;;  %v403_v7 = vmul.f32 %v633_v5, %v812_v33 }
  0x3e   : > { %v637_v21 = vpop.eup %636  ;;  %419 = vst.msk [vmem:[%s867_s7 + $0x30] sm:$0xff] %vm412_vm0, %v402_v20  ;;  %v404_v8 = vmul.f32 %v635_v6, %v821_v46 }
  0x3f   : > { %v639_v9 = vpop.eup %638  ;;  %420 = vst.msk [vmem:[%s867_s7 + $0x38] sm:$0xff] %vm412_vm0, %v403_v7  ;;  %v405_v22 = vmul.f32 %v637_v21, %v824_v47 }
  0x40   : > { %v641_v10 = vpop.eup %640  ;;  %421 = vst.msk [vmem:[%s867_s7 + $0x40] sm:$0xff] %vm412_vm0, %v404_v8  ;;  %v406_v28 = vmul.f32 %v639_v9, %v832_v55 }
  0x41   : > { %v643_v11 = vpop.eup %642  ;;  %422 = vst.msk [vmem:[%s867_s7 + $0x48] sm:$0xff] %vm412_vm0, %v405_v22  ;;  %v407_v33 = vmul.f32 %v641_v10, %v835_v56 }
  0x42   : > { %v645_v12 = vpop.eup %644  ;;  %423 = vst.msk [vmem:[%s867_s7 + $0x50] sm:$0xff] %vm412_vm0, %v406_v28  ;;  %v408_v46 = vmul.f32 %v643_v11, %v841_v62 }
  0x43   : > { %v647_v13 = vpop.eup %646  ;;  %424 = vst.msk [vmem:[%s867_s7 + $0x58] sm:$0xff] %vm412_vm0, %v407_v33  ;;  %v361_v47 = vadd.f32 1.0, %v645_v12 }
  0x44   : > { %v649_v14 = vpop.eup %648  ;;  %425 = vst.msk [vmem:[%s867_s7 + $0x60] sm:$0xff] %vm412_vm0, %v408_v46  ;;  %v362_v55 = vadd.f32 1.0, %v647_v13 }
  0x45   : > { %650 = vrcp.f32 %v361_v47  ;;  %v363_v15 = vadd.f32 1.0, %v649_v14 }
  0x46   : > { %652 = vrcp.f32 %v362_v55 }
  0x47   : > { %654 = vrcp.f32 %v363_v15 }
  0x4f   : > { %v651_v56 = vpop.eup %650 }
  0x50   : > { %v653_v19 = vpop.eup %652  ;;  %v409_v23 = vmul.f32 %v651_v56, %v851_v26 }
  0x51   : > { %v655_v62 = vpop.eup %654  ;;  %v410_v24 = vmul.f32 %v653_v19, %v854_v30 }
  0x52   : > { %426 = vst.msk [vmem:[%s867_s7 + $0x68] sm:$0xff] %vm412_vm0, %v409_v23  ;;  %v411_v25 = vmul.f32 %v655_v62, %v857_v0 }
  0x53   : > { %427 = vst.msk [vmem:[%s867_s7 + $0x70] sm:$0xff] %vm412_vm0, %v410_v24 }
  0x54   : > { %428 = vst.msk [vmem:[%s867_s7 + $0x78] sm:$0xff] %vm412_vm0, %v411_v25 }
  0x55 PF: > { %s13_s16 = sadd.s32 1, %s694_s16   ;;  %s936_s12 = smov %s686_s14 }
  0x56   : > { %p10_p7 = scmp.ge.s32.totalorder %s13_s16, 6   ;;  %s937_s13 = smov %s690_s15 }
  0x57   : > { %s938_s14 = smov %s941_s17  ;;  %s939_s15 = smov %s945_s18 }
  0x58   :  { %12 = sbr.rel (!%p10_p7) target bundleno = 3 (0x3), region = 68 }

// kernel: resnet_block_3d_forward.8
= control target key start
LH: loop header
LB: loop body
LE: loop exit
PB: predicated region body
PF: predicated region fallthrough
CT: control target
= control target key end

     0   :  { %s4758_s18 = smov 0   ;;  %s4760_s19 = smov 0   ;;  %s5892_s0 = inlined_call_operand.vmem [shape: f32[2,6,10,10,32], index: 0, kind: input, shape index: {}, may-alias: {0,1,2}]   ;;  %s5893_s1 = inlined_call_operand.vmem [shape: f32[2,6,10,10,32], index: 1, kind: input, shape index: {}, may-alias: {0,1,2}]   ;;  %s5894_s2 = inlined_call_operand.vmem [shape: f32[2,6,10,10,32], index: 2, kind: input, shape index: {}, may-alias: {0,1,2}]   ;;  %s5895_s3 = inlined_call_operand.vmem [shape: bf16[27,32,64], index: 3, kind: input, shape index: {}]   ;;  %s5896_s4 = inlined_call_operand.vmem [shape: f32[1,64], index: 4, kind: input, shape index: {}]   ;;  %s5897_s5 = inlined_call_operand.vmem [shape: f32[2,4,8,8,64], index: 5, kind: output, shape index: {}]  }
   0x1   :  { %s4762_s20 = smov 0   ;;  %s4764_s21 = smov 0  }
   0x2   :  { %s4766_s22 = smov 0  }
   0x3 LB: > { %s24_s23 = sadd.s32 1, %s4718_s20  ;;  %s27_s24 = sadd.s32 1, %s4722_s21  ;;  %s4726_s22 = sphi %s4766_s22, %s15_s22   ;;  %s4722_s21 = sphi %s4764_s21, %s5961_s21   ;;  %s4718_s20 = sphi %s4762_s20, %s5960_s20   ;;  %s4714_s19 = sphi %s4760_s19, %s5959_s19   ;;  %s4710_s18 = sphi %s4758_s18, %s5958_s18  }
   0x4   : > { %p25_p0 = scmp.ge.s32.totalorder %s24_s23, 4  ;;  %p3609_p1 = scmp.ge.s32.totalorder %s4726_s22, 1 }
   0x5   : > { %p247_p2 = scmp.lt.s32.totalorder %s4726_s22, 9 }
   0x6   : > { %s5963_s23 = smov (%p25_p0, %s24_s23), 0  ;;  %s5965_s24 = smov (!%p25_p0, %s27_s24), %s4722_s21 }
   0x7   : > { %p248_p3 = pnand %p3609_p1, %p247_p2  ;;  %p29_p4 = scmp.ge.s32.totalorder %s5965_s24, 2 }
   0x9   : > { %s5967_s24 = smov (%p29_p4, %s5965_s24), 0  ;;  %251 = sbr.rel (%p248_p3) target bundleno = 473 (0x1d9), region = 40 }
  0x10   : > { %v4627_v0 = vld [vmem:[%s5895_s3 + $0x10] sm:$0xff]   ;;  %p303_p5 = scmp.lt.s32.totalorder %s4714_s19, 1  ;;  %p305_p6 = scmp.lt.s32.totalorder %s4710_s18, 5  ;;  %v4629_v2 = vld [vmem:[%s5895_s3 + $0x18] sm:$0xff]   ;;  %v4631_v4 = vld [vmem:[%s5895_s3] sm:$0xff]   ;;  %vm388_vm0 = vcmask 1046528  }
  0x11   : > { %v4628_v1 = vld [vmem:[%s5895_s3 + $0xd0] sm:$0xff]   ;;  %4047 = vmatprep.subr.bf16.mxu1 %v4627_v0  ;;  %v4630_v3 = vld [vmem:[%s5895_s3 + $0xd8] sm:$0xff]   ;;  %s312_s13 = sadd.s32 1, %s4710_s18  ;;  %v4816_v5 = vld [vmem:[%s5895_s3 + $0xe0] sm:$0xff]   ;;  %vm442_vm1 = vcmask 261120   ;;  %vm609_vm2 = vcmask 1045504  }
  0x12   : > { %s5969_s19 = smov (!%p303_p5, %s4714_s19), 1  ;;  %4203 = vmatprep.subr.bf16.mxu0 %v4628_v1  ;;  %4048 = vmatpush3.bf16.msra.mxu1 %v4627_v0  ;;  %p315_p7 = scmp.lt.s32.totalorder %s312_s13, 5  ;;  %v4634_v28 = vld [vmem:[%s5895_s3 + $0x8] sm:$0xff]   ;;  %v4933_v49 = vld [vmem:[%s5895_s3 + $0x20] sm:$0xff]   ;;  %v4637_v59 = vld [vmem:[%s5895_s3 + $0xf8] sm:$0xff]   ;;  %vm3459_vm3 = vcmask 523264  }
  0x13   : > { %s306_s8 = scalar_select %p305_p6, %s4710_s18, 5  ;;  %4204 = vmatpush3.bf16.msra.mxu0 %v4628_v1  ;;  %4049 = vmatprep.subr.bf16.mxu1 %v4629_v2 }
  0x14   : > { %s4807_s9 = smul.u32 120, %s5969_s19  ;;  %4205 = vmatprep.subr.bf16.mxu0 %v4630_v3  ;;  %s5971_s13 = smov (!%p315_p7, %s312_s13), 5 }
  0x15   : > { %s4583_s10 = smul.u32 20, %s306_s8  ;;  %p336_p9 = scmp.lt.s32.totalorder %s4710_s18, 3 }
  0x16   : > { %4050 = vmatpush3.bf16.msra.mxu1 %v4629_v2  ;;  %s4585_s28 = smul.u32 20, %s5971_s13  ;;  %s3614_s26 = sshll.u32 %s5969_s19, 5 }
  0x17   : > { %s309_s16 = sadd.s32 %s4807_s9, %s4583_s10  ;;  %4206 = vmatpush3.bf16.msra.mxu0 %v4630_v3  ;;  %4059 = vmatprep.subr.bf16.mxu1 %v4631_v4 }
  0x18   : > { %s3610_s17 = sshll.u32 %s309_s16, 3  ;;  %4215 = vmatprep.subr.bf16.mxu0 %v4816_v5  ;;  %s319_s29 = sadd.s32 %s4585_s28, %s4807_s9 }
  0x19   : > { %s4822_s27 = scalar_lea.vmem %s5892_s0, %s3610_s17  ;;  %s3611_s30 = sshll.u32 %s319_s29, 3 }
  0x1a   : > { %v4826_v6 = vld [vmem:[%s4822_s27] sm:$0xff]  ;;  %v4829_v7 = vld [vmem:[%s4822_s27 + $0x8] sm:$0x3]  ;;  %v4832_v8 = vld [vmem:[%s4822_s27 + $0x10] sm:$0xff]  ;;  %s4885_s11 = scalar_lea.vmem %s5893_s1, %s3611_s30  ;;  %s323_s30 = sadd.s32 2, %s4710_s18 }
  0x1b   : > { %v4835_v9 = vld [vmem:[%s4822_s27 + $0x18] sm:$0x3]  ;;  %v4838_v10 = vld [vmem:[%s4822_s27 + $0x20] sm:$0xff]  ;;  %v4841_v11 = vld [vmem:[%s4822_s27 + $0x28] sm:$0x3]  ;;  %v389_v12 = vrot.slane %v4826_v6, 1 }
  0x1c   : > { %v4845_v13 = vld [vmem:[%s4822_s27 + $0x30] sm:$0xff]  ;;  %v4848_v14 = vld [vmem:[%s4822_s27 + $0x38] sm:$0x3]  ;;  %v390_v15 = vrot.slane %v4829_v7, 1  ;;  %v392_v16 = vrot.slane %v4832_v8, 1  ;;  %v393_v17 = vrot.slane %v4835_v9, 1 }
  0x1d   : > { %v395_v18 = vrot.slane %v4838_v10, 1  ;;  %v396_v19 = vrot.slane %v4841_v11, 1  ;;  %v398_v21 = vrot.slane %v4845_v13, 1  ;;  %v399_v22 = vrot.slane %v4848_v14, 1  ;;  %v4866_v25 = vld [vmem:[%s4822_s27 + $0x40] sm:$0xff]  ;;  %v4897_v34 = vld [vmem:[%s4885_s11 + $0x10] sm:$0xff] }
  0x1e   : > { %v391_v20 = vsel %vm388_vm0, %v389_v12, %v390_v15  ;;  %v4859_v23 = vsel %vm388_vm0, %v392_v16, %v393_v17  ;;  %v4876_v29 = vld [vmem:[%s4822_s27 + $0x48] sm:$0x3]  ;;  %v4891_v32 = vld [vmem:[%s4885_s11] sm:$0xff]  ;;  %v4902_v35 = vld [vmem:[%s4885_s11 + $0x18] sm:$0x3]  ;;  %v1513_v43 = vrot.slane %v4897_v34, 1 }
  0x1f   : > { %v4862_v24 = vsel %vm388_vm0, %v395_v18, %v396_v19  ;;  %v4869_v26 = vsel %vm388_vm0, %v398_v21, %v399_v22  ;;  %v421_v27 = vpack.c.bf16 %v4859_v23, %v391_v20  ;;  %v4894_v33 = vld [vmem:[%s4885_s11 + $0x8] sm:$0x3]  ;;  %v4905_v36 = vld [vmem:[%s4885_s11 + $0x20] sm:$0xff]  ;;  %v1510_v38 = vrot.slane %v4891_v32, 1  ;;  %v4912_v39 = vld [vmem:[%s4885_s11 + $0x30] sm:$0xff]  ;;  %p326_p8 = scmp.lt.s32.totalorder %s323_s30, 5 }
  0x20   : > { %v4880_v30 = vpack.c.bf16 %v4869_v26, %v4862_v24  ;;  %v4908_v37 = vld [vmem:[%s4885_s11 + $0x28] sm:$0x3]  ;;  %5915 = vst [vmem:[#allocation3_spill] sm:$0xff] %v4912_v39  ;;  %v4915_v40 = vld [vmem:[%s4885_s11 + $0x38] sm:$0x3]  ;;  %v4918_v41 = vld [vmem:[%s4885_s11 + $0x40] sm:$0xff] }
  0x21   : > { %4051 = vmatprep.mubr.msk.bf16.mxu1 %vm442_vm1, %v421_v27  ;;  %5916 = vst [vmem:[#allocation4_spill] sm:$0xff] %v4918_v41  ;;  %v1511_v42 = vrot.slane %v4894_v33, 1  ;;  %v401_v44 = vrot.slane %v4866_v25, 1  ;;  %v402_v45 = vrot.slane %v4876_v29, 1  ;;  %v4925_v46 = vld [vmem:[%s4885_s11 + $0x48] sm:$0x3] }
  0x22   : > { %5914 = vst [vmem:[#allocation2_spill] sm:$0xff] %v4880_v30  ;;  %4052 = vmatmul.mubr.msk.bf16.vlgmr.msra.gmra.mrb[0].mxu1 %vm442_vm1, %v4880_v30  ;;  %v1514_v47 = vrot.slane %v4902_v35, 1  ;;  %v1516_v51 = vrot.slane %v4905_v36, 1  ;;  %v1517_v52 = vrot.slane %v4908_v37, 1  ;;  %v1519_v53 = vrot.slane %v4912_v39, 1  ;;  %v4953_v60 = vld [vmem:[%s4822_s27 + $0x50] sm:$0xff] }
  0x23   : > { %4060 = vmatpush3.bf16.msra.mxu1 %v4631_v4  ;;  %v4936_v50 = vsel %vm388_vm0, %v1510_v38, %v1511_v42  ;;  %v1520_v55 = vrot.slane %v4915_v40, 1  ;;  %v1522_v56 = vrot.slane %v4918_v41, 1  ;;  %v1523_v57 = vrot.slane %v4925_v46, 1  ;;  %v4956_v61 = vld [vmem:[%s4822_s27 + $0x58] sm:$0x3]  ;;  %v4959_v62 = vld [vmem:[%s4822_s27 + $0x60] sm:$0xff] }
  0x24   : > { %4061 = vmatprep.subr.bf16.mxu1 %v4634_v28  ;;  %5917 = vst [vmem:[#allocation5_spill] sm:$0xff] %v4936_v50  ;;  %v4942_v54 = vsel %vm388_vm0, %v1513_v43, %v1514_v47  ;;  %v4948_v58 = vsel %vm388_vm0, %v1516_v51, %v1517_v52  ;;  %v4968_v1 = vld [vmem:[%s4822_s27 + $0x68] sm:$0x3]  ;;  %v4971_v2 = vld [vmem:[%s4822_s27 + $0x78] sm:$0x3]  ;;  %v1652_v3 = vrot.slane %v4902_v35, 2  ;;  %v4984_v17 = vsel %vm388_vm0, %v401_v44, %v402_v45 }
  0x25   : > { %5918 = vst [vmem:[#allocation6_spill] sm:$0xff] %v4942_v54  ;;  %v4962_v63 = vsel %vm388_vm0, %v1519_v53, %v1520_v55  ;;  %v4965_v0 = vsel %vm388_vm0, %v1522_v56, %v1523_v57  ;;  %v1655_v4 = vrot.slane %v4908_v37, 2  ;;  %v1657_v12 = vrot.slane %v4912_v39, 2  ;;  %v4633_v15 = vld [vmem:[%s5895_s3 + $0xe8] sm:$0xff]   ;;  %v4981_v16 = vld [vmem:[%s4822_s27 + $0x70] sm:$0xff]  ;;  %v5002_v38 = vld [vmem:[%s4885_s11 + $0x60] sm:$0xff] }
  0x26   : > { %v1658_v18 = vrot.slane %v4915_v40, 2  ;;  %v1661_v19 = vrot.slane %v4925_v46, 2  ;;  %v1898_v20 = vpack.c.bf16 %v4948_v58, %v4942_v54  ;;  %v4991_v21 = vld [vmem:[%s4885_s11 + $0x50] sm:$0xff]  ;;  %v4994_v22 = vld [vmem:[%s4885_s11 + $0x58] sm:$0x3]  ;;  %v1899_v27 = vpack.c.bf16 %v4965_v0, %v4962_v63  ;;  %s5973_s30 = smov (!%p326_p8, %s323_s30), 5 }
  0x27   : > { %4062 = vmatpush3.bf16.msra.mxu1 %v4634_v28  ;;  %v404_v28 = vrot.slane %v4953_v60, 1  ;;  %v405_v35 = vrot.slane %v4956_v61, 1  ;;  %v407_v37 = vrot.slane %v4959_v62, 1  ;;  %v408_v40 = vrot.slane %v4968_v1, 1  ;;  %v5030_v55 = vld [vmem:[%s4885_s11 + $0x68] sm:$0x3] }
  0x28   : > { %4071 = vmatprep.subr.bf16.mxu1 %v4933_v49  ;;  %4207 = vmatprep.mubr.msk.bf16.mxu0 %vm442_vm1, %v1898_v20  ;;  %v410_v42 = vrot.slane %v4981_v16, 1  ;;  %v411_v43 = vrot.slane %v4971_v2, 1  ;;  %v1651_v44 = vrot.slane %v4897_v34, 2  ;;  %v1654_v46 = vrot.slane %v4905_v36, 2  ;;  %v4635_v57 = vld [vmem:[%s5895_s3 + $0xf0] sm:$0xff]   ;;  %s4586_s14 = smul.u32 20, %s5973_s30 }
  0x29   : > { %4208 = vmatmul.mubr.msk.bf16.vlgmr.msra.gmra.mrb[0].mxu0 %vm442_vm1, %v1899_v27  ;;  %v5011_v45 = vsel %vm388_vm0, %v404_v28, %v405_v35  ;;  %v1660_v47 = vrot.slane %v4918_v41, 2  ;;  %v5021_v52 = vsel %vm388_vm0, %v407_v37, %v408_v40  ;;  %v364_v20 = vpack.c.bf16 %v4832_v8, %v4826_v6  ;;  %v5055_v37 = vld [vmem:[%s4885_s11 + $0x70] sm:$0xff]  ;;  %s5975_s18 = smov (!%p336_p9, %s4710_s18), 3 }
  0x2a   : > { %4216 = vmatpush3.bf16.msra.mxu0 %v4816_v5  ;;  %v5018_v51 = vpack.c.bf16 %v5011_v45, %v4984_v17  ;;  %v5024_v34 = vsel %vm388_vm0, %v410_v42, %v411_v43  ;;  %v5027_v53 = vsel %vm609_vm2, %v1651_v44, %v1652_v3  ;;  %v5037_v56 = vsel %vm609_vm2, %v1654_v46, %v1655_v4  ;;  %v1383_v43 = vld [vmem:[%s4885_s11 + $0x78] sm:$0x3]  ;;  %v5067_v44 = vld [vmem:[%s4885_s11 + $0x80] sm:$0xff]  ;;  %v1385_v46 = vld [vmem:[%s4885_s11 + $0x88] sm:$0x3]  ;;  %s330_s29 = sadd.s32 %s4586_s14, %s4807_s9 }
  0x2b   : > { %4217 = vmatprep.subr.bf16.mxu0 %v4633_v15  ;;  %v5034_v5 = vpack.c.bf16 %v5024_v34, %v5021_v52  ;;  %v2008_v3 = vpack.c.bf16 %v5037_v56, %v5027_v53  ;;  %v1663_v27 = vrot.slane %v4991_v21, 2  ;;  %v1664_v4 = vrot.slane %v4994_v22, 2  ;;  %s3612_s9 = sshll.u32 %s330_s29, 3 }
  0x2c   : > { %5919 = vst [vmem:[#allocation7_spill] sm:$0xff] %v5018_v51  ;;  %4055 = vmatprep.mubr.msk.bf16.mxu1 %vm442_vm1, %v5018_v51  ;;  %v1666_v28 = vrot.slane %v5002_v38, 2  ;;  %v1667_v35 = vrot.slane %v5030_v55, 2  ;;  %v5059_v40 = vsel %vm609_vm2, %v1657_v12, %v1658_v18  ;;  %v5062_v42 = vsel %vm609_vm2, %v1660_v47, %v1661_v19  ;;  %s5263_s7 = scalar_lea.vmem %s5894_s2, %s3612_s9 }
  0x2d   : > { %5920 = vst [vmem:[#allocation8_spill] sm:$0xff] %v5034_v5  ;;  %4056 = vmatmul.mubr.msk.bf16.gmra.mrb[4].mxu1 %vm442_vm1, %v5034_v5  ;;  %4219 = vmatprep.mubr.msk.bf16.mxu0 %vm442_vm1, %v2008_v3  ;;  %v5071_v48 = vsel %vm609_vm2, %v1663_v27, %v1664_v4  ;;  %v5078_v12 = vpack.c.bf16 %v4845_v13, %v4838_v10  ;;  %v1669_v19 = vrot.slane %v5055_v37, 2  ;;  %v1670_v47 = vrot.slane %v1383_v43, 2 }
  0x2e   : > { %4218 = vmatpush3.bf16.msra.mxu0 %v4633_v15  ;;  %4063 = vmatprep.mubr.msk.bf16.mxu1 %vm442_vm1, %v364_v20  ;;  %v5074_v15 = vsel %vm609_vm2, %v1666_v28, %v1667_v35  ;;  %v2009_v18 = vpack.c.bf16 %v5062_v42, %v5059_v40  ;;  %v610_v20 = vrot.slane %v4826_v6, 2  ;;  %v2004_v3 = vrot.slane %v5067_v44, 2 }
  0x2f   : > { %4227 = vmatprep.subr.bf16.mxu0 %v4635_v57  ;;  %5921 = vst [vmem:[#allocation9_spill] sm:$0xff] %v5078_v12  ;;  %v2005_v27 = vrot.slane %v1385_v46, 2  ;;  %v611_v4 = vrot.slane %v4829_v7, 2  ;;  %v614_v28 = vrot.slane %v4835_v9, 2  ;;  %v2010_v35 = vpack.c.bf16 %v5074_v15, %v5071_v48  ;;  %v4638_v7 = vld [vmem:[%s5895_s3 + $0x28] sm:$0xff]  }
  0x30   : > { %v613_v31 = vrot.slane %v4832_v8, 2  ;;  %v616_v50 = vrot.slane %v4838_v10, 2  ;;  %v5096_v6 = vpack.c.bf16 %v4953_v60, %v4866_v25  ;;  %v617_v9 = vrot.slane %v4841_v11, 2  ;;  %v4639_v11 = vld [vmem:[%s5895_s3 + $0x100] sm:$0xff]  }
  0x31   : > { %v619_v54 = vrot.slane %v4845_v13, 2  ;;  %v620_v5 = vrot.slane %v4848_v14, 2  ;;  %v5108_v51 = vsel %vm609_vm2, %v1669_v19, %v1670_v47  ;;  %v5113_v30 = vsel %vm609_vm2, %v2004_v3, %v2005_v27  ;;  %v4640_v19 = vld [vmem:[%s5895_s3 + $0x30] sm:$0xff]  }
  0x32   : > { %5922 = vst [vmem:[#allocation10_spill] sm:$0xff] %v5096_v6  ;;  %v1531_v14 = vrot.slane %v5055_v37, 1  ;;  %v1895_v47 = vrot.slane %v1385_v46, 1  ;;  %v2011_v3 = vpack.c.bf16 %v5113_v30, %v5108_v51  ;;  %v5146_v46 = vld [vmem:[%s4822_s27 + $0x80] sm:$0xff] }
  0x35   : > { %4220 = vmatmul.mubr.msk.bf16.vlgmr.msra.gmra.mrb[0].mxu0 %vm442_vm1, %v2009_v18  ;;  %4064 = vmatmul.mubr.msk.bf16.vlgmr.msra.gmra.mrb[0].mxu1 %vm442_vm1, %v5078_v12  ;;  %v1532_v18 = vrot.slane %v1383_v43, 1  ;;  %v1894_v12 = vrot.slane %v5067_v44, 1  ;;  %v5131_v43 = vld [vmem:[%s4822_s27 + $0x88] sm:$0x3] }
  0x36   : > { %4228 = vmatpush3.bf16.msra.mxu0 %v4635_v57  ;;  %4072 = vmatpush3.bf16.msra.mxu1 %v4933_v49  ;;  %v612_v57 = vsel %vm609_vm2, %v610_v20, %v611_v4  ;;  %v5123_v49 = vsel %vm609_vm2, %v613_v31, %v614_v28  ;;  %v5137_v20 = vpack.c.bf16 %v4981_v16, %v4959_v62 }
  0x37   : > { %4223 = vmatprep.mubr.msk.bf16.mxu0 %vm442_vm1, %v2010_v35  ;;  %4229 = vmatprep.subr.bf16.mxu0 %v4637_v59  ;;  %v5140_v31 = vsel %vm388_vm0, %v1531_v14, %v1532_v18  ;;  %v5143_v27 = vsel %vm388_vm0, %v1894_v12, %v1895_v47  ;;  %v5150_v4 = vpack.c.bf16 %v4912_v39, %v4905_v36  ;;  %v857_v12 = vrot.slane %v5131_v43, 1  ;;  %v4643_v35 = vld [vmem:[%s5895_s3 + $0x110] sm:$0xff]  }
  0x38   : > { %4067 = vmatprep.mubr.msk.bf16.mxu1 %vm442_vm1, %v5096_v6  ;;  %4073 = vmatprep.subr.bf16.mxu1 %v4638_v7  ;;  %5923 = vst [vmem:[#allocation11_spill] sm:$0xff] %v5140_v31  ;;  %5924 = vst [vmem:[#allocation12_spill] sm:$0xff] %v5143_v27  ;;  %v642_v28 = vpack.c.bf16 %v5123_v49, %v612_v57  ;;  %v856_v6 = vrot.slane %v5146_v46, 1  ;;  %v623_v36 = vrot.slane %v4876_v29, 2  ;;  %v626_v14 = vrot.slane %v4956_v61, 2 }
  0x39   : > { %v5170_v57 = vsel %vm609_vm2, %v616_v50, %v617_v9  ;;  %v5173_v47 = vsel %vm609_vm2, %v619_v54, %v620_v5  ;;  %v5188_v50 = vpack.c.bf16 %v4991_v21, %v4918_v41  ;;  %v629_v9 = vrot.slane %v4968_v1, 2  ;;  %v4642_v1 = vld [vmem:[%s5895_s3 + $0x38] sm:$0xff]  }
  0x3a   : > { %4230 = vmatpush3.bf16.msra.mxu0 %v4637_v59  ;;  %4074 = vmatpush3.bf16.msra.mxu1 %v4638_v7  ;;  %v622_v59 = vrot.slane %v4866_v25, 2  ;;  %v625_v7 = vrot.slane %v4953_v60, 2  ;;  %v5167_v18 = vsel %vm388_vm0, %v856_v6, %v857_v12  ;;  %v5184_v61 = vpack.c.bf16 %v5173_v47, %v5170_v57 }
  0x3b   : > { %4239 = vmatprep.subr.bf16.mxu0 %v4639_v11  ;;  %4083 = vmatprep.subr.bf16.mxu1 %v4640_v19  ;;  %5925 = vst [vmem:[#allocation13_spill] sm:$0xff] %v5188_v50  ;;  %v628_v6 = vrot.slane %v4959_v62, 2  ;;  %v5202_v12 = vpack.c.bf16 %v5055_v37, %v5002_v38  ;;  %v748_v29 = vpack.c.bf16 %v4838_v10, %v4832_v8  ;;  %v1528_v39 = vrot.slane %v5002_v38, 1  ;;  %v2421_v10 = vld [vmem:[%s5263_s7 + $0x78] sm:$0x3] }
  0x3c   : > { %v5191_v54 = vsel %vm609_vm2, %v622_v59, %v623_v36  ;;  %v5194_v5 = vsel %vm609_vm2, %v625_v7, %v626_v14  ;;  %v4641_v59 = vld [vmem:[%s5895_s3 + $0x108] sm:$0xff]   ;;  %v1529_v41 = vrot.slane %v5030_v55, 1  ;;  %v5279_v55 = vld [vmem:[%s5263_s7 + $0x70] sm:$0xff] }
  0x3d   : > { %4224 = vmatmul.mubr.msk.bf16.gmra.mrb[4].mxu0 %vm442_vm1, %v2011_v3  ;;  %4068 = vmatmul.mubr.msk.bf16.gmra.mrb[4].mxu1 %vm442_vm1, %v5137_v20  ;;  %v631_v3 = vrot.slane %v4981_v16, 2  ;;  %5926 = vst [vmem:[#allocation14_spill] sm:$0xff] %v5202_v12  ;;  %v5209_v36 = vpack.c.bf16 %v5194_v5, %v5191_v54  ;;  %v5222_v7 = vsel %vm609_vm2, %v628_v6, %v629_v9  ;;  %v1525_v9 = vrot.slane %v4991_v21, 1  ;;  %v5258_v21 = vld [vmem:[%s4885_s11 + $0x98] sm:$0x3] }
  0x3e   : > { %4231 = vmatprep.mubr.msk.bf16.mxu0 %vm442_vm1, %v5150_v4  ;;  %4075 = vmatprep.mubr.msk.bf16.mxu1 %vm442_vm1, %v642_v28  ;;  %v632_v28 = vrot.slane %v4971_v2, 2  ;;  %v5219_v2 = vld [vmem:[%s4885_s11 + $0x90] sm:$0xff]  ;;  %v2211_v38 = vrot.slane %v5258_v21, 1 }
  0x40   : > { %v5225_v14 = vsel %vm609_vm2, %v631_v3, %v632_v28  ;;  %v1526_v3 = vrot.slane %v4994_v22, 1  ;;  %v5248_v28 = vpack.c.bf16 %v4962_v63, %v4948_v58  ;;  %v1649_v58 = vrot.slane %v4894_v33, 2  ;;  %v4645_v33 = vld [vmem:[%s5895_s3 + $0x118] sm:$0xff]  }
  0x41   : > { %v5242_v6 = vpack.c.bf16 %v5225_v14, %v5222_v7  ;;  %v2210_v63 = vrot.slane %v5219_v2, 1  ;;  %v5275_v22 = vsel %vm388_vm0, %v1528_v39, %v1529_v41  ;;  %v2570_v39 = vrot.slane %v2421_v10, 1  ;;  %v4646_v41 = vld [vmem:[%s5895_s3 + $0x48] sm:$0xff]  }
  0x42   : > { %5927 = vst [vmem:[#allocation15_spill] sm:$0xff] %v5248_v28  ;;  %v5266_v8 = vsel %vm388_vm0, %v1525_v9, %v1526_v3  ;;  %v5296_v9 = vld [vmem:[%s5263_s7 + $0x80] sm:$0xff]  ;;  %v750_v3 = vpack.c.bf16 %v4959_v62, %v4953_v60 }
  0x43   : > { %5928 = vst [vmem:[#allocation16_spill] sm:$0xff] %v5266_v8  ;;  %v4647_v60 = vld [vmem:[%s5895_s3 + $0x120] sm:$0xff]  }
  0x45   : > { %4232 = vmatmul.mubr.msk.bf16.vlgmr.msra.gmra.mrb[0].mxu0 %vm442_vm1, %v5188_v50  ;;  %4076 = vmatmul.mubr.msk.bf16.vlgmr.msra.gmra.mrb[0].mxu1 %vm442_vm1, %v5184_v61 }
  0x46   : > { %4240 = vmatpush3.bf16.msra.mxu0 %v4639_v11  ;;  %4084 = vmatpush3.bf16.msra.mxu1 %v4640_v19  ;;  %v4644_v11 = vld [vmem:[%s5895_s3 + $0x40] sm:$0xff]   ;;  %v2114_v19 = vpack.c.bf16 %v5219_v2, %v5067_v44 }
  0x47   : > { %4235 = vmatprep.mubr.msk.bf16.mxu0 %vm442_vm1, %v5202_v12  ;;  %4241 = vmatprep.subr.bf16.mxu0 %v4641_v59  ;;  %v3042_v12 = vrot.slane %v5296_v9, 2 }
  0x48   : > { %4079 = vmatprep.mubr.msk.bf16.mxu1 %vm442_vm1, %v5209_v36  ;;  %4085 = vmatprep.subr.bf16.mxu1 %v4642_v1 }
  0x4a   : > { %4242 = vmatpush3.bf16.msra.mxu0 %v4641_v59  ;;  %4086 = vmatpush3.bf16.msra.mxu1 %v4642_v1  ;;  %v5283_v59 = vpack.c.bf16 %v5266_v8, %v4965_v0  ;;  %v2569_v1 = vrot.slane %v5279_v55, 1  ;;  %v5300_v0 = vpack.c.bf16 %v5140_v31, %v5275_v22  ;;  %v2708_v8 = vrot.slane %v2421_v10, 2 }
  0x4b   : > { %4251 = vmatprep.subr.bf16.mxu0 %v4643_v35  ;;  %4095 = vmatprep.subr.bf16.mxu1 %v4644_v11 }
  0x4d   : > { %4236 = vmatmul.mubr.msk.bf16.gmra.mrb[4].mxu0 %vm442_vm1, %v2114_v19  ;;  %4080 = vmatmul.mubr.msk.bf16.gmra.mrb[4].mxu1 %vm442_vm1, %v5242_v6  ;;  %v2707_v19 = vrot.slane %v5279_v55, 2 }
  0x4e   : > { %4243 = vmatprep.mubr.msk.bf16.mxu0 %vm442_vm1, %v5248_v28  ;;  %4087 = vmatprep.mubr.msk.bf16.mxu1 %vm442_vm1, %v748_v29  ;;  %v749_v29 = vpack.c.bf16 %v4866_v25, %v4845_v13  ;;  %v2932_v13 = vrot.slane %v5296_v9, 1  ;;  %v1648_v25 = vrot.slane %v4891_v32, 2  ;;  %v2423_v28 = vld [vmem:[%s5263_s7 + $0x88] sm:$0x3]  ;;  %v2212_v32 = vsel %vm388_vm0, %v2210_v63, %v2211_v38 }
  0x4f   : > { %v2933_v50 = vrot.slane %v2423_v28, 1  ;;  %v3043_v62 = vrot.slane %v2423_v28, 2  ;;  %v5333_v28 = vsel %vm609_vm2, %v2707_v19, %v2708_v8  ;;  %v5347_v8 = vpack.c.bf16 %v5059_v40, %v5037_v56  ;;  %v5536_v56 = vld [vmem:[%s5263_s7 + $0x68] sm:$0x3] }
  0x50   : > { %v5312_v31 = vsel %vm609_vm2, %v1648_v25, %v1649_v58  ;;  %v4648_v58 = vld [vmem:[%s5895_s3 + $0x50] sm:$0xff]   ;;  %v861_v40 = vpack.c.bf16 %v4984_v17, %v4869_v26  ;;  %v862_v26 = vpack.c.bf16 %v5021_v52, %v5011_v45  ;;  %v4652_v45 = vld [vmem:[%s5895_s3 + $0x60] sm:$0xff]   ;;  %v970_v25 = vpack.c.bf16 %v5170_v57, %v5123_v49 }
  0x51   : > { %v5338_v38 = vsel %vm609_vm2, %v3042_v12, %v3043_v62  ;;  %v5352_v12 = vld [vmem:[%s5263_s7 + $0x90] sm:$0xff]  ;;  %v5425_v49 = vld [vmem:[%s5263_s7 + $0x20] sm:$0xff]  ;;  %v5432_v62 = vld [vmem:[%s5263_s7 + $0x8] sm:$0x3] }
  0x52   : > { %v3248_v52 = vrot.slane %v5352_v12, 1  ;;  %v5428_v57 = vld [vmem:[%s5263_s7 + $0x30] sm:$0xff] }
  0x55   : > { %4244 = vmatmul.mubr.msk.bf16.vlgmr.msra.gmra.mrb[0].mxu0 %vm442_vm1, %v5283_v59  ;;  %4088 = vmatmul.mubr.msk.bf16.vlgmr.msra.gmra.mrb[0].mxu1 %vm442_vm1, %v749_v29  ;;  %v2214_v29 = vpack.c.bf16 %v2212_v32, %v5143_v27  ;;  %v5930_v32 = vpack.c.bf16 %v5167_v18, %v5024_v34  ;;  %v5441_v34 = vld [vmem:[%s5263_s7 + $0x50] sm:$0xff] }
  0x56   : > { %4252 = vmatpush3.bf16.msra.mxu0 %v4643_v35  ;;  %4096 = vmatpush3.bf16.msra.mxu1 %v4644_v11  ;;  %v5326_v35 = vsel %vm388_vm0, %v2569_v1, %v2570_v39  ;;  %v5329_v11 = vsel %vm388_vm0, %v2932_v13, %v2933_v50  ;;  %v751_v1 = vpack.c.bf16 %v5146_v46, %v4981_v16  ;;  %v2308_v39 = vrot.slane %v5219_v2, 2  ;;  %v5402_v2 = vld [vmem:[%s5263_s7 + $0x98] sm:$0x3]  ;;  %v4664_v27 = vld [vmem:[%s5895_s3 + $0x90] sm:$0xff]  }
  0x57   : > { %4247 = vmatprep.mubr.msk.bf16.mxu0 %vm442_vm1, %v5300_v0  ;;  %4253 = vmatprep.subr.bf16.mxu0 %v4645_v33  ;;  %v5929_v16 = vpack.c.bf16 %v4862_v24, %v4859_v23  ;;  %v5372_v23 = vpack.c.bf16 %v5108_v51, %v5074_v15  ;;  %v4649_v24 = vld [vmem:[%s5895_s3 + $0x128] sm:$0xff]   ;;  %v4651_v51 = vld [vmem:[%s5895_s3 + $0x130] sm:$0xff]  }
  0x58   : > { %4091 = vmatprep.mubr.msk.bf16.mxu1 %vm442_vm1, %v750_v3  ;;  %4097 = vmatprep.subr.bf16.mxu1 %v4646_v41  ;;  %v5399_v15 = vld [vmem:[%s5263_s7 + $0x10] sm:$0xff] }
  0x5a   : > { %4254 = vmatpush3.bf16.msra.mxu0 %v4645_v33  ;;  %4098 = vmatpush3.bf16.msra.mxu1 %v4646_v41  ;;  %v5366_v33 = vpack.c.bf16 %v5071_v48, %v5062_v42  ;;  %v2309_v41 = vrot.slane %v5258_v21, 2  ;;  %v4650_v48 = vld [vmem:[%s5895_s3 + $0x58] sm:$0xff]   ;;  %v5396_v42 = vld [vmem:[%s5263_s7] sm:$0xff]  ;;  %v3249_v21 = vrot.slane %v5402_v2, 1 }
  0x5b   : > { %4263 = vmatprep.subr.bf16.mxu0 %v4647_v60  ;;  %4107 = vmatprep.subr.bf16.mxu1 %v4648_v58  ;;  %v2426_v13 = vpack.c.bf16 %v5399_v15, %v5396_v42 }
  0x5c   : > { %v2310_v17 = vsel %vm609_vm2, %v2308_v39, %v2309_v41  ;;  %v5412_v3 = vsel %vm388_vm0, %v3248_v52, %v3249_v21  ;;  %v966_v39 = vrot.slane %v5146_v46, 2  ;;  %v967_v41 = vrot.slane %v5131_v43, 2  ;;  %v4654_v43 = vld [vmem:[%s5895_s3 + $0x68] sm:$0xff]   ;;  %v5471_v52 = vld [vmem:[%s5263_s7 + $0x60] sm:$0xff] }
  0x5d   : > { %4248 = vmatmul.mubr.msk.bf16.gmra.mrb[4].mxu0 %vm442_vm1, %v2214_v29  ;;  %4092 = vmatmul.mubr.msk.bf16.gmra.mrb[4].mxu1 %vm442_vm1, %v751_v1  ;;  %v2312_v19 = vpack.c.bf16 %v2310_v17, %v5113_v30  ;;  %v5438_v29 = vld [vmem:[%s5263_s7 + $0x40] sm:$0xff]  ;;  %v971_v1 = vpack.c.bf16 %v5191_v54, %v5173_v47  ;;  %v4653_v54 = vld [vmem:[%s5895_s3 + $0x138] sm:$0xff]   ;;  %v972_v17 = vpack.c.bf16 %v5222_v7, %v5194_v5 }
  0x5e   : > { %4255 = vmatprep.mubr.msk.bf16.mxu0 %vm442_vm1, %v5347_v8  ;;  %4099 = vmatprep.mubr.msk.bf16.mxu1 %vm442_vm1, %v5929_v16  ;;  %v2548_v16 = vrot.slane %v5396_v42, 1  ;;  %v5457_v47 = vpack.c.bf16 %v5441_v34, %v5438_v29  ;;  %v5474_v21 = vsel %vm609_vm2, %v966_v39, %v967_v41  ;;  %v4655_v7 = vld [vmem:[%s5895_s3 + $0x140] sm:$0xff]   ;;  %v2554_v41 = vrot.slane %v5425_v49, 1 }
  0x65   : > { %4256 = vmatmul.mubr.msk.bf16.vlgmr.msra.gmra.mrb[0].mxu0 %vm442_vm1, %v5366_v33  ;;  %4100 = vmatmul.mubr.msk.bf16.vlgmr.msra.gmra.mrb[0].mxu1 %vm442_vm1, %v861_v40  ;;  %v5448_v40 = vpack.c.bf16 %v5428_v57, %v5425_v49 }
  0x66   : > { %4264 = vmatpush3.bf16.msra.mxu0 %v4647_v60  ;;  %4108 = vmatpush3.bf16.msra.mxu1 %v4648_v58  ;;  %v5435_v58 = vld [vmem:[%s5263_s7 + $0x18] sm:$0x3] }
  0x67   : > { %4259 = vmatprep.mubr.msk.bf16.mxu0 %vm442_vm1, %v5372_v23  ;;  %4265 = vmatprep.subr.bf16.mxu0 %v4649_v24 }
  0x68   : > { %4103 = vmatprep.mubr.msk.bf16.mxu1 %vm442_vm1, %v862_v26  ;;  %4109 = vmatprep.subr.bf16.mxu1 %v4650_v48  ;;  %v2551_v26 = vrot.slane %v5399_v15, 1 }
  0x6a   : > { %4266 = vmatpush3.bf16.msra.mxu0 %v4649_v24  ;;  %4110 = vmatpush3.bf16.msra.mxu1 %v4650_v48  ;;  %v2549_v24 = vrot.slane %v5432_v62, 1  ;;  %v2552_v48 = vrot.slane %v5435_v58, 1 }
  0x6b   : > { %4275 = vmatprep.subr.bf16.mxu0 %v4651_v51  ;;  %4119 = vmatprep.subr.bf16.mxu1 %v4652_v45 }
  0x6c   : > { %v5478_v5 = vsel %vm388_vm0, %v2551_v26, %v2552_v48  ;;  %v5509_v26 = vld [vmem:[%s5263_s7 + $0x58] sm:$0x3] }
  0x6d   : > { %4260 = vmatmul.mubr.msk.bf16.gmra.mrb[4].mxu0 %vm442_vm1, %v2312_v19  ;;  %4104 = vmatmul.mubr.msk.bf16.gmra.mrb[4].mxu1 %vm442_vm1, %v5930_v32  ;;  %v2550_v19 = vsel %vm388_vm0, %v2548_v16, %v2549_v24  ;;  %v3347_v32 = vrot.slane %v5402_v2, 2  ;;  %v973_v16 = vpack.c.bf16 %v5474_v21, %v5225_v14  ;;  %v5506_v24 = vld [vmem:[%s5263_s7 + $0x48] sm:$0x3]  ;;  %v2557_v2 = vrot.slane %v5428_v57, 1  ;;  %v5932_v14 = vld [vmem:[#allocation9_spill] sm:$0xff] }
  0x6e   : > { %4267 = vmatprep.mubr.msk.bf16.mxu0 %vm442_vm1, %v2426_v13  ;;  %4111 = vmatprep.mubr.msk.bf16.mxu1 %vm442_vm1, %v970_v25  ;;  %v3346_v13 = vrot.slane %v5352_v12, 2  ;;  %v4656_v25 = vld [vmem:[%s5895_s3 + $0x70] sm:$0xff]   ;;  %v2580_v39 = vpack.c.bf16 %v5478_v5, %v2550_v19  ;;  %v2560_v19 = vrot.slane %v5438_v29, 1  ;;  %v2564_v30 = vrot.slane %v5509_v26, 1 }
  0x70   : > { %v5515_v60 = vsel %vm609_vm2, %v3346_v13, %v3347_v32 }
  0x71   : > { %5931 = vst [vmem:[#allocation17_spill] sm:$0xff] %v5515_v60  ;;  %v2699_v60 = vrot.slane %v5506_v24, 2 }
  0x75   : > { %4268 = vmatmul.mubr.msk.bf16.vlgmr.msra.gmra.mrb[0].mxu0 %vm442_vm1, %v5448_v40  ;;  %4112 = vmatmul.mubr.msk.bf16.vlgmr.msra.gmra.mrb[0].mxu1 %vm442_vm1, %v971_v1  ;;  %v5499_v1 = vpack.c.bf16 %v5279_v55, %v5471_v52 }
  0x76   : > { %4276 = vmatpush3.bf16.msra.mxu0 %v4651_v51  ;;  %4120 = vmatpush3.bf16.msra.mxu1 %v4652_v45  ;;  %v5487_v51 = vld [vmem:[%s5263_s7 + $0x28] sm:$0x3]  ;;  %v5490_v45 = vld [vmem:[%s5263_s7 + $0x38] sm:$0x3] }
  0x77   : > { %4271 = vmatprep.mubr.msk.bf16.mxu0 %vm442_vm1, %v5457_v47  ;;  %4277 = vmatprep.subr.bf16.mxu0 %v4653_v54  ;;  %v2555_v48 = vrot.slane %v5487_v51, 1 }
  0x78   : > { %4115 = vmatprep.mubr.msk.bf16.mxu1 %vm442_vm1, %v972_v17  ;;  %4121 = vmatprep.subr.bf16.mxu1 %v4654_v43  ;;  %v2558_v17 = vrot.slane %v5490_v45, 1 }
  0x79   : > { %v5528_v13 = vsel %vm388_vm0, %v2554_v41, %v2555_v48  ;;  %v2566_v41 = vrot.slane %v5471_v52, 1  ;;  %v2567_v48 = vrot.slane %v5536_v56, 1 }
  0x7a   : > { %4278 = vmatpush3.bf16.msra.mxu0 %v4653_v54  ;;  %4122 = vmatpush3.bf16.msra.mxu1 %v4654_v43  ;;  %v2561_v54 = vrot.slane %v5506_v24, 1  ;;  %v2563_v43 = vrot.slane %v5441_v34, 1  ;;  %v5531_v32 = vsel %vm388_vm0, %v2557_v2, %v2558_v17  ;;  %v2687_v17 = vrot.slane %v5432_v62, 2  ;;  %v5572_v62 = vld [vmem:[%s4822_s27 + $0x90] sm:$0xff]  ;;  %v363_v24 = vld [vmem:[%s4822_s27 + $0x98] sm:$0x3] }
  0x7b   : > { %4287 = vmatprep.subr.bf16.mxu0 %v4655_v7  ;;  %4131 = vmatprep.subr.bf16.mxu1 %v4656_v25 }
  0x7c   : > { %v5539_v10 = vsel %vm388_vm0, %v2560_v19, %v2561_v54  ;;  %v5542_v50 = vsel %vm388_vm0, %v2563_v43, %v2564_v30  ;;  %v4657_v30 = vld [vmem:[%s5895_s3 + $0x148] sm:$0xff]   ;;  %v2690_v19 = vrot.slane %v5435_v58, 2  ;;  %v5933_v54 = vld [vmem:[#allocation10_spill] sm:$0xff]  ;;  %v5569_v43 = vsel %vm388_vm0, %v2566_v41, %v2567_v48 }
  0x7d   : > { %4272 = vmatmul.mubr.msk.bf16.gmra.mrb[4].mxu0 %vm442_vm1, %v5499_v1  ;;  %4116 = vmatmul.mubr.msk.bf16.gmra.mrb[4].mxu1 %vm442_vm1, %v973_v16  ;;  %v5546_v16 = vpack.c.bf16 %v5531_v32, %v5528_v13  ;;  %v5553_v2 = vpack.c.bf16 %v5542_v50, %v5539_v10  ;;  %v2692_v41 = vrot.slane %v5425_v49, 2 }
  0x7e   : > { %4279 = vmatprep.mubr.msk.bf16.mxu0 %vm442_vm1, %v2580_v39  ;;  %4123 = vmatprep.mubr.msk.bf16.mxu1 %vm442_vm1, %v5932_v14  ;;  %v2686_v39 = vrot.slane %v5396_v42, 2  ;;  %v2689_v14 = vrot.slane %v5399_v15, 2  ;;  %v4658_v42 = vld [vmem:[%s5895_s3 + $0x78] sm:$0xff]  }
  0x80   : > { %v2688_v58 = vsel %vm609_vm2, %v2686_v39, %v2687_v17  ;;  %v5578_v63 = vsel %vm609_vm2, %v2689_v14, %v2690_v19  ;;  %v1076_v39 = vpack.c.bf16 %v5572_v62, %v5146_v46  ;;  %v2693_v17 = vrot.slane %v5487_v51, 2 }
  0x81   : > { %v2718_v48 = vpack.c.bf16 %v5578_v63, %v2688_v58  ;;  %v2695_v14 = vrot.slane %v5428_v57, 2  ;;  %v2698_v19 = vrot.slane %v5438_v29, 2  ;;  %v2701_v46 = vrot.slane %v5441_v34, 2 }
  0x82   : > { %v5608_v51 = vsel %vm609_vm2, %v2692_v41, %v2693_v17  ;;  %v1172_v41 = vrot.slane %v5572_v62, 1  ;;  %v2705_v17 = vrot.slane %v5536_v56, 2 }
  0x83   : > { %v5617_v58 = vsel %vm609_vm2, %v2698_v19, %v2699_v60  ;;  %v4661_v60 = vld [vmem:[%s5895_s3 + $0x158] sm:$0xff]   ;;  %v4662_v19 = vld [vmem:[%s5895_s3 + $0x88] sm:$0xff]  }
  0x85   : > { %4280 = vmatmul.mubr.msk.bf16.vlgmr.msra.gmra.mrb[0].mxu0 %vm442_vm1, %v5546_v16  ;;  %4124 = vmatmul.mubr.msk.bf16.vlgmr.msra.gmra.mrb[0].mxu1 %vm442_vm1, %v5933_v54  ;;  %v4659_v54 = vld [vmem:[%s5895_s3 + $0x150] sm:$0xff]  }
  0x86   : > { %4288 = vmatpush3.bf16.msra.mxu0 %v4655_v7  ;;  %4132 = vmatpush3.bf16.msra.mxu1 %v4656_v25  ;;  %v4660_v7 = vld [vmem:[%s5895_s3 + $0x80] sm:$0xff]   ;;  %v5590_v25 = vpack.c.bf16 %v5326_v35, %v5569_v43 }
  0x87   : > { %4283 = vmatprep.mubr.msk.bf16.mxu0 %vm442_vm1, %v5553_v2  ;;  %4289 = vmatprep.subr.bf16.mxu0 %v4657_v30 }
  0x88   : > { %4127 = vmatprep.mubr.msk.bf16.mxu1 %vm442_vm1, %v5137_v20  ;;  %4133 = vmatprep.subr.bf16.mxu1 %v4658_v42  ;;  %v2696_v20 = vrot.slane %v5490_v45, 2 }
  0x8a   : > { %4290 = vmatpush3.bf16.msra.mxu0 %v4657_v30  ;;  %4134 = vmatpush3.bf16.msra.mxu1 %v4658_v42  ;;  %v2702_v30 = vrot.slane %v5509_v26, 2  ;;  %v5611_v45 = vsel %vm609_vm2, %v2695_v14, %v2696_v20  ;;  %v5934_v42 = vld [vmem:[#allocation2_spill] sm:$0xff]  ;;  %v1173_v14 = vrot.slane %v363_v24, 1 }
  0x8b   : > { %4299 = vmatprep.subr.bf16.mxu0 %v4659_v54  ;;  %4143 = vmatprep.subr.bf16.mxu1 %v4660_v7 }
  0x8c   : > { %v5620_v26 = vsel %vm609_vm2, %v2701_v46, %v2702_v30  ;;  %v5935_v46 = vld [vmem:[#allocation7_spill] sm:$0xff]  ;;  %v1174_v30 = vsel %vm388_vm0, %v1172_v41, %v1173_v14  ;;  %v2824_v41 = vpack.c.bf16 %v5425_v49, %v5399_v15  ;;  %v2826_v15 = vpack.c.bf16 %v5471_v52, %v5441_v34  ;;  %v4666_v14 = vld [vmem:[%s5895_s3 + $0x98] sm:$0xff]  }
  0x8d   : > { %4284 = vmatmul.mubr.msk.bf16.gmra.mrb[4].mxu0 %vm442_vm1, %v5590_v25  ;;  %4128 = vmatmul.mubr.msk.bf16.gmra.mrb[4].mxu1 %vm442_vm1, %v1076_v39  ;;  %v5624_v39 = vpack.c.bf16 %v5611_v45, %v5608_v51  ;;  %v5631_v20 = vpack.c.bf16 %v5620_v26, %v5617_v58  ;;  %v4665_v49 = vld [vmem:[%s5895_s3 + $0x168] sm:$0xff]   ;;  %v2936_v34 = vpack.c.bf16 %v5528_v13, %v5478_v5  ;;  %v5937_v13 = vld [vmem:[#allocation13_spill] sm:$0xff] }
  0x8e   : > { %4291 = vmatprep.mubr.msk.bf16.mxu0 %vm442_vm1, %v2718_v48  ;;  %4135 = vmatprep.mubr.msk.bf16.mxu1 %vm442_vm1, %v5934_v42  ;;  %v2704_v48 = vrot.slane %v5471_v52, 2  ;;  %v4663_v42 = vld [vmem:[%s5895_s3 + $0x160] sm:$0xff]   ;;  %v4670_v5 = vld [vmem:[%s5895_s3 + $0xa8] sm:$0xff]  }
  0x8f   : > { %v4681_v52 = vld [vmem:[%s4885_s11] sm:$0xff] }
  0x90   : > { %v5644_v56 = vsel %vm609_vm2, %v2704_v48, %v2705_v17  ;;  %v1270_v48 = vrot.slane %v5572_v62, 2  ;;  %v1271_v17 = vrot.slane %v363_v24, 2  ;;  %v5701_v62 = vld [vmem:[%s4885_s11 + $0x10] sm:$0xff] }
  0x91   : > { %v1388_v24 = vpack.c.bf16 %v5701_v62, %v4681_v52 }
  0x95   : > { %4292 = vmatmul.mubr.msk.bf16.vlgmr.msra.gmra.mrb[0].mxu0 %vm442_vm1, %v5624_v39  ;;  %4136 = vmatmul.mubr.msk.bf16.vlgmr.msra.gmra.mrb[0].mxu1 %vm442_vm1, %v5935_v46  ;;  %v5936_v46 = vld [vmem:[#allocation8_spill] sm:$0xff] }
  0x96   : > { %4300 = vmatpush3.bf16.msra.mxu0 %v4659_v54  ;;  %4144 = vmatpush3.bf16.msra.mxu1 %v4660_v7  ;;  %v5659_v54 = vpack.c.bf16 %v5333_v28, %v5644_v56  ;;  %v1176_v7 = vpack.c.bf16 %v1174_v30, %v5167_v18  ;;  %v2825_v18 = vpack.c.bf16 %v5438_v29, %v5428_v57  ;;  %v4667_v57 = vld [vmem:[%s5895_s3 + $0x170] sm:$0xff]   ;;  %v4668_v29 = vld [vmem:[%s5895_s3 + $0xa0] sm:$0xff]  }
  0x97   : > { %4295 = vmatprep.mubr.msk.bf16.mxu0 %vm442_vm1, %v5631_v20  ;;  %4301 = vmatprep.subr.bf16.mxu0 %v4661_v60 }
  0x98   : > { %4139 = vmatprep.mubr.msk.bf16.mxu1 %vm442_vm1, %v5936_v46  ;;  %4145 = vmatprep.subr.bf16.mxu1 %v4662_v19  ;;  %v5943_v46 = vld [vmem:[#allocation15_spill] sm:$0xff] }
  0x9a   : > { %4302 = vmatpush3.bf16.msra.mxu0 %v4661_v60  ;;  %4146 = vmatpush3.bf16.msra.mxu1 %v4662_v19  ;;  %v5940_v60 = vld [vmem:[#allocation6_spill] sm:$0xff]  ;;  %v5941_v19 = vld [vmem:[#allocation5_spill] sm:$0xff] }
  0x9b   : > { %4311 = vmatprep.subr.bf16.mxu0 %v4663_v42  ;;  %4155 = vmatprep.subr.bf16.mxu1 %v4664_v27  ;;  %v5942_v30 = vpack.c.bf16 %v5940_v60, %v5941_v19 }
  0x9d   : > { %4296 = vmatmul.mubr.msk.bf16.gmra.mrb[4].mxu0 %vm442_vm1, %v5659_v54  ;;  %4140 = vmatmul.mubr.msk.bf16.gmra.mrb[4].mxu1 %vm442_vm1, %v1176_v7 }
  0x9e   : > { %4303 = vmatprep.mubr.msk.bf16.mxu0 %vm442_vm1, %v2824_v41  ;;  %4147 = vmatprep.mubr.msk.bf16.mxu1 %vm442_vm1, %v5184_v61  ;;  %v1272_v61 = vsel %vm609_vm2, %v1270_v48, %v1271_v17  ;;  %v5956_v48 = vld [vmem:[#allocation17_spill] sm:$0xff] }
  0xa5   : > { %4304 = vmatmul.mubr.msk.bf16.vlgmr.msra.gmra.mrb[0].mxu0 %vm442_vm1, %v2825_v18  ;;  %4148 = vmatmul.mubr.msk.bf16.vlgmr.msra.gmra.mrb[0].mxu1 %vm442_vm1, %v5209_v36  ;;  %v1274_v36 = vpack.c.bf16 %v1272_v61, %v5474_v21  ;;  %v4669_v21 = vld [vmem:[%s5895_s3 + $0x178] sm:$0xff]   ;;  %v5951_v18 = vpack.c.bf16 %v5412_v3, %v5329_v11 }
  0xa6   : > { %4312 = vmatpush3.bf16.msra.mxu0 %v4663_v42  ;;  %4156 = vmatpush3.bf16.msra.mxu1 %v4664_v27  ;;  %v2827_v27 = vpack.c.bf16 %v5296_v9, %v5279_v55  ;;  %v2938_v55 = vpack.c.bf16 %v5569_v43, %v5542_v50  ;;  %v4672_v50 = vld [vmem:[%s5895_s3 + $0xb0] sm:$0xff]   ;;  %v5939_v43 = vld [vmem:[#allocation14_spill] sm:$0xff]  ;;  %v4674_v42 = vld [vmem:[%s5895_s3 + $0xb8] sm:$0xff]  }
  0xa7   : > { %4307 = vmatprep.mubr.msk.bf16.mxu0 %vm442_vm1, %v2826_v15  ;;  %4313 = vmatprep.subr.bf16.mxu0 %v4665_v49 }
  0xa8   : > { %4151 = vmatprep.mubr.msk.bf16.mxu1 %vm442_vm1, %v5242_v6  ;;  %4157 = vmatprep.subr.bf16.mxu1 %v4666_v14  ;;  %v2937_v6 = vpack.c.bf16 %v5539_v10, %v5531_v32  ;;  %v4671_v10 = vld [vmem:[%s5895_s3 + $0x180] sm:$0xff]   ;;  %v5938_v32 = vpack.c.bf16 %v5329_v11, %v5326_v35  ;;  %v4673_v35 = vld [vmem:[%s5895_s3 + $0x188] sm:$0xff]  }
  0xa9   : > { %v5954_v11 = vld [vmem:[#allocation11_spill] sm:$0xff] }
  0xaa   : > { %4314 = vmatpush3.bf16.msra.mxu0 %v4665_v49  ;;  %4158 = vmatpush3.bf16.msra.mxu1 %v4666_v14 }
  0xab   : > { %4323 = vmatprep.subr.bf16.mxu0 %v4667_v57  ;;  %4167 = vmatprep.subr.bf16.mxu1 %v4668_v29 }
  0xad   : > { %4308 = vmatmul.mubr.msk.bf16.gmra.mrb[4].mxu0 %vm442_vm1, %v2827_v27  ;;  %4152 = vmatmul.mubr.msk.bf16.gmra.mrb[4].mxu1 %vm442_vm1, %v1274_v36 }
  0xae   : > { %4315 = vmatprep.mubr.msk.bf16.mxu0 %vm442_vm1, %v2936_v34  ;;  %4159 = vmatprep.mubr.msk.bf16.mxu1 %vm442_vm1, %v1388_v24 }
  0xb5   : > { %4316 = vmatmul.mubr.msk.bf16.vlgmr.msra.gmra.mrb[0].mxu0 %vm442_vm1, %v2937_v6  ;;  %4160 = vmatmul.mubr.msk.bf16.vlgmr.msra.gmra.mrb[0].mxu1 %vm442_vm1, %v5150_v4  ;;  %v3046_v4 = vpack.c.bf16 %v5608_v51, %v5578_v63  ;;  %v3047_v63 = vpack.c.bf16 %v5617_v58, %v5611_v45  ;;  %v3048_v51 = vpack.c.bf16 %v5644_v56, %v5620_v26  ;;  %v4675_v45 = vld [vmem:[%s5895_s3 + $0x190] sm:$0xff]   ;;  %v4676_v58 = vld [vmem:[%s5895_s3 + $0xc0] sm:$0xff]   ;;  %v4677_v56 = vld [vmem:[%s5895_s3 + $0x198] sm:$0xff]  }
  0xb6   : > { %4324 = vmatpush3.bf16.msra.mxu0 %v4667_v57  ;;  %4168 = vmatpush3.bf16.msra.mxu1 %v4668_v29  ;;  %v5944_v26 = vpack.c.bf16 %v5338_v38, %v5333_v28  ;;  %v4678_v28 = vld [vmem:[%s5895_s3 + $0xc8] sm:$0xff]  }
  0xb7   : > { %4319 = vmatprep.mubr.msk.bf16.mxu0 %vm442_vm1, %v2938_v55  ;;  %4325 = vmatprep.subr.bf16.mxu0 %v4669_v21 }
  0xb8   : > { %4163 = vmatprep.mubr.msk.bf16.mxu1 %vm442_vm1, %v5937_v13  ;;  %4169 = vmatprep.subr.bf16.mxu1 %v4670_v5 }
  0xba   : > { %4326 = vmatpush3.bf16.msra.mxu0 %v4669_v21  ;;  %4170 = vmatpush3.bf16.msra.mxu1 %v4670_v5 }
  0xbb   : > { %4335 = vmatprep.subr.bf16.mxu0 %v4671_v10  ;;  %4179 = vmatprep.subr.bf16.mxu1 %v4672_v50 }
  0xbd   : > { %4320 = vmatmul.mubr.msk.bf16.gmra.mrb[4].mxu0 %vm442_vm1, %v5938_v32  ;;  %4164 = vmatmul.mubr.msk.bf16.gmra.mrb[4].mxu1 %vm442_vm1, %v5939_v43 }
  0xbe   : > { %4327 = vmatprep.mubr.msk.bf16.mxu0 %vm442_vm1, %v3046_v4  ;;  %4171 = vmatprep.mubr.msk.bf16.mxu1 %vm442_vm1, %v5942_v30 }
  0xc5   : > { %4328 = vmatmul.mubr.msk.bf16.vlgmr.msra.gmra.mrb[0].mxu0 %vm442_vm1, %v3047_v63  ;;  %4172 = vmatmul.mubr.msk.bf16.vlgmr.msra.gmra.mrb[0].mxu1 %vm442_vm1, %v5943_v46 }
  0xc6   : > { %4336 = vmatpush3.bf16.msra.mxu0 %v4671_v10  ;;  %4180 = vmatpush3.bf16.msra.mxu1 %v4672_v50 }
  0xc7   : > { %4331 = vmatprep.mubr.msk.bf16.mxu0 %vm442_vm1, %v3048_v51  ;;  %4337 = vmatprep.subr.bf16.mxu0 %v4673_v35 }
  0xc8   : > { %4175 = vmatprep.mubr.msk.bf16.mxu1 %vm442_vm1, %v5283_v59  ;;  %4181 = vmatprep.subr.bf16.mxu1 %v4674_v42  ;;  %v5945_v59 = vpack.c.bf16 %v5027_v53, %v5312_v31  ;;  %v4679_v53 = vld [vmem:[%s5895_s3 + $0x1a0] sm:$0xff]  }
  0xc9   : > { %v4683_v31 = vld [vmem:[%s4885_s11 + $0x20] sm:$0xff] }
  0xca   : > { %4338 = vmatpush3.bf16.msra.mxu0 %v4673_v35  ;;  %4182 = vmatpush3.bf16.msra.mxu1 %v4674_v42 }
  0xcb   : > { %4347 = vmatprep.subr.bf16.mxu0 %v4675_v45  ;;  %4191 = vmatprep.subr.bf16.mxu1 %v4676_v58 }
  0xcd   : > { %4332 = vmatmul.mubr.msk.bf16.gmra.mrb[4].mxu0 %vm442_vm1, %v5944_v26  ;;  %4176 = vmatmul.mubr.msk.bf16.gmra.mrb[4].mxu1 %vm442_vm1, %v5300_v0  ;;  %v1786_v0 = vpack.c.bf16 %v4683_v31, %v5701_v62 }
  0xce   : > { %4339 = vmatprep.mubr.msk.bf16.mxu0 %vm442_vm1, %v5448_v40  ;;  %4183 = vmatprep.mubr.msk.bf16.mxu1 %vm442_vm1, %v5945_v59  ;;  %v5946_v40 = vpack.c.bf16 %v5352_v12, %v5296_v9  ;;  %v5947_v9 = vld [vmem:[#allocation4_spill] sm:$0xff]  ;;  %v5948_v12 = vld [vmem:[#allocation3_spill] sm:$0xff] }
  0xcf   : > { %v5949_v41 = vpack.c.bf16 %v5947_v9, %v5948_v12 }
  0xd5   : > { %4340 = vmatmul.mubr.msk.bf16.vlgmr.msra.gmra.mrb[0].mxu0 %vm442_vm1, %v5457_v47  ;;  %4184 = vmatmul.mubr.msk.bf16.vlgmr.msra.gmra.mrb[0].mxu1 %vm442_vm1, %v5347_v8  ;;  %v4684_v8 = vld [vmem:[%s5895_s3 + $0xd0] sm:$0xff]  }
  0xd6   : > { %4348 = vmatpush3.bf16.msra.mxu0 %v4675_v45  ;;  %4192 = vmatpush3.bf16.msra.mxu1 %v4676_v58  ;;  %v4685_v47 = vld [vmem:[%s4885_s11 + $0x50] sm:$0xff] }
  0xd7   : > { %4343 = vmatprep.mubr.msk.bf16.mxu0 %vm442_vm1, %v5499_v1  ;;  %4349 = vmatprep.subr.bf16.mxu0 %v4677_v56  ;;  %v4686_v1 = vld [vmem:[%s4885_s11 + $0x60] sm:$0xff]  ;;  %s3613_s11 = sshll.u32 %s5975_s18, 3 }
  0xd8   : > { %4187 = vmatprep.mubr.msk.bf16.mxu1 %vm442_vm1, %v5366_v33  ;;  %4193 = vmatprep.subr.bf16.mxu1 %v4678_v28  ;;  %v4680_v33 = vld [vmem:[%s5895_s3 + $0x1a8] sm:$0xff]   ;;  %v1788_v7 = vpack.c.bf16 %v4686_v1, %v4685_v47  ;;  %s340_s28 = sadd.s32 %s3614_s26, %s3613_s11 }
  0xd9   : > { %s3615_s29 = sshll.u32 %s340_s28, 3 }
  0xda   : > { %4350 = vmatpush3.bf16.msra.mxu0 %v4677_v56  ;;  %4194 = vmatpush3.bf16.msra.mxu1 %v4678_v28  ;;  %s5859_s27 = scalar_lea.vmem %s5897_s5, %s3615_s29 }
  0xdb   : > { %4359 = vmatprep.subr.bf16.mxu0 %v4679_v53  ;;  %4371 = vmatprep.subr.bf16.mxu1 %v4684_v8 }
  0xdd   : > { %4344 = vmatmul.mubr.msk.bf16.gmra.mrb[4].mxu0 %vm442_vm1, %v5946_v40  ;;  %4188 = vmatmul.mubr.msk.bf16.gmra.mrb[4].mxu1 %vm442_vm1, %v5372_v23  ;;  %v4687_v23 = vld [vmem:[%s5895_s3 + $0xd8] sm:$0xff]  }
  0xde   : > { %4351 = vmatprep.mubr.msk.bf16.mxu0 %vm442_vm1, %v5546_v16  ;;  %4195 = vmatprep.mubr.msk.bf16.mxu1 %vm442_vm1, %v1786_v0  ;;  %v5950_v16 = vld [vmem:[#allocation16_spill] sm:$0xff] }
  0xe5   : > { %4352 = vmatmul.mubr.msk.bf16.vlgmr.msra.gmra.mrb[0].mxu0 %vm442_vm1, %v5553_v2  ;;  %4196 = vmatmul.mubr.msk.bf16.vlgmr.msra.gmra.mrb[0].mxu1 %vm442_vm1, %v5949_v41  ;;  %v1900_v2 = vpack.c.bf16 %v5275_v22, %v5950_v16  ;;  %v5953_v22 = vld [vmem:[#allocation12_spill] sm:$0xff] }
  0xe6   : > { %4360 = vmatpush3.bf16.msra.mxu0 %v4679_v53  ;;  %4373 = vmatpush3.bf16.msra.mxu1 %v4684_v8  ;;  %v5955_v3 = vpack.c.bf16 %v5953_v22, %v5954_v11 }
  0xe7   : > { %4355 = vmatprep.mubr.msk.bf16.mxu0 %vm442_vm1, %v5590_v25  ;;  %4361 = vmatprep.subr.bf16.mxu0 %v4680_v33  ;;  %v5952_v25 = vpack.c.bf16 %v5067_v44, %v5055_v37  ;;  %v5957_v37 = vpack.c.bf16 %v5956_v48, %v5338_v38 }
  0xe8   : > { %4199 = vmatprep.mubr.msk.bf16.mxu1 %vm442_vm1, %v1788_v7  ;;  %4372 = vmatprep.subr.bf16.mxu1 %v4687_v23 }
  0xea   : > { %4362 = vmatpush3.bf16.msra.mxu0 %v4680_v33  ;;  %4374 = vmatpush3.bf16.msra.mxu1 %v4687_v23 }
  0xed   : > { %4356 = vmatmul.mubr.msk.bf16.gmra.mrb[4].mxu0 %vm442_vm1, %v5951_v18  ;;  %4200 = vmatmul.mubr.msk.bf16.gmra.mrb[4].mxu1 %vm442_vm1, %v5952_v25 }
  0xee   : > { %4363 = vmatprep.mubr.msk.bf16.mxu0 %vm442_vm1, %v5624_v39  ;;  %4211 = vmatprep.mubr.msk.bf16.mxu1 %vm442_vm1, %v1900_v2 }
  0xf5   : > { %4364 = vmatmul.mubr.msk.bf16.vlgmr.msra.gmra.mrb[0].mxu0 %vm442_vm1, %v5631_v20 }
  0xf6   : > { %4367 = vmatprep.mubr.msk.bf16.mxu0 %vm442_vm1, %v5659_v54  ;;  %v3882_v54 = vld [vmem:[%s5896_s4] ss:$0 sm:$0xff] }
  0xf9   : > { %4212 = vmatmul.mubr.msk.bf16.vlgmr.msra.gmra.mrb[4].mxu1 %vm442_vm1, %v5955_v3 }
  0xfd   : > { %4368 = vmatmul.mubr.msk.bf16.gmra.mrb[4].mxu0 %vm442_vm1, %v5957_v37 }
 0x1b8   : > { %v4197_v44 = vpop.f32.mrb[0].mxu1 }
 0x1b9   : > { %v1853_v39 = vpop.f32.mrb[1].mxu1 }
 0x1ba   : > { %v4198_v17 = vpop.f32.mrb[2].mxu1 }
 0x1bb   : > { %v1856_v15 = vpop.f32.mrb[3].mxu1 }
 0x1c8   : > { %v4365_v20 = vpop.f32.mrb[0].mxu0 }
 0x1c9   : > { %v4375_v49 = vadd.f32 %v4365_v20, %v4197_v44  ;;  %v3405_v14 = vpop.f32.mrb[1].mxu0 }
 0x1ca   : > { %v4376_v38 = vadd.f32 %v3405_v14, %v1853_v39  ;;  %v4366_v61 = vpop.f32.mrb[2].mxu0 }
 0x1cb   : > { %v3453_v57 = vadd.f32 %v4375_v49, %v3882_v54  ;;  %v4377_v29 = vadd.f32 %v4366_v61, %v4198_v17  ;;  %v3408_v27 = vpop.f32.mrb[3].mxu0 }
 0x1cc   : > { %v3451_v36 = vadd.f32 %v4376_v38, %v3882_v54  ;;  %v4378_v34 = vadd.f32 %v3408_v27, %v1856_v15  ;;  %v4213_v52 = vpop.f32.mrb[4].mxu1 }
 0x1cd   : > { %3462 = vst.msk [vmem:[%s5859_s27 + $0x10] sm:$0xff] %vm3459_vm3, %v3453_v57  ;;  %v3454_v62 = vadd.f32 %v4377_v29, %v3882_v54  ;;  %v1981_v24 = vpop.f32.mrb[5].mxu1 }
 0x1ce   : > { %3460 = vst.msk [vmem:[%s5859_s27] sm:$0xff] %vm3459_vm3, %v3451_v36  ;;  %v3452_v6 = vadd.f32 %v4378_v34, %v3882_v54  ;;  %v4214_v55 = vpop.f32.mrb[6].mxu1 }
 0x1cf   : > { %3463 = vst.msk [vmem:[%s5859_s27 + $0x18] sm:$0xff] %vm3459_vm3, %v3454_v62  ;;  %v1984_v21 = vpop.f32.mrb[7].mxu1 }
 0x1d0   : > { %3461 = vst.msk [vmem:[%s5859_s27 + $0x8] sm:$0xff] %vm3459_vm3, %v3452_v6  ;;  %v4369_v5 = vpop.f32.mrb[4].mxu0 }
 0x1d1   : > { %v4379_v10 = vadd.f32 %v4369_v5, %v4213_v52  ;;  %v3421_v50 = vpop.f32.mrb[5].mxu0 }
 0x1d2   : > { %v4380_v13 = vadd.f32 %v3421_v50, %v1981_v24  ;;  %v4370_v4 = vpop.f32.mrb[6].mxu0 }
 0x1d3   : > { %v3457_v32 = vadd.f32 %v4379_v10, %v3882_v54  ;;  %v4381_v43 = vadd.f32 %v4370_v4, %v4214_v55  ;;  %v3424_v60 = vpop.f32.mrb[7].mxu0 }
 0x1d4   : > { %v3455_v19 = vadd.f32 %v4380_v13, %v3882_v54  ;;  %v4382_v30 = vadd.f32 %v3424_v60, %v1984_v21 }
 0x1d5   : > { %3466 = vst.msk [vmem:[%s5859_s27 + $0x30] sm:$0xff] %vm3459_vm3, %v3457_v32  ;;  %v3458_v63 = vadd.f32 %v4381_v43, %v3882_v54 }
 0x1d6   : > { %3464 = vst.msk [vmem:[%s5859_s27 + $0x20] sm:$0xff] %vm3459_vm3, %v3455_v19  ;;  %v3456_v51 = vadd.f32 %v4382_v30, %v3882_v54 }
 0x1d7   : > { %3467 = vst.msk [vmem:[%s5859_s27 + $0x38] sm:$0xff] %vm3459_vm3, %v3458_v63 }
 0x1d8   : > { %3465 = vst.msk [vmem:[%s5859_s27 + $0x28] sm:$0xff] %vm3459_vm3, %v3456_v51 }
 0x1d9 PF: > { %s15_s22 = sadd.s32 1, %s4726_s22   ;;  %s5958_s18 = smov %s4718_s20 }
 0x1da   : > { %p12_p10 = scmp.ge.s32.totalorder %s15_s22, 10   ;;  %s5959_s19 = smov %s4722_s21 }
 0x1db   : > { %s5960_s20 = smov %s5963_s23  ;;  %s5961_s21 = smov %s5967_s24 }
 0x1dc   :  { %14 = sbr.rel (!%p12_p10) target bundleno = 3 (0x3), region = 102 }

// kernel: resnet_block_3d_forward.11
= control target key start
LH: loop header
LB: loop body
LE: loop exit
PB: predicated region body
PF: predicated region fallthrough
CT: control target
= control target key end

     0   :  { %s3034_s0 = inlined_call_operand.vmem [shape: f32[2,4,10,10,64], index: 0, kind: input, shape index: {}]   ;;  %s3035_s1 = inlined_call_operand.vmem [shape: f32[2,4,8,8,32], index: 1, kind: input, shape index: {}]   ;;  %s3036_s2 = inlined_call_operand.vmem [shape: bf16[9,64,64], index: 2, kind: input, shape index: {}]   ;;  %s3037_s3 = inlined_call_operand.vmem [shape: f32[1,64], index: 3, kind: input, shape index: {}]   ;;  %s3038_s4 = inlined_call_operand.vmem [shape: bf16[32,64], index: 4, kind: input, shape index: {}]   ;;  %s3039_s5 = inlined_call_operand.vmem [shape: f32[1,64], index: 5, kind: input, shape index: {}]   ;;  %s3040_s6 = inlined_call_operand.hbm [shape: f32[2,4,8,8,64], index: 6, kind: output, shape index: {}]  }
   0x1   :  { %3045 = sst [smem:[#allocation9_spill]] %s3038_s4 }
   0x2   :  { %11 = vsyncpa [#allocation3], 0 }
   0x3   :  { %13 = vsyncpa [#allocation3 + $0x1], 0  ;;  %s2476_s21 = smov 0   ;;  %s2478_s22 = smov 0  }
   0x4   :  { %s2480_s23 = smov 0   ;;  %s2482_s24 = smov 0  }
   0x5   :  { %s2484_s25 = smov 0   ;;  %s2486_s26 = smov 0  }
   0x6   :  { %s2488_s27 = smov 0   ;;  %s2490_s28 = smov 0  }
   0x7 LB: > { %3046 = sst [smem:[#allocation5_spill]] %s2428_s26  ;;  %s1755_s29 = sadd.s32 4294967295, %s2436_s28   ;;  %s2436_s28 = sphi %s2490_s28, %s19_s28   ;;  %s2432_s27 = sphi %s2488_s27, %s3056_s27   ;;  %s2428_s26 = sphi %s2486_s26, %s3055_s26   ;;  %s2424_s25 = sphi %s2484_s25, %s3054_s25   ;;  %s2420_s24 = sphi %s2482_s24, %s3053_s24   ;;  %s2416_s23 = sphi %s2480_s23, %s3059_s23   ;;  %s2412_s22 = sphi %s2478_s22, %s3058_s22   ;;  %s2408_s21 = sphi %s2476_s21, %s3057_s21  }
   0x8   : > { %3047 = sst [smem:[#allocation6_spill]] %s2432_s27  ;;  %s1756_s30 = sadd.s32 4294967294, %s2436_s28  }
   0x9   : > { %s28_s7 = sadd.s32 1, %s2428_s26  ;;  %s31_s8 = sadd.s32 1, %s2432_s27 }
   0xa   : > { %p29_p0 = scmp.ge.s32.totalorder %s28_s7, 4  ;;  %p190_p1 = scmp.ne.s32.totalorder %s2416_s23, %s2412_s22 }
   0xb   : > { %p191_p2 = scmp.eq.s32.totalorder %s1755_s29, 7  ;;  %p196_p5 = scmp.ne.s32.totalorder %s2412_s22, %s2408_s21 }
   0xc   : > { %s3061_s7 = smov (%p29_p0, %s28_s7), 0  ;;  %s3063_s8 = smov (!%p29_p0, %s31_s8), %s2432_s27 }
   0xd   : > { %3048 = sst [smem:[#allocation7_spill]] %s3061_s7  ;;  %s176_s9 = ssub.s32 %s2428_s26, %s3061_s7 }
   0xe   : > { %p2527_p3 = por %p191_p2, %p190_p1  ;;  %p33_p4 = scmp.ge.s32.totalorder %s3063_s8, 2 }
   0xf   : > { %p197_p6 = scmp.eq.s32.totalorder %s1756_s30, 7  ;;  %p1759_p7 = scmp.ge.s32.totalorder %s2436_s28, 1 }
  0x10   : > { %s3065_s8 = smov (%p33_p4, %s3063_s8), 0  ;;  %p251_p9 = scmp.lt.s32.totalorder %s2436_s28, 9 }
  0x11   : > { %3050 = sst [smem:[#allocation8_spill]] %s3065_s8  ;;  %p2536_p8 = por %p197_p6, %p196_p5 }
  0x12   : > { %s175_s12 = ssub.s32 %s2432_s27, %s3065_s8  ;;  %s180_s13 = sadd.s32 1, %s2416_s23 }
  0x13   : > { %s177_s14 = sor.u32 %s176_s9, %s175_s12  ;;  %p252_p10 = pnand %p1759_p7, %p251_p9 }
  0x14   : > { %p178_p11 = scmp.eq.s32.totalorder %s177_s14, 0  ;;  %v2304_v0 = vld [vmem:[%s3036_s2 + $0x80] sm:$0xff] (!%p252_p10)   ;;  %p294_p12 = scmp.lt.s32.totalorder (!%p252_p10), %s2424_s25, 1  ;;  %v2306_v2 = vld [vmem:[%s3036_s2 + $0x88] sm:$0xff] (!%p252_p10)   ;;  %v2308_v4 = vld [vmem:[%s3036_s2 + $0x90] sm:$0xff] (!%p252_p10)   ;;  %vm348_vm0 = vcmask (!%p252_p10), 261120  }
  0x15   : > { %255 = sbr.rel (%p252_p10) target bundleno = 352 (0x160), region = 44  ;;  %s3052_s4 = sld [smem:[#allocation9_spill]] (!%p252_p10)  ;;  %2069 = vmatprep.subr.bf16.mxu0 (!%p252_p10), %v2304_v0  ;;  %v2309_v5 = vld [vmem:[%s3036_s2] sm:$0xff] (!%p252_p10)   ;;  %v2310_v6 = vld [vmem:[%s3036_s2 + $0x98] sm:$0xff] (!%p252_p10)   ;;  %v2311_v12 = vld [vmem:[%s3036_s2 + $0x8] sm:$0xff] (!%p252_p10)   ;;  %vm584_vm1 = vcmask (!%p252_p10), 1046528  }
  0x16   : > { %s2545_s15 = scalar_select %p178_p11, %s2416_s23, %s180_s13  }
  0x17   : > { %p296_p13 = scmp.lt.s32.totalorder (!%p252_p10), %s2420_s24, 3  ;;  %2070 = vmatpush3.bf16.msra.mxu0 (!%p252_p10), %v2304_v0  ;;  %v2592_v13 = vld [vmem:[%s3036_s2 + $0xa0] sm:$0xff] (!%p252_p10)   ;;  %vm482_vm2 = vcmask (!%p252_p10), 523264   ;;  %v2313_v39 = vld [vmem:[%s3036_s2 + $0x10] sm:$0xff] (!%p252_p10)   ;;  %vm739_vm3 = vcmask (!%p252_p10), 1045504   ;;  %v2314_v47 = vld [vmem:[%s3036_s2 + $0xa8] sm:$0xff] (!%p252_p10)  }
  0x18   : > { %2071 = vmatprep.subr.bf16.mxu0 (!%p252_p10), %v2306_v2  ;;  %v2315_v49 = vld [vmem:[%s3036_s2 + $0x18] sm:$0xff] (!%p252_p10)   ;;  %s291_s17 = sand.u32 (!%p252_p10), 1, %s2412_s22   ;;  %s2438_s26 = smov (!%p252_p10), [#allocation2]  }
  0x19   : > { %s1760_s18 = sshll.u32 (!%p252_p10), %s291_s17, 6  ;;  %s2982_s7 = scalar_lea.sflag (!%p252_p10), [#allocation3], %s291_s17 }
  0x1a   : > { %s2346_s27 = sshll.u32 (!%p252_p10), %s2438_s26, 4  ;;  %s2347_s27 = int_to_ptr.vmem [resolvable:$false] %s2346_s27 }
  0x1b   : > { %v2305_v1 = vld [vmem:[%s3052_s4] sm:$0xff] (!%p252_p10)   ;;  %v2307_v3 = vld [vmem:[%s3052_s4 + $0x8] sm:$0xff] (!%p252_p10)   ;;  %2072 = vmatpush3.bf16.msra.mxu0 (!%p252_p10), %v2306_v2 }
  0x1c   : > { %s295_s30 = scalar_select %p294_p12, %s2424_s25, 1  ;;  %1993 = vmatprep.subr.bf16.mxu1 %v2305_v1  ;;  %2073 = vmatprep.subr.bf16.mxu0 %v2308_v4 }
  0x1d   : > { %s297_s13 = scalar_select %p296_p13, %s2420_s24, 3  ;;  %1994 = vmatpush3.bf16.msra.mxu1 %v2305_v1 }
  0x1e   : > { %s2230_s14 = smul.u32 80, %s295_s30  ;;  %s1763_s16 = sshll.u32 %s295_s30, 5  ;;  %1995 = vmatprep.subr.bf16.mxu1 %v2307_v3 }
  0x1f   : > { %s2229_s19 = smul.u32 20, %s297_s13  ;;  %s1762_s20 = sshll.u32 %s297_s13, 3  ;;  %2074 = vmatpush3.bf16.msra.mxu0 %v2308_v4 }
  0x20   : > { %s309_s29 = sadd.s32 %s1763_s16, %s1762_s20  ;;  %2075 = vmatprep.subr.bf16.mxu0 %v2310_v6 }
  0x21   : > { %s300_s9 = sadd.s32 %s2230_s14, %s2229_s19  ;;  %s1764_s12 = sshll.u32 %s309_s29, 3  ;;  %1996 = vmatpush3.bf16.msra.mxu1 %v2307_v3 }
  0x22   : > { %s1761_s4 = sshll.u32 %s300_s9, 3  ;;  %s2572_s30 = scalar_lea.vmem %s3035_s1, %s1764_s12  ;;  %2005 = vmatprep.subr.bf16.mxu1 %v2309_v5 }
  0x23   : > { %s2580_s14 = scalar_lea.vmem %s3034_s0, %s1761_s4  ;;  %v313_v7 = vld [vmem:[%s2572_s30] sm:$0xff]  ;;  %v314_v8 = vld [vmem:[%s2572_s30 + $0x8] sm:$0xff]  ;;  %v315_v9 = vld [vmem:[%s2572_s30 + $0x10] sm:$0xff]  ;;  %2076 = vmatpush3.bf16.msra.mxu0 %v2310_v6  ;;  %s1910_s29 = sshll.u32 %s2420_s24, 3 }
  0x24   : > { %v321_v10 = vpack.c.bf16 %v314_v8, %v313_v7  ;;  %v316_v11 = vld [vmem:[%s2572_s30 + $0x18] sm:$0xff]  ;;  %v2595_v15 = vld [vmem:[%s2580_s14 + $0x10] sm:$0xff]  ;;  %v2601_v17 = vld [vmem:[%s2580_s14 + $0x20] sm:$0xff]  ;;  %2085 = vmatprep.subr.bf16.mxu0 %v2592_v13  ;;  %s1911_s9 = sshll.u32 %s2424_s25, 5  ;;  %s2954_s12 = scalar_lea.vmem [#allocation2], %s1760_s18 }
  0x25   : > { %v322_v14 = vpack.c.bf16 %v316_v11, %v315_v9  ;;  %v2598_v16 = vld [vmem:[%s2580_s14 + $0x18] sm:$0x3]  ;;  %v2605_v18 = vld [vmem:[%s2580_s14 + $0x28] sm:$0x3]  ;;  %v2608_v19 = vld [vmem:[%s2580_s14 + $0x30] sm:$0xff]  ;;  %v588_v21 = vrot.slane %v2595_v15, 1 }
  0x26   : > { %1997 = vmatprep.mubr.msk.bf16.mxu1 %vm348_vm0, %v321_v10  ;;  %v2611_v20 = vld [vmem:[%s2580_s14 + $0x38] sm:$0x3]  ;;  %v2616_v22 = vld [vmem:[%s2580_s14 + $0x40] sm:$0xff]  ;;  %v2619_v23 = vld [vmem:[%s2580_s14 + $0x48] sm:$0x3]  ;;  %v589_v24 = vrot.slane %v2598_v16, 1  ;;  %v2699_v0 = vpack.c.bf16 %v2608_v19, %v2601_v17 }
  0x27   : > { %1998 = vmatmul.mubr.msk.bf16.vlgmr.msra.gmra.mrb[0].mxu1 %vm348_vm0, %v322_v14  ;;  %v591_v25 = vrot.slane %v2601_v17, 1  ;;  %v592_v26 = vrot.slane %v2605_v18, 1  ;;  %v594_v27 = vrot.slane %v2608_v19, 1  ;;  %v595_v28 = vrot.slane %v2611_v20, 1  ;;  %v317_v30 = vld [vmem:[%s2572_s30 + $0x20] sm:$0xff]  ;;  %v318_v31 = vld [vmem:[%s2572_s30 + $0x28] sm:$0xff] }
  0x28   : > { %2006 = vmatpush3.bf16.msra.mxu1 %v2309_v5  ;;  %v597_v29 = vrot.slane %v2616_v22, 1  ;;  %v2630_v32 = vld [vmem:[%s2580_s14] sm:$0xff]  ;;  %v2633_v33 = vsel %vm584_vm1, %v588_v21, %v589_v24  ;;  %v598_v34 = vrot.slane %v2619_v23, 1  ;;  %v319_v35 = vld [vmem:[%s2572_s30 + $0x30] sm:$0xff]  ;;  %v320_v36 = vld [vmem:[%s2572_s30 + $0x38] sm:$0xff]  ;;  %v744_v41 = vrot.slane %v2598_v16, 2  ;;  %s1646_s30 = sadd.s32 %s1911_s9, %s1910_s29 }
  0x29   : > { %2007 = vmatprep.subr.bf16.mxu1 %v2311_v12  ;;  %v2639_v37 = vsel %vm584_vm1, %v591_v25, %v592_v26  ;;  %v2642_v38 = vsel %vm584_vm1, %v594_v27, %v595_v28  ;;  %v747_v42 = vrot.slane %v2605_v18, 2  ;;  %v750_v43 = vrot.slane %v2611_v20, 2  ;;  %v2665_v50 = vld [vmem:[%s2580_s14 + $0x50] sm:$0xff]  ;;  %v2672_v53 = vld [vmem:[%s2580_s14 + $0x58] sm:$0x3]  ;;  %v2675_v54 = vld [vmem:[%s2580_s14 + $0x60] sm:$0xff] }
  0x2a   : > { %v2649_v40 = vsel %vm584_vm1, %v597_v29, %v598_v34  ;;  %v1022_v44 = vpack.c.bf16 %v2639_v37, %v2633_v33  ;;  %v323_v46 = vpack.c.bf16 %v318_v31, %v317_v30  ;;  %v324_v48 = vpack.c.bf16 %v320_v36, %v319_v35  ;;  %v2678_v55 = vld [vmem:[%s2580_s14 + $0x68] sm:$0x3]  ;;  %v2689_v61 = vld [vmem:[%s2580_s14 + $0x70] sm:$0xff]  ;;  %v2692_v62 = vld [vmem:[%s2580_s14 + $0x78] sm:$0x3]  ;;  %s1912_s24 = sshll.u32 %s1646_s30, 7 }
  0x2b   : > { %v1023_v45 = vpack.c.bf16 %v2649_v40, %v2642_v38  ;;  %v743_v51 = vrot.slane %v2595_v15, 2  ;;  %v746_v52 = vrot.slane %v2601_v17, 2  ;;  %v600_v56 = vrot.slane %v2665_v50, 1  ;;  %v2695_v63 = vld [vmem:[%s2580_s14 + $0x8] sm:$0x3]  ;;  %v2703_v1 = vld [vmem:[%s2580_s14 + $0x80] sm:$0xff]  ;;  %s2970_s16 = scalar_lea.hbm %s3040_s6, %s1912_s24 }
  0x2c   : > { %2008 = vmatpush3.bf16.msra.mxu1 %v2311_v12  ;;  %2077 = vmatprep.mubr.msk.bf16.mxu0 %vm482_vm2, %v1022_v44  ;;  %v446_v57 = vpack.c.bf16 %v2595_v15, %v2630_v32  ;;  %v601_v58 = vrot.slane %v2672_v53, 1  ;;  %v603_v59 = vrot.slane %v2675_v54, 1  ;;  %v604_v60 = vrot.slane %v2678_v55, 1  ;;  %v2706_v2 = vld [vmem:[%s2580_s14 + $0x88] sm:$0x3]  ;;  %v2316_v5 = vld [vmem:[%s3036_s2 + $0xb0] sm:$0xff]  }
  0x2d   : > { %2009 = vmatprep.subr.bf16.mxu1 %v2313_v39  ;;  %2001 = vmatprep.mubr.msk.bf16.mxu1 %vm348_vm0, %v323_v46  ;;  %v606_v3 = vrot.slane %v2689_v61, 1  ;;  %v607_v4 = vrot.slane %v2692_v62, 1  ;;  %v1018_v8 = vrot.slane %v2703_v1, 1  ;;  %v1019_v9 = vrot.slane %v2706_v2, 1  ;;  %v2318_v26 = vld [vmem:[%s3036_s2 + $0xb8] sm:$0xff]   ;;  %v2319_v28 = vld [vmem:[%s3036_s2 + $0x28] sm:$0xff]  }
  0x2e   : > { %2078 = vmatmul.mubr.msk.bf16.vlgmr.msra.gmra.mrb[0].mxu0 %vm482_vm2, %v1023_v45  ;;  %v2714_v6 = vsel %vm584_vm1, %v600_v56, %v601_v58  ;;  %v2717_v7 = vsel %vm584_vm1, %v603_v59, %v604_v60  ;;  %v753_v10 = vrot.slane %v2619_v23, 2  ;;  %v2732_v14 = vsel %vm739_vm3, %v743_v51, %v744_v41  ;;  %v2321_v20 = vld [vmem:[%s3036_s2 + $0x30] sm:$0xff]   ;;  %v2322_v46 = vld [vmem:[%s3036_s2 + $0xc8] sm:$0xff]   ;;  %v2325_v60 = vld [vmem:[%s3036_s2 + $0x40] sm:$0xff]   ;;  %s1649_s25 = sshll.u32 %s2954_s12, 4  ;;  %s2348_s4 = scalar_lea.vmem %s2347_s27, 2048  ;;  %s2972_s25 = int_to_ptr.vmem [resolvable:$true] %s1649_s25 }
  0x2f   : > { %2002 = vmatmul.mubr.msk.bf16.gmra.mrb[4].mxu1 %vm348_vm0, %v324_v48  ;;  %2086 = vmatpush3.bf16.msra.mxu0 %v2592_v13  ;;  %v1024_v11 = vpack.c.bf16 %v2717_v7, %v2714_v6  ;;  %v2726_v12 = vsel %vm584_vm1, %v606_v3, %v607_v4  ;;  %v2317_v13 = vld [vmem:[%s3036_s2 + $0x20] sm:$0xff]   ;;  %v2735_v16 = vsel %vm584_vm1, %v1018_v8, %v1019_v9  ;;  %v749_v21 = vrot.slane %v2608_v19, 2  ;;  %v2326_v3 = vld [vmem:[%s3036_s2 + $0xd8] sm:$0xff]   ;;  %v2327_v4 = vld [vmem:[%s3036_s2 + $0x48] sm:$0xff]   ;;  %s2342_s8 = scalar_lea.vmem %s2972_s25, 1024  ;;  %p2349_p4 = scmp.lt.s32.totalorder %s2972_s25, %s2347_s27 }
  0x30   : > { %2010 = vmatpush3.bf16.msra.mxu1 %v2313_v39  ;;  %2087 = vmatprep.subr.bf16.mxu0 %v2314_v47  ;;  %v2738_v18 = vsel %vm739_vm3, %v746_v52, %v747_v42  ;;  %v752_v23 = vrot.slane %v2616_v22, 2  ;;  %v585_v24 = vrot.slane %v2630_v32, 1  ;;  %v1025_v25 = vpack.c.bf16 %v2735_v16, %v2726_v12  ;;  %v2320_v42 = vld [vmem:[%s3036_s2 + $0xc0] sm:$0xff]   ;;  %p2343_p0 = scmp.ne.s32.totalorder %s2972_s25, %s2342_s8  ;;  %p2350_p5 = scmp.lt.s32.totalorder %s2348_s4, %s2342_s8 }
  0x31   : > { %2011 = vmatprep.subr.bf16.mxu1 %v2315_v49  ;;  %2013 = vmatprep.mubr.msk.bf16.mxu1 %vm482_vm2, %v446_v57  ;;  %v586_v27 = vrot.slane %v2695_v63, 1  ;;  %v1148_v29 = vpack.c.bf16 %v2738_v18, %v2732_v14  ;;  %v2757_v30 = vpack.c.bf16 %v2665_v50, %v2616_v22  ;;  %v755_v31 = vrot.slane %v2665_v50, 2  ;;  %v2328_v8 = vld [vmem:[%s3036_s2 + $0xe0] sm:$0xff]  }
  0x32   : > { %2081 = vmatprep.mubr.msk.bf16.mxu0 %vm482_vm2, %v1024_v11  ;;  %v756_v34 = vrot.slane %v2672_v53, 2  ;;  %v2767_v35 = vsel %vm739_vm3, %v749_v21, %v750_v43  ;;  %v2770_v36 = vsel %vm739_vm3, %v752_v23, %v753_v10  ;;  %v758_v39 = vrot.slane %v2675_v54, 2  ;;  %v2332_v10 = vld [vmem:[%s3036_s2 + $0xf0] sm:$0xff]   ;;  %v2333_v11 = vld [vmem:[%s3036_s2 + $0x60] sm:$0xff]   ;;  %v2335_v21 = vld [vmem:[%s3036_s2 + $0x68] sm:$0xff]   ;;  %p2344_p1 = pnand %p2343_p0, %p2527_p3  ;;  %p2351_p6 = por %p2350_p5, %p2349_p4 }
  0x33   : > { %2088 = vmatpush3.bf16.msra.mxu0 %v2314_v47  ;;  %v759_v41 = vrot.slane %v2678_v55, 2  ;;  %v587_v43 = vsel %vm584_vm1, %v585_v24, %v586_v27  ;;  %v1149_v44 = vpack.c.bf16 %v2770_v36, %v2767_v35  ;;  %v2788_v45 = vpack.c.bf16 %v2689_v61, %v2675_v54  ;;  %v2323_v55 = vld [vmem:[%s3036_s2 + $0x38] sm:$0xff]   ;;  %v2337_v24 = vld [vmem:[%s3036_s2 + $0x70] sm:$0xff]  }
  0x34   : > { %2012 = vmatpush3.bf16.msra.mxu1 %v2315_v49  ;;  %2089 = vmatprep.subr.bf16.mxu0 %v2316_v5  ;;  %v2794_v47 = vsel %vm739_vm3, %v755_v31, %v756_v34  ;;  %v761_v49 = vrot.slane %v2689_v61, 2  ;;  %v762_v51 = vrot.slane %v2692_v62, 2  ;;  %v1144_v52 = vrot.slane %v2703_v1, 2  ;;  %p2345_p2 = pneg %p2344_p1 }
  0x35   : > { %2021 = vmatprep.subr.bf16.mxu1 %v2317_v13  ;;  %v2797_v48 = vsel %vm739_vm3, %v758_v39, %v759_v41  ;;  %v1145_v53 = vrot.slane %v2706_v2, 2  ;;  %v617_v56 = vpack.c.bf16 %v2633_v33, %v587_v43  ;;  %v2324_v33 = vld [vmem:[%s3036_s2 + $0xd0] sm:$0xff]   ;;  %v618_v62 = vpack.c.bf16 %v2642_v38, %v2639_v37 }
  0x36   : > { %2082 = vmatmul.mubr.msk.bf16.gmra.mrb[4].mxu0 %vm482_vm2, %v1025_v25  ;;  %v1150_v57 = vpack.c.bf16 %v2797_v48, %v2794_v47  ;;  %v2813_v58 = vsel %vm739_vm3, %v761_v49, %v762_v51  ;;  %v741_v37 = vrot.slane %v2695_v63, 2  ;;  %v740_v38 = vrot.slane %v2630_v32, 2  ;;  %v445_v25 = vld [vmem:[%s2580_s14 + $0x98] sm:$0x3]  ;;  %p2352_p7 = pnand %p2351_p6, %p2345_p2 }
  0x37   : > { %2014 = vmatmul.mubr.msk.bf16.vlgmr.msra.gmra.mrb[0].mxu1 %vm482_vm2, %v2699_v0  ;;  %2090 = vmatpush3.bf16.msra.mxu0 %v2316_v5  ;;  %v2816_v59 = vsel %vm739_vm3, %v1144_v52, %v1145_v53  ;;  %v2838_v5 = vpack.c.bf16 %v2714_v6, %v2649_v40  ;;  %v2329_v40 = vld [vmem:[%s3036_s2 + $0x50] sm:$0xff]   ;;  %v620_v32 = vpack.c.bf16 %v2726_v12, %v2717_v7  ;;  %v2330_v6 = vld [vmem:[%s3036_s2 + $0xe8] sm:$0xff]  }
  0x38   : > { %2022 = vmatpush3.bf16.msra.mxu1 %v2317_v13  ;;  %2091 = vmatprep.subr.bf16.mxu0 %v2318_v26  ;;  %v1151_v2 = vpack.c.bf16 %v2816_v59, %v2813_v58  ;;  %v742_v63 = vsel %vm739_vm3, %v740_v38, %v741_v37  ;;  %v2868_v7 = vld [vmem:[%s2580_s14 + $0x90] sm:$0xff]  ;;  %v773_v12 = vpack.c.bf16 %v2767_v35, %v2738_v18  ;;  %v2336_v18 = vld [vmem:[%s3036_s2 + $0x100] sm:$0xff]  }
  0x39   : > { %2023 = vmatprep.subr.bf16.mxu1 %v2319_v28  ;;  %2093 = vmatprep.mubr.msk.bf16.mxu0 %vm482_vm2, %v1148_v29  ;;  %v772_v9 = vpack.c.bf16 %v2732_v14, %v742_v63  ;;  %v1270_v13 = vpack.c.bf16 %v2868_v7, %v2703_v1  ;;  %v2334_v14 = vld [vmem:[%s3036_s2 + $0xf8] sm:$0xff]   ;;  %v774_v23 = vpack.c.bf16 %v2794_v47, %v2770_v36  ;;  %v1382_v27 = vrot.slane %v2868_v7, 1  ;;  %v2338_v29 = vld [vmem:[%s3036_s2 + $0x108] sm:$0xff]   ;;  %v2340_v35 = vld [vmem:[%s3036_s2 + $0x110] sm:$0xff]  }
  0x3a   : > { %2017 = vmatprep.mubr.msk.bf16.mxu1 %vm482_vm2, %v2757_v30  ;;  %v894_v31 = vpack.c.bf16 %v2601_v17, %v2595_v15  ;;  %v895_v15 = vpack.c.bf16 %v2616_v22, %v2608_v19  ;;  %v2341_v36 = vld [vmem:[%s3036_s2 + $0x118] sm:$0xff]   ;;  %v896_v39 = vpack.c.bf16 %v2675_v54, %v2665_v50  ;;  %v897_v19 = vpack.c.bf16 %v2703_v1, %v2689_v61 }
  0x3b   : > { %2092 = vmatpush3.bf16.msra.mxu0 %v2318_v26  ;;  %v775_v26 = vpack.c.bf16 %v2813_v58, %v2797_v48  ;;  %v1496_v22 = vrot.slane %v2868_v7, 2 }
  0x3c   : > { %2024 = vmatpush3.bf16.msra.mxu1 %v2319_v28  ;;  %2101 = vmatprep.subr.bf16.mxu0 %v2320_v42  ;;  %v1383_v28 = vrot.slane %v445_v25, 1 }
  0x3d   : > { %2025 = vmatprep.subr.bf16.mxu1 %v2321_v20 }
  0x3e   : > { %2094 = vmatmul.mubr.msk.bf16.vlgmr.msra.gmra.mrb[0].mxu0 %vm482_vm2, %v1149_v44  ;;  %v1384_v34 = vsel %vm584_vm1, %v1382_v27, %v1383_v28 }
  0x3f   : > { %2018 = vmatmul.mubr.msk.bf16.gmra.mrb[4].mxu1 %vm482_vm2, %v2788_v45  ;;  %2102 = vmatpush3.bf16.msra.mxu0 %v2320_v42  ;;  %v1386_v17 = vpack.c.bf16 %v1384_v34, %v2735_v16  ;;  %v1497_v16 = vrot.slane %v445_v25, 2 }
  0x40   : > { %2026 = vmatpush3.bf16.msra.mxu1 %v2321_v20  ;;  %2103 = vmatprep.subr.bf16.mxu0 %v2322_v46  ;;  %v1765_v20 = vld [vmem:[%s3039_s5] ss:$0 sm:$0xff] }
  0x41   : > { %2027 = vmatprep.subr.bf16.mxu1 %v2323_v55  ;;  %2097 = vmatprep.mubr.msk.bf16.mxu0 %vm482_vm2, %v1150_v57  ;;  %v1498_v50 = vsel %vm739_vm3, %v1496_v22, %v1497_v16 }
  0x42   : > { %2029 = vmatprep.mubr.msk.bf16.mxu1 %vm482_vm2, %v617_v56  ;;  %v1500_v54 = vpack.c.bf16 %v1498_v50, %v2816_v59 }
  0x43   : > { %2104 = vmatpush3.bf16.msra.mxu0 %v2322_v46  ;;  %v1908_v46 = vld [vmem:[%s3037_s3] ss:$0 sm:$0xff] }
  0x44   : > { %2028 = vmatpush3.bf16.msra.mxu1 %v2323_v55  ;;  %2105 = vmatprep.subr.bf16.mxu0 %v2324_v33 }
  0x45   : > { %2037 = vmatprep.subr.bf16.mxu1 %v2325_v60 }
  0x46   : > { %2098 = vmatmul.mubr.msk.bf16.gmra.mrb[4].mxu0 %vm482_vm2, %v1151_v2 }
  0x47   : > { %2030 = vmatmul.mubr.msk.bf16.vlgmr.msra.gmra.mrb[0].mxu1 %vm482_vm2, %v618_v62  ;;  %2106 = vmatpush3.bf16.msra.mxu0 %v2324_v33 }
  0x48   : > { %2038 = vmatpush3.bf16.msra.mxu1 %v2325_v60  ;;  %2107 = vmatprep.subr.bf16.mxu0 %v2326_v3 }
  0x49   : > { %2039 = vmatprep.subr.bf16.mxu1 %v2327_v4  ;;  %2109 = vmatprep.mubr.msk.bf16.mxu0 %vm482_vm2, %v2699_v0  ;;  %v2331_v0 = vld [vmem:[%s3036_s2 + $0x58] sm:$0xff]  }
  0x4a   : > { %2033 = vmatprep.mubr.msk.bf16.mxu1 %vm482_vm2, %v2838_v5 }
  0x4b   : > { %2108 = vmatpush3.bf16.msra.mxu0 %v2326_v3 }
  0x4c   : > { %2040 = vmatpush3.bf16.msra.mxu1 %v2327_v4  ;;  %2117 = vmatprep.subr.bf16.mxu0 %v2328_v8 }
  0x4d   : > { %2041 = vmatprep.subr.bf16.mxu1 %v2329_v40 }
  0x4e   : > { %2110 = vmatmul.mubr.msk.bf16.vlgmr.msra.gmra.mrb[0].mxu0 %vm482_vm2, %v2757_v30  ;;  %v2339_v30 = vld [vmem:[%s3036_s2 + $0x78] sm:$0xff]  }
  0x4f   : > { %2034 = vmatmul.mubr.msk.bf16.gmra.mrb[4].mxu1 %vm482_vm2, %v620_v32  ;;  %2118 = vmatpush3.bf16.msra.mxu0 %v2328_v8 }
  0x50   : > { %2042 = vmatpush3.bf16.msra.mxu1 %v2329_v40  ;;  %2119 = vmatprep.subr.bf16.mxu0 %v2330_v6 }
  0x51   : > { %2043 = vmatprep.subr.bf16.mxu1 %v2331_v0  ;;  %2113 = vmatprep.mubr.msk.bf16.mxu0 %vm482_vm2, %v2788_v45 }
  0x52   : > { %2045 = vmatprep.mubr.msk.bf16.mxu1 %vm482_vm2, %v772_v9 }
  0x53   : > { %2120 = vmatpush3.bf16.msra.mxu0 %v2330_v6 }
  0x54   : > { %2044 = vmatpush3.bf16.msra.mxu1 %v2331_v0  ;;  %2121 = vmatprep.subr.bf16.mxu0 %v2332_v10 }
  0x55   : > { %2053 = vmatprep.subr.bf16.mxu1 %v2333_v11 }
  0x56   : > { %2114 = vmatmul.mubr.msk.bf16.gmra.mrb[4].mxu0 %vm482_vm2, %v1270_v13 }
  0x57   : > { %2046 = vmatmul.mubr.msk.bf16.vlgmr.msra.gmra.mrb[0].mxu1 %vm482_vm2, %v773_v12  ;;  %2122 = vmatpush3.bf16.msra.mxu0 %v2332_v10 }
  0x58   : > { %2054 = vmatpush3.bf16.msra.mxu1 %v2333_v11  ;;  %2123 = vmatprep.subr.bf16.mxu0 %v2334_v14 }
  0x59   : > { %2055 = vmatprep.subr.bf16.mxu1 %v2335_v21  ;;  %2125 = vmatprep.mubr.msk.bf16.mxu0 %vm482_vm2, %v618_v62 }
  0x5a   : > { %2049 = vmatprep.mubr.msk.bf16.mxu1 %vm482_vm2, %v774_v23 }
  0x5b   : > { %2124 = vmatpush3.bf16.msra.mxu0 %v2334_v14 }
  0x5c   : > { %2056 = vmatpush3.bf16.msra.mxu1 %v2335_v21  ;;  %2133 = vmatprep.subr.bf16.mxu0 %v2336_v18 }
  0x5d   : > { %2057 = vmatprep.subr.bf16.mxu1 %v2337_v24 }
  0x5e   : > { %2126 = vmatmul.mubr.msk.bf16.vlgmr.msra.gmra.mrb[0].mxu0 %vm482_vm2, %v2838_v5 }
  0x5f   : > { %2050 = vmatmul.mubr.msk.bf16.gmra.mrb[4].mxu1 %vm482_vm2, %v775_v26  ;;  %2134 = vmatpush3.bf16.msra.mxu0 %v2336_v18 }
  0x60   : > { %2058 = vmatpush3.bf16.msra.mxu1 %v2337_v24  ;;  %2135 = vmatprep.subr.bf16.mxu0 %v2338_v29 }
  0x61   : > { %2059 = vmatprep.subr.bf16.mxu1 %v2339_v30  ;;  %2129 = vmatprep.mubr.msk.bf16.mxu0 %vm482_vm2, %v620_v32 }
  0x62   : > { %2061 = vmatprep.mubr.msk.bf16.mxu1 %vm482_vm2, %v894_v31 }
  0x63   : > { %2136 = vmatpush3.bf16.msra.mxu0 %v2338_v29 }
  0x64   : > { %2060 = vmatpush3.bf16.msra.mxu1 %v2339_v30  ;;  %2137 = vmatprep.subr.bf16.mxu0 %v2340_v35 }
  0x66   : > { %2130 = vmatmul.mubr.msk.bf16.gmra.mrb[4].mxu0 %vm482_vm2, %v1386_v17 }
  0x67   : > { %2062 = vmatmul.mubr.msk.bf16.vlgmr.msra.gmra.mrb[0].mxu1 %vm482_vm2, %v895_v15  ;;  %2138 = vmatpush3.bf16.msra.mxu0 %v2340_v35 }
  0x68   : > { %2141 = vmatprep.mubr.msk.bf16.mxu0 %vm482_vm2, %v773_v12  ;;  %2139 = vmatprep.subr.bf16.mxu0 %v2341_v36 }
  0x69   : > { %2065 = vmatprep.mubr.msk.bf16.mxu1 %vm482_vm2, %v896_v39 }
  0x6b   : > { %2140 = vmatpush3.bf16.msra.mxu0 %v2341_v36 }
  0x6e   : > { %2142 = vmatmul.mubr.msk.bf16.vlgmr.msra.gmra.mrb[0].mxu0 %vm482_vm2, %v774_v23 }
  0x6f   : > { %2066 = vmatmul.mubr.msk.bf16.gmra.mrb[4].mxu1 %vm482_vm2, %v897_v19  ;;  %2145 = vmatprep.mubr.msk.bf16.mxu0 %vm482_vm2, %v775_v26 }
  0x76   : > { %2146 = vmatmul.mubr.msk.bf16.gmra.mrb[4].mxu0 %vm482_vm2, %v1500_v54 }
 0x13a   : > { %v2063_v41 = vpop.f32.mrb[0].mxu1 }
 0x13b   : > { %v977_v42 = vpop.f32.mrb[1].mxu1  ;;  %v2149_v43 = vadd.f32 %v2063_v41, %v1765_v20 }
 0x13c   : > { %v2064_v61 = vpop.f32.mrb[2].mxu1  ;;  %v2151_v44 = vadd.f32 %v1765_v20, %v977_v42 }
 0x13d   : > { %v980_v1 = vpop.f32.mrb[3].mxu1  ;;  %v2153_v48 = vadd.f32 %v2064_v61, %v1765_v20 }
 0x13e   : > { %v2155_v53 = vadd.f32 %v1765_v20, %v980_v1 }
 0x141   : > { %v2143_v45 = vpop.f32.mrb[0].mxu0 }
 0x142   : > { %v2067_v47 = vpop.f32.mrb[4].mxu1  ;;  %v2150_v49 = vadd.f32 %v2149_v43, %v2143_v45  ;;  %v1571_v51 = vpop.f32.mrb[1].mxu0 }
 0x143   : > { %v993_v52 = vpop.f32.mrb[5].mxu1  ;;  %v2152_v55 = vadd.f32 %v2151_v44, %v1571_v51  ;;  %v2144_v56 = vpop.f32.mrb[2].mxu0  ;;  %v2157_v5 = vadd.f32 %v2067_v47, %v1765_v20 }
 0x144   : > { %v2068_v57 = vpop.f32.mrb[6].mxu1  ;;  %v1619_v58 = vadd.f32 %v2150_v49, %v1908_v46  ;;  %v2154_v59 = vadd.f32 %v2153_v48, %v2144_v56  ;;  %v1574_v33 = vpop.f32.mrb[3].mxu0  ;;  %v2159_v37 = vadd.f32 %v1765_v20, %v993_v52 }
 0x145   : > { %v996_v60 = vpop.f32.mrb[7].mxu1  ;;  %v1617_v62 = vadd.f32 %v2152_v55, %v1908_v46  ;;  %v2156_v2 = vadd.f32 %v2155_v53, %v1574_v33  ;;  %v2161_v8 = vadd.f32 %v2068_v57, %v1765_v20 }
 0x146   : > { %1627 = vst.msk [vmem:[%s2954_s12 + $0x10] sm:$0xff] %vm482_vm2, %v1619_v58  ;;  %v1620_v3 = vadd.f32 %v2154_v59, %v1908_v46  ;;  %v2163_v63 = vadd.f32 %v1765_v20, %v996_v60 }
 0x147   : > { %1625 = vst.msk [vmem:[%s2954_s12] sm:$0xff] %vm482_vm2, %v1617_v62  ;;  %v1618_v4 = vadd.f32 %v2156_v2, %v1908_v46 }
 0x148   : > { %1628 = vst.msk [vmem:[%s2954_s12 + $0x18] sm:$0xff] %vm482_vm2, %v1620_v3 }
 0x149   : > { %1626 = vst.msk [vmem:[%s2954_s12 + $0x8] sm:$0xff] %vm482_vm2, %v1618_v4  ;;  %v2147_v38 = vpop.f32.mrb[4].mxu0 }
 0x14a   : > { %v2158_v40 = vadd.f32 %v2157_v5, %v2147_v38  ;;  %v1587_v32 = vpop.f32.mrb[5].mxu0 }
 0x14b   : > { %v2160_v6 = vadd.f32 %v2159_v37, %v1587_v32  ;;  %v2148_v0 = vpop.f32.mrb[6].mxu0 }
 0x14c   : > { %v1623_v9 = vadd.f32 %v2158_v40, %v1908_v46  ;;  %v2162_v7 = vadd.f32 %v2161_v8, %v2148_v0  ;;  %v1590_v10 = vpop.f32.mrb[7].mxu0 }
 0x14d   : > { %v1621_v11 = vadd.f32 %v2160_v6, %v1908_v46  ;;  %v2164_v12 = vadd.f32 %v2163_v63, %v1590_v10 }
 0x14e   : > { %1631 = vst.msk [vmem:[%s2954_s12 + $0x30] sm:$0xff] %vm482_vm2, %v1623_v9  ;;  %v1624_v13 = vadd.f32 %v2162_v7, %v1908_v46 }
 0x14f   : > { %1629 = vst.msk [vmem:[%s2954_s12 + $0x20] sm:$0xff] %vm482_vm2, %v1621_v11  ;;  %v1622_v14 = vadd.f32 %v2164_v12, %v1908_v46 }
 0x150   : > { %1632 = vst.msk [vmem:[%s2954_s12 + $0x38] sm:$0xff] %vm482_vm2, %v1624_v13 }
 0x151   : > { %1630 = vst.msk [vmem:[%s2954_s12 + $0x28] sm:$0xff] %vm482_vm2, %v1622_v14 }
 0x152   : > { %2355 = shalt.err (!%p2352_p7)
}
 0x153   : > { %s2356_s17 = scalar_lea.hbm %s2970_s16, 1024  ;;  %s2360_s20 = scalar_lea.hbm %s3040_s6, 8192 }
 0x154   : > { %p2357_p9 = scmp.ne.s32.totalorder %s2970_s16, %s2356_s17  ;;  %p2361_p12 = scmp.lt.u32.totalorder %s2970_s16, %s3040_s6 }
 0x155   : > { %p2362_p13 = scmp.lt.u32.totalorder %s2360_s20, %s2356_s17  ;;  %p2364_p1 = scmp.lt.u32.totalorder %s2356_s17, %s2970_s16 }
 0x156   : > { %p2358_p10 = pnand %p2357_p9, %p2527_p3 }
 0x157   : > { %p2363_p0 = por %p2362_p13, %p2361_p12 }
 0x158   : > { %p2359_p11 = pneg %p2358_p10 }
 0x159   : > { %p2365_p2 = por %p2364_p1, %p2363_p0 }
 0x15b   : > { %p2366_p4 = pnand %p2365_p2, %p2359_p11 }
 0x15d   : > { %2369 = shalt.err (!%p2366_p4)
}
 0x15e   : > { %s2439_s12 = smov 128   ;;  %s2440_s30 = smov 8  }
 0x15f   : > { %2231 = dma.vmem_to_hbm [thread:$0]  (%p2527_p3), %s2972_s25, 1024, %s2970_s16, %s2982_s7, %s2439_s12, %s2439_s12, %s2440_s30  }
 0x160 PF: > { %p2237_p5 = scmp.ge.s32.totalorder %s2436_s28, 2  ;;  %s1664_s24 = sand.u32 1, %s2408_s21  }
 0x161   : > { %s1665_s13 = scalar_lea.sflag [#allocation3], %s1664_s24 }
 0x162   : > { %p2234_p6 = pnand %p2237_p5, %p2536_p8 }
 0x164   : > { %2403 = dma.done.wait (!%p2234_p6), %s1665_s13, 1024  }
 0x165   : > { %2405 = vsyncadd (!%p2234_p6), %s1665_s13, 4294966272  ;;  %s19_s28 = sadd.s32 1, %s2436_s28   ;;  %s3053_s24 = sld [smem:[#allocation5_spill]] }
 0x166   : > { %p16_p7 = scmp.ge.s32.totalorder %s19_s28, 10   ;;  %s3054_s25 = sld [smem:[#allocation6_spill]] }
 0x167   : > { %s3055_s26 = sld [smem:[#allocation7_spill]]  ;;  %s3056_s27 = sld [smem:[#allocation8_spill]] }
 0x168   : > { %s3057_s21 = smov %s2412_s22  ;;  %s3058_s22 = smov %s2416_s23 }
 0x169   : > { %s3059_s23 = smov %s2545_s15  ;;  %18 = sbr.rel (!%p16_p7) target bundleno = 7 (0x7), region = 90 }
 0x170   :  { %1670 = vsyncpa [#allocation3], 1 }
 0x171   :  { %1672 = vsyncpa [#allocation3 + $0x1], 1 }

</bundles_post_ra>
